<compile_context>
chip_gen: v7x
topology: tpu7x:2x2x1
jax: 0.10.0
libtpu: 0.0.40
codegen_flags: <defaults>
</compile_context>

<pallas_src>
import jax
import jax.numpy as jnp
from jax import lax
from jax.experimental import pallas as pl
from jax.experimental.pallas import tpu as pltpu


# ----------------------------------------------------------------------------
# Pallas kernel: whole forward pass (8 GEMM + bias + activation stages)
# ----------------------------------------------------------------------------
_ACTS = ("relu", "relu", "relu", "none", "relu", "relu", "relu", "sigmoid")


def _autoencoder_fused_kernel(*refs):
    """refs = (x, m1, b1, m2, b2, ..., m8, b8, out).

    Every layer (conv / linear / transposed conv) has been pre-lowered to a
    dense matrix, so each stage is: h = act(h @ M + b), all on the MXU/VPU,
    with h kept resident in vregs/VMEM for the whole forward pass.
    """
    x_ref, out_ref = refs[0], refs[-1]
    layer_refs = refs[1:-1]

    h = x_ref[...]                                            # (N, Cin*Lin)
    for idx, act in enumerate(_ACTS):
        m = layer_refs[2 * idx][...]                          # (K, Cout*Lout)
        b = layer_refs[2 * idx + 1][...]                      # (1, Cout*Lout)
        h = jnp.dot(h, m, preferred_element_type=jnp.float32) + b
        if act == "relu":
            h = jnp.maximum(h, 0.0)
        elif act == "sigmoid":
            h = jax.nn.sigmoid(h)
        # act == "none": encoder Linear has no activation.
    out_ref[...] = h


def _fused_forward(x_flat, operands):
    """x_flat: (N, 80) float32; operands: 16 arrays (matrix, bias) x 8 layers."""
    n = x_flat.shape[0]
    out_dim = operands[-2].shape[1]                           # 1 * 78
    args = [x_flat] + list(operands)
    in_specs = [pl.BlockSpec(a.shape, lambda i: (0, 0)) for a in args]

    return pl.pallas_call(
        _autoencoder_fused_kernel,
        out_shape=jax.ShapeDtypeStruct((n, out_dim), jnp.float32),
        grid_spec=pl.GridSpec(
            grid=(1,),
            in_specs=in_specs,
            out_specs=pl.BlockSpec((n, out_dim), lambda i: (0, 0)),
        ),
        compiler_params=pltpu.CompilerParams(
            dimension_semantics=("arbitrary",),
            vmem_limit_bytes=32 * 1024 * 1024,
        ),
    )(*args)


# ----------------------------------------------------------------------------
# One-time weight packing: lower each (transposed) conv to a dense matrix
# acting on the channel-major flattened activation (index = c * L + l).
# ----------------------------------------------------------------------------
def _conv1d_matrix(w, l_in, stride, pad):
    """w: (Cout, Cin, k) torch Conv1d weight -> M: (Cin*Lin, Cout*Lout)."""
    w = jnp.asarray(w, jnp.float32)
    c_out, c_in, k = w.shape
    l_out = (l_in + 2 * pad - k) // stride + 1
    p = jnp.arange(l_in)
    m4 = jnp.zeros((c_in, l_in, c_out, l_out), jnp.float32)
    for j in range(k):
        src = stride * jnp.arange(l_out) + j - pad            # input pos per out pos
        sel = (p[:, None] == src[None, :]).astype(jnp.float32)  # OOB never matches
        m4 = m4 + jnp.einsum("oi,pl->ipol", w[:, :, j], sel)
    return m4.reshape(c_in * l_in, c_out * l_out), l_out


def _convT1d_matrix(w, l_in, stride, pad, out_pad):
    """w: (Cin, Cout, k) torch ConvTranspose1d weight -> M: (Cin*Lin, Cout*Lout)."""
    w = jnp.asarray(w, jnp.float32)
    c_in, c_out, k = w.shape
    l_out = (l_in - 1) * stride - 2 * pad + k + out_pad
    lo = jnp.arange(l_out)
    m4 = jnp.zeros((c_in, l_in, c_out, l_out), jnp.float32)
    for j in range(k):
        dst = stride * jnp.arange(l_in) + j - pad             # output pos per in pos
        sel = (dst[:, None] == lo[None, :]).astype(jnp.float32)  # OOB contributions dropped
        m4 = m4 + jnp.einsum("io,ml->imol", w[:, :, j], sel)
    return m4.reshape(c_in * l_in, c_out * l_out), l_out


def _bias_row(b, l_out):
    """Per-channel bias -> (1, Cout*Lout) row in channel-major flat layout."""
    return jnp.repeat(jnp.asarray(b, jnp.float32), l_out).reshape(1, -1)


def pack_params(params, l_in):
    ops = []
    L = l_in
    # encoder convs
    m, L = _conv1d_matrix(params["conv1_w"], L, stride=2, pad=1)
    ops += [m, _bias_row(params["conv1_b"], L)]
    m, L = _conv1d_matrix(params["conv2_w"], L, stride=2, pad=1)
    ops += [m, _bias_row(params["conv2_b"], L)]
    m, L = _conv1d_matrix(params["conv3_w"], L, stride=2, pad=1)
    ops += [m, _bias_row(params["conv3_b"], L)]
    assert 32 * L == params["fc_enc_w"].shape[1], (L, params["fc_enc_w"].shape)
    # encoder Linear (no activation), decoder Linear (+ReLU)
    ops += [jnp.asarray(params["fc_enc_w"], jnp.float32).T,
            jnp.asarray(params["fc_enc_b"], jnp.float32).reshape(1, -1)]
    ops += [jnp.asarray(params["fc_dec_w"], jnp.float32).T,
            jnp.asarray(params["fc_dec_b"], jnp.float32).reshape(1, -1)]
    # decoder transposed convs (Unflatten is a no-op in channel-major flat layout)
    m, L = _convT1d_matrix(params["convT1_w"], L, stride=2, pad=1, out_pad=1)
    ops += [m, _bias_row(params["convT1_b"], L)]
    m, L = _convT1d_matrix(params["convT2_w"], L, stride=2, pad=1, out_pad=0)
    ops += [m, _bias_row(params["convT2_b"], L)]
    m, L = _convT1d_matrix(params["convT3_w"], L, stride=2, pad=0, out_pad=0)
    ops += [m, _bias_row(params["convT3_b"], L)]
    return {"operands": ops, "l_out": L}


def conv_autoencoder_forward(x, packed):
    """x: (N, 1, L_in) float32 -> (N, 1, L_out) float32 (L_in=80 -> L_out=78)."""
    n = x.shape[0]
    x_flat = x.reshape(n, -1).astype(jnp.float32)             # Cin = 1
    out_flat = _fused_forward(x_flat, packed["operands"])
    return out_flat.reshape(n, 1, packed["l_out"])


# ----------------------------------------------------------------------------
# Deterministic synthetic parameters (torch layouts / torch-style init scale)
# ----------------------------------------------------------------------------
def init_params(key):
    keys = jax.random.split(key, 16)
    ki = iter(keys)

    def unif(k, shape, fan_in):
        bound = 1.0 / (float(fan_in) ** 0.5)
        return jax.random.uniform(k, shape, jnp.float32, -bound, bound)

    p = {}
    p["conv1_w"] = unif(next(ki), (16, 1, 3), 3)
    p["conv1_b"] = unif(next(ki), (16,), 3)
    p["conv2_w"] = unif(next(ki), (32, 16, 3), 48)
    p["conv2_b"] = unif(next(ki), (32,), 48)
    p["conv3_w"] = unif(next(ki), (32, 32, 3), 96)
    p["conv3_b"] = unif(next(ki), (32,), 96)
    p["fc_enc_w"] = unif(next(ki), (32, 320), 320)
    p["fc_enc_b"] = unif(next(ki), (32,), 320)
    p["fc_dec_w"] = unif(next(ki), (320, 32), 32)
    p["fc_dec_b"] = unif(next(ki), (320,), 32)
    p["convT1_w"] = unif(next(ki), (32, 32, 3), 96)
    p["convT1_b"] = unif(next(ki), (32,), 96)
    p["convT2_w"] = unif(next(ki), (32, 16, 3), 48)
    p["convT2_b"] = unif(next(ki), (16,), 48)
    p["convT3_w"] = unif(next(ki), (16, 1, 2), 32)
    p["convT3_b"] = unif(next(ki), (1,), 32)
    return p


# ----------------------------------------------------------------------------
# Independent pure-JAX reference (for correctness verification only)
# ----------------------------------------------------------------------------
def _conv1d_ref(x, w, b, stride, pad):
    y = lax.conv_general_dilated(x, w, window_strides=(stride,),
                                 padding=[(pad, pad)],
                                 dimension_numbers=("NCH", "OIH", "NCH"))
    return y + b[None, :, None]


def _convT1d_ref(x, w, b, stride, pad, out_pad):
    k = w.shape[2]
    w_conv = jnp.flip(w, axis=2).transpose(1, 0, 2)           # (Cout, Cin, k)
    y = lax.conv_general_dilated(x, w_conv, window_strides=(1,),
                                 padding=[(k - 1 - pad, k - 1 - pad + out_pad)],
                                 lhs_dilation=(stride,),
                                 dimension_numbers=("NCH", "OIH", "NCH"))
    return y + b[None, :, None]


def reference_forward(x, p):
    h = jax.nn.relu(_conv1d_ref(x, p["conv1_w"], p["conv1_b"], 2, 1))
    h = jax.nn.relu(_conv1d_ref(h, p["conv2_w"], p["conv2_b"], 2, 1))
    h = jax.nn.relu(_conv1d_ref(h, p["conv3_w"], p["conv3_b"], 2, 1))
    n = h.shape[0]
    h = h.reshape(n, -1)
    h = h @ p["fc_enc_w"].T + p["fc_enc_b"]
    h = jax.nn.relu(h @ p["fc_dec_w"].T + p["fc_dec_b"])
    h = h.reshape(n, 32, 10)
    h = jax.nn.relu(_convT1d_ref(h, p["convT1_w"], p["convT1_b"], 2, 1, 1))
    h = jax.nn.relu(_convT1d_ref(h, p["convT2_w"], p["convT2_b"], 2, 1, 0))
    h = jax.nn.sigmoid(_convT1d_ref(h, p["convT3_w"], p["convT3_b"], 2, 0, 0))
    return h


if __name__ == "__main__":
    key = jax.random.PRNGKey(0)
    k_x, k_p = jax.random.split(key)

    # (N, C, L) = (2, 1, 80): three stride-2 convs -> length 10, matching
    # the module's Linear(32*10, 32).
    x = jax.random.normal(k_x, (2, 1, 80), jnp.float32)
    params = init_params(k_p)
    packed = pack_params(params, l_in=80)

    out = conv_autoencoder_forward(x, packed)
    out = jax.block_until_ready(out)

    assert out.shape == (2, 1, 78), out.shape
    assert out.dtype == jnp.float32
    assert bool(jnp.all(jnp.isfinite(out)))
    assert bool(jnp.all((out >= 0.0) & (out <= 1.0)))          # sigmoid range

    ref = reference_forward(x, params)
    max_err = float(jnp.max(jnp.abs(out - ref)))
    assert jnp.allclose(out, ref, atol=1e-3, rtol=1e-3), max_err

    print("KERNEL_OK")
</pallas_src>

<mosaic_0001>
module attributes {stable_mosaic.version = 11 : i64} {
  func.func @_autoencoder_fused_kernel(%arg0: i32, %arg1: memref<2x80xf32, #tpu.memory_space<vmem>>, %arg2: memref<80x640xf32, #tpu.memory_space<vmem>>, %arg3: memref<1x640xf32, #tpu.memory_space<vmem>>, %arg4: memref<640x640xf32, #tpu.memory_space<vmem>>, %arg5: memref<1x640xf32, #tpu.memory_space<vmem>>, %arg6: memref<640x320xf32, #tpu.memory_space<vmem>>, %arg7: memref<1x320xf32, #tpu.memory_space<vmem>>, %arg8: memref<320x32xf32, #tpu.memory_space<vmem>>, %arg9: memref<1x32xf32, #tpu.memory_space<vmem>>, %arg10: memref<32x320xf32, #tpu.memory_space<vmem>>, %arg11: memref<1x320xf32, #tpu.memory_space<vmem>>, %arg12: memref<320x640xf32, #tpu.memory_space<vmem>>, %arg13: memref<1x640xf32, #tpu.memory_space<vmem>>, %arg14: memref<640x624xf32, #tpu.memory_space<vmem>>, %arg15: memref<1x624xf32, #tpu.memory_space<vmem>>, %arg16: memref<624x78xf32, #tpu.memory_space<vmem>>, %arg17: memref<1x78xf32, #tpu.memory_space<vmem>>, %arg18: memref<2x78xf32, #tpu.memory_space<vmem>>) attributes {dimension_semantics = [#tpu.dimension_semantics<arbitrary>], iteration_bounds = array<i64: 1>, scalar_prefetch = 0 : i64, scratch_operands = 0 : i64, tpu.core_type = #tpu.core_type<tc>, window_params = [{pipeline_mode = #tpu.pipeline_mode<synchronous>, transform_indices = @transform_0, window_bounds = array<i64: 2, 80>}, {pipeline_mode = #tpu.pipeline_mode<synchronous>, transform_indices = @transform_1, window_bounds = array<i64: 80, 640>}, {pipeline_mode = #tpu.pipeline_mode<synchronous>, transform_indices = @transform_2, window_bounds = array<i64: 1, 640>}, {pipeline_mode = #tpu.pipeline_mode<synchronous>, transform_indices = @transform_3, window_bounds = array<i64: 640, 640>}, {pipeline_mode = #tpu.pipeline_mode<synchronous>, transform_indices = @transform_4, window_bounds = array<i64: 1, 640>}, {pipeline_mode = #tpu.pipeline_mode<synchronous>, transform_indices = @transform_5, window_bounds = array<i64: 640, 320>}, {pipeline_mode = #tpu.pipeline_mode<synchronous>, transform_indices = @transform_6, window_bounds = array<i64: 1, 320>}, {pipeline_mode = #tpu.pipeline_mode<synchronous>, transform_indices = @transform_7, window_bounds = array<i64: 320, 32>}, {pipeline_mode = #tpu.pipeline_mode<synchronous>, transform_indices = @transform_8, window_bounds = array<i64: 1, 32>}, {pipeline_mode = #tpu.pipeline_mode<synchronous>, transform_indices = @transform_9, window_bounds = array<i64: 32, 320>}, {pipeline_mode = #tpu.pipeline_mode<synchronous>, transform_indices = @transform_10, window_bounds = array<i64: 1, 320>}, {pipeline_mode = #tpu.pipeline_mode<synchronous>, transform_indices = @transform_11, window_bounds = array<i64: 320, 640>}, {pipeline_mode = #tpu.pipeline_mode<synchronous>, transform_indices = @transform_12, window_bounds = array<i64: 1, 640>}, {pipeline_mode = #tpu.pipeline_mode<synchronous>, transform_indices = @transform_13, window_bounds = array<i64: 640, 624>}, {pipeline_mode = #tpu.pipeline_mode<synchronous>, transform_indices = @transform_14, window_bounds = array<i64: 1, 624>}, {pipeline_mode = #tpu.pipeline_mode<synchronous>, transform_indices = @transform_15, window_bounds = array<i64: 624, 78>}, {pipeline_mode = #tpu.pipeline_mode<synchronous>, transform_indices = @transform_16, window_bounds = array<i64: 1, 78>}, {pipeline_mode = #tpu.pipeline_mode<synchronous>, transform_indices = @transform_17, window_bounds = array<i64: 2, 78>}]} {
    %c0 = arith.constant 0 : index
    %c0_0 = arith.constant 0 : index
    %0 = vector.load %arg1[%c0, %c0_0] : memref<2x80xf32, #tpu.memory_space<vmem>>, vector<2x80xf32>
    %c0_1 = arith.constant 0 : index
    %c0_2 = arith.constant 0 : index
    %1 = vector.load %arg2[%c0_1, %c0_2] : memref<80x640xf32, #tpu.memory_space<vmem>>, vector<80x640xf32>
    %c0_3 = arith.constant 0 : index
    %c0_4 = arith.constant 0 : index
    %2 = vector.load %arg3[%c0_3, %c0_4] : memref<1x640xf32, #tpu.memory_space<vmem>>, vector<1x640xf32>
    %cst = arith.constant dense<0.000000e+00> : vector<2x640xf32>
    %3 = tpu.matmul %0, %1, %cst {dimension_numbers = #tpu.dot_dimension_numbers<[1], [0], [0], [1], [0, 0, 1, 1], [], []>} : vector<2x80xf32>, vector<80x640xf32>, vector<2x640xf32> -> vector<2x640xf32>
    %4 = vector.broadcast %2 : vector<1x640xf32> to vector<2x640xf32>
    %5 = arith.addf %3, %4 : vector<2x640xf32>
    %cst_5 = arith.constant 0.000000e+00 : f32
    %6 = vector.broadcast %cst_5 : f32 to vector<2x640xf32>
    %7 = arith.maximumf %5, %6 : vector<2x640xf32>
    %c0_6 = arith.constant 0 : index
    %c0_7 = arith.constant 0 : index
    %8 = vector.load %arg4[%c0_6, %c0_7] : memref<640x640xf32, #tpu.memory_space<vmem>>, vector<640x640xf32>
    %c0_8 = arith.constant 0 : index
    %c0_9 = arith.constant 0 : index
    %9 = vector.load %arg5[%c0_8, %c0_9] : memref<1x640xf32, #tpu.memory_space<vmem>>, vector<1x640xf32>
    %cst_10 = arith.constant dense<0.000000e+00> : vector<2x640xf32>
    %10 = tpu.matmul %7, %8, %cst_10 {dimension_numbers = #tpu.dot_dimension_numbers<[1], [0], [0], [1], [0, 0, 1, 1], [], []>} : vector<2x640xf32>, vector<640x640xf32>, vector<2x640xf32> -> vector<2x640xf32>
    %11 = vector.broadcast %9 : vector<1x640xf32> to vector<2x640xf32>
    %12 = arith.addf %10, %11 : vector<2x640xf32>
    %cst_11 = arith.constant 0.000000e+00 : f32
    %13 = vector.broadcast %cst_11 : f32 to vector<2x640xf32>
    %14 = arith.maximumf %12, %13 : vector<2x640xf32>
    %c0_12 = arith.constant 0 : index
    %c0_13 = arith.constant 0 : index
    %15 = vector.load %arg6[%c0_12, %c0_13] : memref<640x320xf32, #tpu.memory_space<vmem>>, vector<640x320xf32>
    %c0_14 = arith.constant 0 : index
    %c0_15 = arith.constant 0 : index
    %16 = vector.load %arg7[%c0_14, %c0_15] : memref<1x320xf32, #tpu.memory_space<vmem>>, vector<1x320xf32>
    %cst_16 = arith.constant dense<0.000000e+00> : vector<2x320xf32>
    %17 = tpu.matmul %14, %15, %cst_16 {dimension_numbers = #tpu.dot_dimension_numbers<[1], [0], [0], [1], [0, 0, 1, 1], [], []>} : vector<2x640xf32>, vector<640x320xf32>, vector<2x320xf32> -> vector<2x320xf32>
    %18 = vector.broadcast %16 : vector<1x320xf32> to vector<2x320xf32>
    %19 = arith.addf %17, %18 : vector<2x320xf32>
    %cst_17 = arith.constant 0.000000e+00 : f32
    %20 = vector.broadcast %cst_17 : f32 to vector<2x320xf32>
    %21 = arith.maximumf %19, %20 : vector<2x320xf32>
    %c0_18 = arith.constant 0 : index
    %c0_19 = arith.constant 0 : index
    %22 = vector.load %arg8[%c0_18, %c0_19] : memref<320x32xf32, #tpu.memory_space<vmem>>, vector<320x32xf32>
    %c0_20 = arith.constant 0 : index
    %c0_21 = arith.constant 0 : index
    %23 = vector.load %arg9[%c0_20, %c0_21] : memref<1x32xf32, #tpu.memory_space<vmem>>, vector<1x32xf32>
    %cst_22 = arith.constant dense<0.000000e+00> : vector<2x32xf32>
    %24 = tpu.matmul %21, %22, %cst_22 {dimension_numbers = #tpu.dot_dimension_numbers<[1], [0], [0], [1], [0, 0, 1, 1], [], []>} : vector<2x320xf32>, vector<320x32xf32>, vector<2x32xf32> -> vector<2x32xf32>
    %25 = vector.broadcast %23 : vector<1x32xf32> to vector<2x32xf32>
    %26 = arith.addf %24, %25 : vector<2x32xf32>
    %c0_23 = arith.constant 0 : index
    %c0_24 = arith.constant 0 : index
    %27 = vector.load %arg10[%c0_23, %c0_24] : memref<32x320xf32, #tpu.memory_space<vmem>>, vector<32x320xf32>
    %c0_25 = arith.constant 0 : index
    %c0_26 = arith.constant 0 : index
    %28 = vector.load %arg11[%c0_25, %c0_26] : memref<1x320xf32, #tpu.memory_space<vmem>>, vector<1x320xf32>
    %cst_27 = arith.constant dense<0.000000e+00> : vector<2x320xf32>
    %29 = tpu.matmul %26, %27, %cst_27 {dimension_numbers = #tpu.dot_dimension_numbers<[1], [0], [0], [1], [0, 0, 1, 1], [], []>} : vector<2x32xf32>, vector<32x320xf32>, vector<2x320xf32> -> vector<2x320xf32>
    %30 = vector.broadcast %28 : vector<1x320xf32> to vector<2x320xf32>
    %31 = arith.addf %29, %30 : vector<2x320xf32>
    %cst_28 = arith.constant 0.000000e+00 : f32
    %32 = vector.broadcast %cst_28 : f32 to vector<2x320xf32>
    %33 = arith.maximumf %31, %32 : vector<2x320xf32>
    %c0_29 = arith.constant 0 : index
    %c0_30 = arith.constant 0 : index
    %34 = vector.load %arg12[%c0_29, %c0_30] : memref<320x640xf32, #tpu.memory_space<vmem>>, vector<320x640xf32>
    %c0_31 = arith.constant 0 : index
    %c0_32 = arith.constant 0 : index
    %35 = vector.load %arg13[%c0_31, %c0_32] : memref<1x640xf32, #tpu.memory_space<vmem>>, vector<1x640xf32>
    %cst_33 = arith.constant dense<0.000000e+00> : vector<2x640xf32>
    %36 = tpu.matmul %33, %34, %cst_33 {dimension_numbers = #tpu.dot_dimension_numbers<[1], [0], [0], [1], [0, 0, 1, 1], [], []>} : vector<2x320xf32>, vector<320x640xf32>, vector<2x640xf32> -> vector<2x640xf32>
    %37 = vector.broadcast %35 : vector<1x640xf32> to vector<2x640xf32>
    %38 = arith.addf %36, %37 : vector<2x640xf32>
    %cst_34 = arith.constant 0.000000e+00 : f32
    %39 = vector.broadcast %cst_34 : f32 to vector<2x640xf32>
    %40 = arith.maximumf %38, %39 : vector<2x640xf32>
    %c0_35 = arith.constant 0 : index
    %c0_36 = arith.constant 0 : index
    %41 = vector.load %arg14[%c0_35, %c0_36] : memref<640x624xf32, #tpu.memory_space<vmem>>, vector<640x624xf32>
    %c0_37 = arith.constant 0 : index
    %c0_38 = arith.constant 0 : index
    %42 = vector.load %arg15[%c0_37, %c0_38] : memref<1x624xf32, #tpu.memory_space<vmem>>, vector<1x624xf32>
    %cst_39 = arith.constant dense<0.000000e+00> : vector<2x624xf32>
    %43 = tpu.matmul %40, %41, %cst_39 {dimension_numbers = #tpu.dot_dimension_numbers<[1], [0], [0], [1], [0, 0, 1, 1], [], []>} : vector<2x640xf32>, vector<640x624xf32>, vector<2x624xf32> -> vector<2x624xf32>
    %44 = vector.broadcast %42 : vector<1x624xf32> to vector<2x624xf32>
    %45 = arith.addf %43, %44 : vector<2x624xf32>
    %cst_40 = arith.constant 0.000000e+00 : f32
    %46 = vector.broadcast %cst_40 : f32 to vector<2x624xf32>
    %47 = arith.maximumf %45, %46 : vector<2x624xf32>
    %c0_41 = arith.constant 0 : index
    %c0_42 = arith.constant 0 : index
    %48 = vector.load %arg16[%c0_41, %c0_42] : memref<624x78xf32, #tpu.memory_space<vmem>>, vector<624x78xf32>
    %c0_43 = arith.constant 0 : index
    %c0_44 = arith.constant 0 : index
    %49 = vector.load %arg17[%c0_43, %c0_44] : memref<1x78xf32, #tpu.memory_space<vmem>>, vector<1x78xf32>
    %cst_45 = arith.constant dense<0.000000e+00> : vector<2x78xf32>
    %50 = tpu.matmul %47, %48, %cst_45 {dimension_numbers = #tpu.dot_dimension_numbers<[1], [0], [0], [1], [0, 0, 1, 1], [], []>} : vector<2x624xf32>, vector<624x78xf32>, vector<2x78xf32> -> vector<2x78xf32>
    %51 = vector.broadcast %49 : vector<1x78xf32> to vector<2x78xf32>
    %52 = arith.addf %50, %51 : vector<2x78xf32>
    %53 = arith.negf %52 : vector<2x78xf32>
    %54 = math.exp %53 : vector<2x78xf32>
    %cst_46 = arith.constant 1.000000e+00 : f32
    %55 = vector.broadcast %cst_46 : f32 to vector<2x78xf32>
    %56 = arith.addf %55, %54 : vector<2x78xf32>
    %57 = arith.divf %55, %56 : vector<2x78xf32>
    %c0_47 = arith.constant 0 : index
    %c0_48 = arith.constant 0 : index
    %58 = vector.load %arg18[%c0_47, %c0_48] : memref<2x78xf32, #tpu.memory_space<vmem>>, vector<2x78xf32>
    tpu.vector_store %arg18[%c0_47, %c0_48], %57 {strides = array<i32>} : memref<2x78xf32, #tpu.memory_space<vmem>>, vector<2x78xf32>,
    return
  }
  func.func @transform_0(%arg0: i32) -> (i32, i32) {
    %c0_i32 = arith.constant 0 : i32
    %c0_i32_0 = arith.constant 0 : i32
    %c0_i32_1 = arith.constant 0 : i32
    return %c0_i32, %c0_i32_0 : i32, i32
  }
  func.func @transform_1(%arg0: i32) -> (i32, i32) {
    %c0_i32 = arith.constant 0 : i32
    %c0_i32_0 = arith.constant 0 : i32
    %c0_i32_1 = arith.constant 0 : i32
    return %c0_i32, %c0_i32_0 : i32, i32
  }
  func.func @transform_2(%arg0: i32) -> (i32, i32) {
    %c0_i32 = arith.constant 0 : i32
    %c0_i32_0 = arith.constant 0 : i32
    %c0_i32_1 = arith.constant 0 : i32
    return %c0_i32, %c0_i32_0 : i32, i32
  }
  func.func @transform_3(%arg0: i32) -> (i32, i32) {
    %c0_i32 = arith.constant 0 : i32
    %c0_i32_0 = arith.constant 0 : i32
    %c0_i32_1 = arith.constant 0 : i32
    return %c0_i32, %c0_i32_0 : i32, i32
  }
  func.func @transform_4(%arg0: i32) -> (i32, i32) {
    %c0_i32 = arith.constant 0 : i32
    %c0_i32_0 = arith.constant 0 : i32
    %c0_i32_1 = arith.constant 0 : i32
    return %c0_i32, %c0_i32_0 : i32, i32
  }
  func.func @transform_5(%arg0: i32) -> (i32, i32) {
    %c0_i32 = arith.constant 0 : i32
    %c0_i32_0 = arith.constant 0 : i32
    %c0_i32_1 = arith.constant 0 : i32
    return %c0_i32, %c0_i32_0 : i32, i32
  }
  func.func @transform_6(%arg0: i32) -> (i32, i32) {
    %c0_i32 = arith.constant 0 : i32
    %c0_i32_0 = arith.constant 0 : i32
    %c0_i32_1 = arith.constant 0 : i32
    return %c0_i32, %c0_i32_0 : i32, i32
  }
  func.func @transform_7(%arg0: i32) -> (i32, i32) {
    %c0_i32 = arith.constant 0 : i32
    %c0_i32_0 = arith.constant 0 : i32
    %c0_i32_1 = arith.constant 0 : i32
    return %c0_i32, %c0_i32_0 : i32, i32
  }
  func.func @transform_8(%arg0: i32) -> (i32, i32) {
    %c0_i32 = arith.constant 0 : i32
    %c0_i32_0 = arith.constant 0 : i32
    %c0_i32_1 = arith.constant 0 : i32
    return %c0_i32, %c0_i32_0 : i32, i32
  }
  func.func @transform_9(%arg0: i32) -> (i32, i32) {
    %c0_i32 = arith.constant 0 : i32
    %c0_i32_0 = arith.constant 0 : i32
    %c0_i32_1 = arith.constant 0 : i32
    return %c0_i32, %c0_i32_0 : i32, i32
  }
  func.func @transform_10(%arg0: i32) -> (i32, i32) {
    %c0_i32 = arith.constant 0 : i32
    %c0_i32_0 = arith.constant 0 : i32
    %c0_i32_1 = arith.constant 0 : i32
    return %c0_i32, %c0_i32_0 : i32, i32
  }
  func.func @transform_11(%arg0: i32) -> (i32, i32) {
    %c0_i32 = arith.constant 0 : i32
    %c0_i32_0 = arith.constant 0 : i32
    %c0_i32_1 = arith.constant 0 : i32
    return %c0_i32, %c0_i32_0 : i32, i32
  }
  func.func @transform_12(%arg0: i32) -> (i32, i32) {
    %c0_i32 = arith.constant 0 : i32
    %c0_i32_0 = arith.constant 0 : i32
    %c0_i32_1 = arith.constant 0 : i32
    return %c0_i32, %c0_i32_0 : i32, i32
  }
  func.func @transform_13(%arg0: i32) -> (i32, i32) {
    %c0_i32 = arith.constant 0 : i32
    %c0_i32_0 = arith.constant 0 : i32
    %c0_i32_1 = arith.constant 0 : i32
    return %c0_i32, %c0_i32_0 : i32, i32
  }
  func.func @transform_14(%arg0: i32) -> (i32, i32) {
    %c0_i32 = arith.constant 0 : i32
    %c0_i32_0 = arith.constant 0 : i32
    %c0_i32_1 = arith.constant 0 : i32
    return %c0_i32, %c0_i32_0 : i32, i32
  }
  func.func @transform_15(%arg0: i32) -> (i32, i32) {
    %c0_i32 = arith.constant 0 : i32
    %c0_i32_0 = arith.constant 0 : i32
    %c0_i32_1 = arith.constant 0 : i32
    return %c0_i32, %c0_i32_0 : i32, i32
  }
  func.func @transform_16(%arg0: i32) -> (i32, i32) {
    %c0_i32 = arith.constant 0 : i32
    %c0_i32_0 = arith.constant 0 : i32
    %c0_i32_1 = arith.constant 0 : i32
    return %c0_i32, %c0_i32_0 : i32, i32
  }
  func.func @transform_17(%arg0: i32) -> (i32, i32) {
    %c0_i32 = arith.constant 0 : i32
    %c0_i32_0 = arith.constant 0 : i32
    %c0_i32_1 = arith.constant 0 : i32
    return %c0_i32, %c0_i32_0 : i32, i32
  }
}

</mosaic_0001>

<bundles_post_ra>
// kernel: tpu_custom_call.1
= control target key start
LH: loop header
LB: loop body
LE: loop exit
PB: predicated region body
PF: predicated region fallthrough
CT: control target
= control target key end

     0   :  { %s11388_s0 = inlined_call_operand.vmem [shape: f32[2,80], index: 0, kind: input, shape index: {}]   ;;  %s11389_s1 = inlined_call_operand.vmem [shape: f32[80,640], index: 1, kind: input, shape index: {}]   ;;  %s11390_s2 = inlined_call_operand.vmem [shape: f32[1,640], index: 2, kind: input, shape index: {}]   ;;  %s11391_s3 = inlined_call_operand.vmem [shape: f32[640,640], index: 3, kind: input, shape index: {}]   ;;  %s11392_s4 = inlined_call_operand.vmem [shape: f32[1,640], index: 4, kind: input, shape index: {}]   ;;  %s11393_s5 = inlined_call_operand.vmem [shape: f32[640,320], index: 5, kind: input, shape index: {}]   ;;  %s11394_s6 = inlined_call_operand.vmem [shape: f32[1,320], index: 6, kind: input, shape index: {}]   ;;  %s11395_s7 = inlined_call_operand.vmem [shape: f32[320,32], index: 7, kind: input, shape index: {}]   ;;  %s11396_s8 = inlined_call_operand.vmem [shape: f32[1,32], index: 8, kind: input, shape index: {}]   ;;  %s11397_s9 = inlined_call_operand.vmem [shape: f32[32,320], index: 9, kind: input, shape index: {}]   ;;  %s11398_s10 = inlined_call_operand.vmem [shape: f32[1,320], index: 10, kind: input, shape index: {}]   ;;  %s11399_s11 = inlined_call_operand.vmem [shape: f32[320,640], index: 11, kind: input, shape index: {}]   ;;  %s11400_s12 = inlined_call_operand.vmem [shape: f32[1,640], index: 12, kind: input, shape index: {}]   ;;  %s11401_s13 = inlined_call_operand.vmem [shape: f32[640,624], index: 13, kind: input, shape index: {}]   ;;  %s11402_s14 = inlined_call_operand.vmem [shape: f32[1,624], index: 14, kind: input, shape index: {}]   ;;  %s11403_s15 = inlined_call_operand.vmem [shape: f32[624,78], index: 15, kind: input, shape index: {}]   ;;  %s11404_s16 = inlined_call_operand.vmem [shape: f32[1,78], index: 16, kind: input, shape index: {}]   ;;  %s11405_s17 = inlined_call_operand.hbm [shape: f32[2,78], index: 17, kind: output, shape index: {}]  }
   0x1   :  { %11407 = sst [smem:[#allocation5_spill]] %s11388_s0 }
   0x2   :  { %11408 = sst [smem:[#allocation6_spill]] %s11389_s1 }
   0x3   :  { %s11409_s26 = sld [smem:[#allocation6_spill]]  ;;  %v6730_v7 = vmov 0.0   ;;  %s11410_s22 = sld [smem:[#allocation5_spill]]  ;;  %vm135_vm0 = vcmask 654336   ;;  %vm6732_vm1 = vmmov 0  }
   0x4   :  { %203 = vmatprep.mubr.f32.mxu0 %v6730_v7  ;;  %274 = vmatprep.mubr.f32.mxu1 %v6730_v7 }
   0x9   :  { %v59_v0 = vld [vmem:[%s11409_s26 + $0x8] sm:$0xff]  ;;  %v64_v1 = vld [vmem:[%s11409_s26 + $0x30] sm:$0xff]  ;;  %v58_v2 = vld [vmem:[%s11409_s26] sm:$0xff] }
   0xa   :  { %v5194_v3 = vpack.c.bf16 %v64_v1, %v59_v0  ;;  %v63_v4 = vld [vmem:[%s11409_s26 + $0x28] sm:$0xff]  ;;  %v69_v5 = vld [vmem:[%s11409_s26 + $0x58] sm:$0xff]  ;;  %v74_v6 = vld [vmem:[%s11409_s26 + $0x80] sm:$0xff]  ;;  %v6731_v1 = vmov 0.0|0.0  }
   0xb   :  { %v5196_v8 = vpack.c.bf16 %v63_v4, %v58_v2  ;;  %v5198_v9 = vpack.c.bf16 %v74_v6, %v69_v5  ;;  %v68_v10 = vld [vmem:[%s11409_s26 + $0x50] sm:$0xff]  ;;  %v73_v11 = vld [vmem:[%s11409_s26 + $0x78] sm:$0xff]  ;;  %v79_v12 = vld [vmem:[%s11409_s26 + $0xa8] sm:$0xff] }
   0xc   :  { %5195 = vmatprep.subr.bf16.mxu0 %v5194_v3  ;;  %v84_v13 = vld [vmem:[%s11409_s26 + $0xd0] sm:$0xff]  ;;  %v5200_v14 = vpack.c.bf16 %v73_v11, %v68_v10  ;;  %v78_v16 = vld [vmem:[%s11409_s26 + $0xa0] sm:$0xff]  ;;  %v83_v17 = vld [vmem:[%s11409_s26 + $0xc8] sm:$0xff] }
   0xd   :  { %5197 = vmatpush1.bf16.msra.mxu0 %v5196_v8  ;;  %v5202_v15 = vpack.c.bf16 %v84_v13, %v79_v12  ;;  %v89_v18 = vld [vmem:[%s11409_s26 + $0xf8] sm:$0xff]  ;;  %v94_v19 = vld [vmem:[%s11409_s26 + $0x120] sm:$0xff]  ;;  %v88_v20 = vld [vmem:[%s11409_s26 + $0xf0] sm:$0xff]  ;;  %v5204_v25 = vpack.c.bf16 %v83_v17, %v78_v16 }
   0xe   :  { %5199 = vmatprep.subr.bf16.mxu0 %v5198_v9  ;;  %v93_v21 = vld [vmem:[%s11409_s26 + $0x118] sm:$0xff]  ;;  %v66_v23 = vld [vmem:[%s11409_s26 + $0x40] sm:$0xff]  ;;  %v60_v24 = vld [vmem:[%s11409_s26 + $0x10] sm:$0xff]  ;;  %v5206_v30 = vpack.c.bf16 %v94_v19, %v89_v18 }
   0xf   :  { %v61_v22 = vld [vmem:[%s11409_s26 + $0x18] sm:$0xff]  ;;  %v71_v28 = vld [vmem:[%s11409_s26 + $0x68] sm:$0xff]  ;;  %v76_v29 = vld [vmem:[%s11409_s26 + $0x90] sm:$0xff]  ;;  %v5208_v40 = vpack.c.bf16 %v93_v21, %v88_v20 }
  0x10   :  { %v5214_v26 = vpack.c.bf16 %v66_v23, %v61_v22  ;;  %v65_v27 = vld [vmem:[%s11409_s26 + $0x38] sm:$0xff]  ;;  %v5218_v32 = vpack.c.bf16 %v76_v29, %v71_v28  ;;  %v70_v33 = vld [vmem:[%s11409_s26 + $0x60] sm:$0xff]  ;;  %v75_v34 = vld [vmem:[%s11409_s26 + $0x88] sm:$0xff] }
  0x11   :  { %5201 = vmatpush1.bf16.msra.mxu0 %v5200_v14  ;;  %v5216_v31 = vpack.c.bf16 %v65_v27, %v60_v24  ;;  %v81_v35 = vld [vmem:[%s11409_s26 + $0xb8] sm:$0xff]  ;;  %v99_v36 = vld [vmem:[%s11409_s26 + $0x148] sm:$0xff]  ;;  %v104_v37 = vld [vmem:[%s11409_s26 + $0x170] sm:$0xff]  ;;  %v5220_v39 = vpack.c.bf16 %v75_v34, %v70_v33 }
  0x12   :  { %5203 = vmatprep.subr.bf16.mxu0 %v5202_v15  ;;  %5215 = vmatprep.subr.bf16.mxu1 %v5214_v26  ;;  %v86_v38 = vld [vmem:[%s11409_s26 + $0xe0] sm:$0xff]  ;;  %v80_v43 = vld [vmem:[%s11409_s26 + $0xb0] sm:$0xff]  ;;  %v85_v44 = vld [vmem:[%s11409_s26 + $0xd8] sm:$0xff]  ;;  %v5210_v45 = vpack.c.bf16 %v104_v37, %v99_v36 }
  0x13   :  { %5217 = vmatpush1.bf16.msra.mxu1 %v5216_v31  ;;  %v98_v41 = vld [vmem:[%s11409_s26 + $0x140] sm:$0xff]  ;;  %v5222_v42 = vpack.c.bf16 %v86_v38, %v81_v35  ;;  %v103_v46 = vld [vmem:[%s11409_s26 + $0x168] sm:$0xff]  ;;  %v96_v48 = vld [vmem:[%s11409_s26 + $0x130] sm:$0xff]  ;;  %v5224_v49 = vpack.c.bf16 %v85_v44, %v80_v43 }
  0x14   :  { %5219 = vmatprep.subr.bf16.mxu1 %v5218_v32  ;;  %v91_v47 = vld [vmem:[%s11409_s26 + $0x108] sm:$0xff]  ;;  %v5212_v50 = vpack.c.bf16 %v103_v46, %v98_v41  ;;  %v90_v52 = vld [vmem:[%s11409_s26 + $0x100] sm:$0xff]  ;;  %v101_v54 = vld [vmem:[%s11409_s26 + $0x158] sm:$0xff] }
  0x15   :  { %5205 = vmatpush1.bf16.msra.mxu0 %v5204_v25  ;;  %v5226_v51 = vpack.c.bf16 %v96_v48, %v91_v47  ;;  %v95_v53 = vld [vmem:[%s11409_s26 + $0x128] sm:$0xff]  ;;  %v106_v55 = vld [vmem:[%s11409_s26 + $0x180] sm:$0xff]  ;;  %v100_v61 = vld [vmem:[%s11409_s26 + $0x150] sm:$0xff] }
  0x16   :  { %5207 = vmatprep.subr.bf16.mxu0 %v5206_v30  ;;  %v62_v56 = vld [vmem:[%s11409_s26 + $0x20] sm:$0xff]  ;;  %v67_v57 = vld [vmem:[%s11409_s26 + $0x48] sm:$0xff]  ;;  %v5228_v59 = vpack.c.bf16 %v95_v53, %v90_v52  ;;  %v5230_v60 = vpack.c.bf16 %v106_v55, %v101_v54  ;;  %v105_v62 = vld [vmem:[%s11409_s26 + $0x178] sm:$0xff] }
  0x17   :  { %5221 = vmatpush1.bf16.msra.mxu1 %v5220_v39  ;;  %v6949_v58 = vld [vmem:[%s11410_s22] sm:$0x3]  ;;  %v5235_v63 = vpack.c.bf16 %v67_v57, %v62_v56  ;;  %v72_v0 = vld [vmem:[%s11409_s26 + $0x70] sm:$0xff]  ;;  %v77_v2 = vld [vmem:[%s11409_s26 + $0x98] sm:$0xff]  ;;  %v5232_v5 = vpack.c.bf16 %v105_v62, %v100_v61 }
  0x18   :  { %5223 = vmatprep.subr.bf16.mxu1 %v5222_v42  ;;  %v357_v3 = vld [vmem:[%s11391_s3 + $0x8] sm:$0xff]  ;;  %v362_v4 = vld [vmem:[%s11391_s3 + $0x30] sm:$0xff]  ;;  %v5238_v6 = vpack.c.bf16 %v77_v2, %v72_v0  ;;  %v82_v8 = vld [vmem:[%s11409_s26 + $0xc0] sm:$0xff] }
  0x19   :  { %5209 = vmatpush1.bf16.msra.mxu0 %v5208_v40  ;;  %v5249_v9 = vpack.c.bf16 %v362_v4, %v357_v3  ;;  %v356_v10 = vld [vmem:[%s11391_s3] sm:$0xff]  ;;  %v361_v11 = vld [vmem:[%s11391_s3 + $0x28] sm:$0xff]  ;;  %v367_v13 = vld [vmem:[%s11391_s3 + $0x58] sm:$0xff] }
  0x1a   :  { %5211 = vmatprep.subr.bf16.mxu0 %v5210_v45  ;;  %v87_v12 = vld [vmem:[%s11409_s26 + $0xe8] sm:$0xff]  ;;  %v372_v14 = vld [vmem:[%s11391_s3 + $0x80] sm:$0xff]  ;;  %v5251_v15 = vpack.c.bf16 %v361_v11, %v356_v10  ;;  %v92_v17 = vld [vmem:[%s11409_s26 + $0x110] sm:$0xff] }
  0x1b   :  { %5225 = vmatpush1.bf16.msra.mxu1 %v5224_v49  ;;  %v5241_v16 = vpack.c.bf16 %v87_v12, %v82_v8  ;;  %v5253_v18 = vpack.c.bf16 %v372_v14, %v367_v13  ;;  %v366_v19 = vld [vmem:[%s11391_s3 + $0x50] sm:$0xff]  ;;  %v371_v20 = vld [vmem:[%s11391_s3 + $0x78] sm:$0xff]  ;;  %v377_v22 = vld [vmem:[%s11391_s3 + $0xa8] sm:$0xff] }
  0x1c   :  { %5227 = vmatprep.subr.bf16.mxu1 %v5226_v51  ;;  %v97_v21 = vld [vmem:[%s11409_s26 + $0x138] sm:$0xff]  ;;  %v382_v23 = vld [vmem:[%s11391_s3 + $0xd0] sm:$0xff]  ;;  %v5255_v24 = vpack.c.bf16 %v371_v20, %v366_v19  ;;  %v102_v26 = vld [vmem:[%s11409_s26 + $0x160] sm:$0xff] }
  0x1d   :  { %5213 = vmatpush1.bf16.msra.mxu0 %v5212_v50  ;;  %v5244_v25 = vpack.c.bf16 %v97_v21, %v92_v17  ;;  %v5257_v27 = vpack.c.bf16 %v382_v23, %v377_v22  ;;  %v376_v28 = vld [vmem:[%s11391_s3 + $0xa0] sm:$0xff]  ;;  %v381_v29 = vld [vmem:[%s11391_s3 + $0xc8] sm:$0xff]  ;;  %v387_v31 = vld [vmem:[%s11391_s3 + $0xf8] sm:$0xff] }
  0x1e   :  { %5234 = vmatprep.subr.bf16.mxu0 %v6731_v1  ;;  %v107_v30 = vld [vmem:[%s11409_s26 + $0x188] sm:$0xff]  ;;  %v392_v32 = vld [vmem:[%s11391_s3 + $0x120] sm:$0xff]  ;;  %v359_v33 = vld [vmem:[%s11391_s3 + $0x18] sm:$0xff]  ;;  %v5259_v35 = vpack.c.bf16 %v381_v29, %v376_v28 }
  0x1f   :  { %5229 = vmatpush1.bf16.msra.mxu1 %v5228_v59  ;;  %v364_v34 = vld [vmem:[%s11391_s3 + $0x40] sm:$0xff]  ;;  %v5247_v36 = vpack.c.bf16 %v107_v30, %v102_v26  ;;  %v358_v37 = vld [vmem:[%s11391_s3 + $0x10] sm:$0xff]  ;;  %v5261_v38 = vpack.c.bf16 %v392_v32, %v387_v31  ;;  %v391_v40 = vld [vmem:[%s11391_s3 + $0x118] sm:$0xff] }
  0x20   :  { %4523 = vmatmul.mubr.msk.f32.vlgmr.msra.gmra.mrb[0].mxu0 %vm135_vm0, %v6949_v58  ;;  %5231 = vmatprep.subr.bf16.mxu1 %v5230_v60  ;;  %v386_v39 = vld [vmem:[%s11391_s3 + $0xf0] sm:$0xff]  ;;  %v5409_v41 = vpack.c.bf16 %v364_v34, %v359_v33  ;;  %v363_v42 = vld [vmem:[%s11391_s3 + $0x38] sm:$0xff]  ;;  %v397_v43 = vld [vmem:[%s11391_s3 + $0x148] sm:$0xff] }
  0x21   :  { %5236 = vmatpush3.bf16.msra.mxu0 %v5235_v63  ;;  %5006 = vmatprep.mubr.msk.f32.mxu0 %vm6732_vm1, %v6730_v7  ;;  %v402_v44 = vld [vmem:[%s11391_s3 + $0x170] sm:$0xff]  ;;  %v369_v45 = vld [vmem:[%s11391_s3 + $0x68] sm:$0xff]  ;;  %v5263_v47 = vpack.c.bf16 %v391_v40, %v386_v39  ;;  %v5411_v48 = vpack.c.bf16 %v363_v42, %v358_v37  ;;  %v368_v49 = vld [vmem:[%s11391_s3 + $0x60] sm:$0xff] }
  0x22   :  { %5237 = vmatprep.subr.bf16.mxu0 %v6731_v1  ;;  %v374_v46 = vld [vmem:[%s11391_s3 + $0x90] sm:$0xff]  ;;  %v5265_v50 = vpack.c.bf16 %v402_v44, %v397_v43  ;;  %v396_v51 = vld [vmem:[%s11391_s3 + $0x140] sm:$0xff]  ;;  %v401_v52 = vld [vmem:[%s11391_s3 + $0x168] sm:$0xff] }
  0x23   :  { %5233 = vmatpush1.bf16.msra.mxu1 %v5232_v5  ;;  %v5413_v53 = vpack.c.bf16 %v374_v46, %v369_v45  ;;  %v373_v54 = vld [vmem:[%s11391_s3 + $0x88] sm:$0xff]  ;;  %v407_v55 = vld [vmem:[%s11391_s3 + $0x198] sm:$0xff]  ;;  %v412_v56 = vld [vmem:[%s11391_s3 + $0x1c0] sm:$0xff]  ;;  %v5267_v60 = vpack.c.bf16 %v401_v52, %v396_v51 }
  0x24   :  { %5250 = vmatprep.subr.bf16.mxu1 %v5249_v9  ;;  %v379_v57 = vld [vmem:[%s11391_s3 + $0xb8] sm:$0xff]  ;;  %v384_v59 = vld [vmem:[%s11391_s3 + $0xe0] sm:$0xff]  ;;  %v5415_v61 = vpack.c.bf16 %v373_v54, %v368_v49  ;;  %v378_v62 = vld [vmem:[%s11391_s3 + $0xb0] sm:$0xff]  ;;  %v5269_v63 = vpack.c.bf16 %v412_v56, %v407_v55 }
  0x25   :  { %5239 = vmatpush3.bf16.msra.mxu0 %v5238_v6  ;;  %v406_v0 = vld [vmem:[%s11391_s3 + $0x190] sm:$0xff]  ;;  %v411_v2 = vld [vmem:[%s11391_s3 + $0x1b8] sm:$0xff]  ;;  %v417_v4 = vld [vmem:[%s11391_s3 + $0x1e8] sm:$0xff] }
  0x26   :  { %5240 = vmatprep.subr.bf16.mxu0 %v6731_v1  ;;  %4524 = vmatmul.mubr.msk.f32.vlgmr.msra.gmra.mrb[0].mxu1 %vm135_vm0, %v6949_v58  ;;  %v383_v3 = vld [vmem:[%s11391_s3 + $0xd8] sm:$0xff]  ;;  %v422_v5 = vld [vmem:[%s11391_s3 + $0x210] sm:$0xff]  ;;  %v389_v6 = vld [vmem:[%s11391_s3 + $0x108] sm:$0xff]  ;;  %v5271_v9 = vpack.c.bf16 %v411_v2, %v406_v0 }
  0x27   :  { %5252 = vmatpush1.bf16.msra.mxu1 %v5251_v15  ;;  %v394_v8 = vld [vmem:[%s11391_s3 + $0x130] sm:$0xff]  ;;  %v5419_v10 = vpack.c.bf16 %v383_v3, %v378_v62  ;;  %v388_v11 = vld [vmem:[%s11391_s3 + $0x100] sm:$0xff]  ;;  %v5273_v12 = vpack.c.bf16 %v422_v5, %v417_v4  ;;  %v421_v14 = vld [vmem:[%s11391_s3 + $0x208] sm:$0xff] }
  0x28   :  { %5254 = vmatprep.subr.bf16.mxu1 %v5253_v18  ;;  %v416_v13 = vld [vmem:[%s11391_s3 + $0x1e0] sm:$0xff]  ;;  %v5421_v15 = vpack.c.bf16 %v394_v8, %v389_v6  ;;  %v427_v17 = vld [vmem:[%s11391_s3 + $0x238] sm:$0xff]  ;;  %v398_v23 = vld [vmem:[%s11391_s3 + $0x150] sm:$0xff] }
  0x29   :  { %5242 = vmatpush3.bf16.msra.mxu0 %v5241_v16  ;;  %v393_v16 = vld [vmem:[%s11391_s3 + $0x128] sm:$0xff]  ;;  %v432_v18 = vld [vmem:[%s11391_s3 + $0x260] sm:$0xff]  ;;  %v399_v19 = vld [vmem:[%s11391_s3 + $0x158] sm:$0xff]  ;;  %v5275_v21 = vpack.c.bf16 %v421_v14, %v416_v13 }
  0x2a   :  { %5243 = vmatprep.subr.bf16.mxu0 %v6731_v1  ;;  %v404_v20 = vld [vmem:[%s11391_s3 + $0x180] sm:$0xff]  ;;  %v5423_v22 = vpack.c.bf16 %v393_v16, %v388_v11  ;;  %v431_v26 = vld [vmem:[%s11391_s3 + $0x258] sm:$0xff]  ;;  %v437_v29 = vld [vmem:[%s11391_s3 + $0x288] sm:$0xff] }
  0x2b   :  { %5256 = vmatpush1.bf16.msra.mxu1 %v5255_v24  ;;  %v5277_v24 = vpack.c.bf16 %v432_v18, %v427_v17  ;;  %v403_v28 = vld [vmem:[%s11391_s3 + $0x178] sm:$0xff]  ;;  %v442_v30 = vld [vmem:[%s11391_s3 + $0x2b0] sm:$0xff]  ;;  %v409_v31 = vld [vmem:[%s11391_s3 + $0x1a8] sm:$0xff] }
  0x2c   :  { %5258 = vmatprep.subr.bf16.mxu1 %v5257_v27  ;;  %v5425_v27 = vpack.c.bf16 %v404_v20, %v399_v19  ;;  %v414_v32 = vld [vmem:[%s11391_s3 + $0x1d0] sm:$0xff]  ;;  %v408_v33 = vld [vmem:[%s11391_s3 + $0x1a0] sm:$0xff]  ;;  %v5281_v37 = vpack.c.bf16 %v442_v30, %v437_v29  ;;  %v441_v39 = vld [vmem:[%s11391_s3 + $0x2a8] sm:$0xff] }
  0x2d   :  { %5245 = vmatpush3.bf16.msra.mxu0 %v5244_v25  ;;  %v426_v25 = vld [vmem:[%s11391_s3 + $0x230] sm:$0xff]  ;;  %v5429_v40 = vpack.c.bf16 %v414_v32, %v409_v31  ;;  %v452_v42 = vld [vmem:[%s11391_s3 + $0x300] sm:$0xff] }
  0x2e   :  { %5246 = vmatprep.subr.bf16.mxu0 %v6731_v1  ;;  %v5279_v34 = vpack.c.bf16 %v431_v26, %v426_v25 }
  0x2f   :  { %5260 = vmatpush1.bf16.msra.mxu1 %v5259_v35  ;;  %v5427_v35 = vpack.c.bf16 %v403_v28, %v398_v23 }
  0x30   :  { %5262 = vmatprep.subr.bf16.mxu1 %v5261_v38  ;;  %v436_v38 = vld [vmem:[%s11391_s3 + $0x280] sm:$0xff] }
  0x31   :  { %5248 = vmatpush3.bf16.msra.mxu0 %v5247_v36  ;;  %v413_v36 = vld [vmem:[%s11391_s3 + $0x1c8] sm:$0xff] }
  0x32   :  { %5410 = vmatprep.subr.bf16.mxu0 %v5409_v41  ;;  %v447_v41 = vld [vmem:[%s11391_s3 + $0x2d8] sm:$0xff] }
  0x33   :  { %5264 = vmatpush1.bf16.msra.mxu1 %v5263_v47 }
  0x34   :  { %5007 = vmatmul.mubr.msk.f32.vlgmr.msra.gmra.mrb[2].mxu0 %vm135_vm0, %v6949_v58  ;;  %5266 = vmatprep.subr.bf16.mxu1 %v5265_v50  ;;  %v5417_v58 = vpack.c.bf16 %v384_v59, %v379_v57 }
  0x35   :  { %5412 = vmatpush1.bf16.msra.mxu0 %v5411_v48 }
  0x36   :  { %5414 = vmatprep.subr.bf16.mxu0 %v5413_v53 }
  0x37   :  { %5268 = vmatpush1.bf16.msra.mxu1 %v5267_v60 }
  0x38   :  { %5270 = vmatprep.subr.bf16.mxu1 %v5269_v63 }
  0x39   :  { %5416 = vmatpush1.bf16.msra.mxu0 %v5415_v61 }
  0x3a   :  { %5418 = vmatprep.subr.bf16.mxu0 %v5417_v58 }
  0x3b   :  { %5272 = vmatpush1.bf16.msra.mxu1 %v5271_v9 }
  0x3c   :  { %5274 = vmatprep.subr.bf16.mxu1 %v5273_v12 }
  0x3d   :  { %5420 = vmatpush1.bf16.msra.mxu0 %v5419_v10 }
  0x3e   :  { %5422 = vmatprep.subr.bf16.mxu0 %v5421_v15 }
  0x3f   :  { %5276 = vmatpush1.bf16.msra.mxu1 %v5275_v21 }
  0x40   :  { %5278 = vmatprep.subr.bf16.mxu1 %v5277_v24 }
  0x41   :  { %5424 = vmatpush1.bf16.msra.mxu0 %v5423_v22 }
  0x42   :  { %5426 = vmatprep.subr.bf16.mxu0 %v5425_v27 }
  0x43   :  { %22 = vsyncpa [#allocation3], 0  ;;  %v419_v43 = vld [vmem:[%s11391_s3 + $0x1f8] sm:$0xff]  ;;  %v424_v44 = vld [vmem:[%s11391_s3 + $0x220] sm:$0xff]  ;;  %5280 = vmatpush1.bf16.msra.mxu1 %v5279_v34  ;;  %v5283_v45 = vpack.c.bf16 %v441_v39, %v436_v38  ;;  %v5431_v46 = vpack.c.bf16 %v413_v36, %v408_v33  ;;  %v5285_v48 = vpack.c.bf16 %v452_v42, %v447_v41  ;;  %vm2154_vm2 = vcmask 523264   ;;  %s6733_s27 = smov [#allocation2]  }
  0x44   :  { %v418_v47 = vld [vmem:[%s11391_s3 + $0x1f0] sm:$0xff]  ;;  %5282 = vmatprep.subr.bf16.mxu1 %v5281_v37  ;;  %v451_v50 = vld [vmem:[%s11391_s3 + $0x2f8] sm:$0xff]  ;;  %v5433_v51 = vpack.c.bf16 %v424_v44, %v419_v43  ;;  %v457_v53 = vld [vmem:[%s11391_s3 + $0x328] sm:$0xff]  ;;  %vm2327_vm3 = vcmask 261120   ;;  %vm4287_vm4 = vcmask 916480   ;;  %s4515_s28 = sshll.u32 %s6733_s27, 4  ;;  %s4516_s28 = int_to_ptr.vmem [resolvable:$true] %s4515_s28 }
  0x45   :  { %5428 = vmatpush1.bf16.msra.mxu0 %v5427_v35  ;;  %v446_v49 = vld [vmem:[%s11391_s3 + $0x2d0] sm:$0xff]  ;;  %v423_v52 = vld [vmem:[%s11391_s3 + $0x218] sm:$0xff]  ;;  %v429_v55 = vld [vmem:[%s11391_s3 + $0x248] sm:$0xff]  ;;  %vm4507_vm5 = vcmask 631808   ;;  %p6711_p1 = scmp.lt.s32.totalorder %s4516_s28, %s4516_s28 }
  0x46   :  { %5430 = vmatprep.subr.bf16.mxu0 %v5429_v40  ;;  %v462_v54 = vld [vmem:[%s11391_s3 + $0x350] sm:$0xff]  ;;  %v5287_v57 = vpack.c.bf16 %v451_v50, %v446_v49  ;;  %v5435_v59 = vpack.c.bf16 %v423_v52, %v418_v47  ;;  %v428_v60 = vld [vmem:[%s11391_s3 + $0x240] sm:$0xff]  ;;  %v461_v63 = vld [vmem:[%s11391_s3 + $0x348] sm:$0xff] }
  0x47   :  { %v434_v56 = vld [vmem:[%s11391_s3 + $0x270] sm:$0xff]  ;;  %5284 = vmatpush1.bf16.msra.mxu1 %v5283_v45  ;;  %v5289_v61 = vpack.c.bf16 %v462_v54, %v457_v53  ;;  %v456_v62 = vld [vmem:[%s11391_s3 + $0x320] sm:$0xff]  ;;  %v433_v2 = vld [vmem:[%s11391_s3 + $0x268] sm:$0xff] }
  0x48   :  { %5286 = vmatprep.subr.bf16.mxu1 %v5285_v48  ;;  %v5437_v0 = vpack.c.bf16 %v434_v56, %v429_v55  ;;  %v467_v58 = vld [vmem:[%s11391_s3 + $0x378] sm:$0xff]  ;;  %v472_v3 = vld [vmem:[%s11391_s3 + $0x3a0] sm:$0xff]  ;;  %v5291_v6 = vpack.c.bf16 %v461_v63, %v456_v62  ;;  %v5439_v8 = vpack.c.bf16 %v433_v2, %v428_v60  ;;  %v438_v9 = vld [vmem:[%s11391_s3 + $0x290] sm:$0xff] }
  0x49   :  { %5432 = vmatpush1.bf16.msra.mxu0 %v5431_v46  ;;  %v439_v4 = vld [vmem:[%s11391_s3 + $0x298] sm:$0xff]  ;;  %v444_v5 = vld [vmem:[%s11391_s3 + $0x2c0] sm:$0xff]  ;;  %v5293_v10 = vpack.c.bf16 %v472_v3, %v467_v58  ;;  %v466_v11 = vld [vmem:[%s11391_s3 + $0x370] sm:$0xff] }
  0x4a   :  { %5434 = vmatprep.subr.bf16.mxu0 %v5433_v51  ;;  %v471_v12 = vld [vmem:[%s11391_s3 + $0x398] sm:$0xff]  ;;  %v5441_v13 = vpack.c.bf16 %v444_v5, %v439_v4  ;;  %v477_v15 = vld [vmem:[%s11391_s3 + $0x3c8] sm:$0xff]  ;;  %v482_v16 = vld [vmem:[%s11391_s3 + $0x3f0] sm:$0xff] }
  0x4b   :  { %5288 = vmatpush1.bf16.msra.mxu1 %v5287_v57  ;;  %v443_v14 = vld [vmem:[%s11391_s3 + $0x2b8] sm:$0xff]  ;;  %v449_v17 = vld [vmem:[%s11391_s3 + $0x2e8] sm:$0xff]  ;;  %v454_v18 = vld [vmem:[%s11391_s3 + $0x310] sm:$0xff]  ;;  %v5295_v19 = vpack.c.bf16 %v471_v12, %v466_v11  ;;  %v5297_v22 = vpack.c.bf16 %v482_v16, %v477_v15 }
  0x4c   :  { %5290 = vmatprep.subr.bf16.mxu1 %v5289_v61  ;;  %v5443_v20 = vpack.c.bf16 %v443_v14, %v438_v9  ;;  %v448_v21 = vld [vmem:[%s11391_s3 + $0x2e0] sm:$0xff]  ;;  %v481_v24 = vld [vmem:[%s11391_s3 + $0x3e8] sm:$0xff]  ;;  %v5445_v25 = vpack.c.bf16 %v454_v18, %v449_v17  ;;  %v487_v27 = vld [vmem:[%s11391_s3 + $0x418] sm:$0xff] }
  0x4d   :  { %5436 = vmatpush1.bf16.msra.mxu0 %v5435_v59  ;;  %v476_v23 = vld [vmem:[%s11391_s3 + $0x3c0] sm:$0xff]  ;;  %v453_v26 = vld [vmem:[%s11391_s3 + $0x308] sm:$0xff]  ;;  %v459_v29 = vld [vmem:[%s11391_s3 + $0x338] sm:$0xff] }
  0x4e   :  { %5438 = vmatprep.subr.bf16.mxu0 %v5437_v0  ;;  %v492_v28 = vld [vmem:[%s11391_s3 + $0x440] sm:$0xff]  ;;  %v5299_v31 = vpack.c.bf16 %v481_v24, %v476_v23  ;;  %v5447_v32 = vpack.c.bf16 %v453_v26, %v448_v21  ;;  %v458_v33 = vld [vmem:[%s11391_s3 + $0x330] sm:$0xff]  ;;  %v491_v36 = vld [vmem:[%s11391_s3 + $0x438] sm:$0xff] }
  0x4f   :  { %5292 = vmatpush1.bf16.msra.mxu1 %v5291_v6  ;;  %v464_v30 = vld [vmem:[%s11391_s3 + $0x360] sm:$0xff]  ;;  %v5301_v34 = vpack.c.bf16 %v492_v28, %v487_v27  ;;  %v486_v35 = vld [vmem:[%s11391_s3 + $0x410] sm:$0xff]  ;;  %v463_v38 = vld [vmem:[%s11391_s3 + $0x358] sm:$0xff]  ;;  %v110_v27 = vlaneseq }
  0x50   :  { %5294 = vmatprep.subr.bf16.mxu1 %v5293_v10  ;;  %v5449_v37 = vpack.c.bf16 %v464_v30, %v459_v29  ;;  %v497_v39 = vld [vmem:[%s11391_s3 + $0x468] sm:$0xff]  ;;  %v502_v40 = vld [vmem:[%s11391_s3 + $0x490] sm:$0xff]  ;;  %v5303_v43 = vpack.c.bf16 %v491_v36, %v486_v35  ;;  %v5451_v44 = vpack.c.bf16 %v463_v38, %v458_v33  ;;  %v496_v46 = vld [vmem:[%s11391_s3 + $0x460] sm:$0xff] }
  0x51   :  { %5440 = vmatpush1.bf16.msra.mxu0 %v5439_v8  ;;  %v469_v41 = vld [vmem:[%s11391_s3 + $0x388] sm:$0xff]  ;;  %v474_v42 = vld [vmem:[%s11391_s3 + $0x3b0] sm:$0xff]  ;;  %v5305_v45 = vpack.c.bf16 %v502_v40, %v497_v39  ;;  %v468_v49 = vld [vmem:[%s11391_s3 + $0x380] sm:$0xff]  ;;  %v7390_v28 = vshrl.u32 %v110_v27, 7 }
  0x52   :  { %5442 = vmatprep.subr.bf16.mxu0 %v5441_v13  ;;  %v501_v47 = vld [vmem:[%s11391_s3 + $0x488] sm:$0xff]  ;;  %v5453_v48 = vpack.c.bf16 %v474_v42, %v469_v41  ;;  %v479_v51 = vld [vmem:[%s11391_s3 + $0x3d8] sm:$0xff]  ;;  %v484_v52 = vld [vmem:[%s11391_s3 + $0x400] sm:$0xff] }
  0x53   :  { %5296 = vmatpush1.bf16.msra.mxu1 %v5295_v19  ;;  %v473_v50 = vld [vmem:[%s11391_s3 + $0x3a8] sm:$0xff]  ;;  %v5307_v53 = vpack.c.bf16 %v501_v47, %v496_v46  ;;  %v5457_v55 = vpack.c.bf16 %v484_v52, %v479_v51  ;;  %v478_v56 = vld [vmem:[%s11391_s3 + $0x3d0] sm:$0xff]  ;;  %v483_v57 = vld [vmem:[%s11391_s3 + $0x3f8] sm:$0xff]  ;;  %v7393_v29 = vsub.s32 0, %v7390_v28  ;;  %v7423_v42 = vsub.s32 3, %v7390_v28 }
  0x54   :  { %5298 = vmatprep.subr.bf16.mxu1 %v5297_v22  ;;  %v5455_v54 = vpack.c.bf16 %v473_v50, %v468_v49  ;;  %v489_v59 = vld [vmem:[%s11391_s3 + $0x428] sm:$0xff]  ;;  %v494_v60 = vld [vmem:[%s11391_s3 + $0x450] sm:$0xff]  ;;  %v5459_v61 = vpack.c.bf16 %v483_v57, %v478_v56  ;;  %v488_v63 = vld [vmem:[%s11391_s3 + $0x420] sm:$0xff] }
  0x55   :  { %5444 = vmatpush1.bf16.msra.mxu0 %v5443_v20  ;;  %v5461_v62 = vpack.c.bf16 %v494_v60, %v489_v59  ;;  %v493_v0 = vld [vmem:[%s11391_s3 + $0x448] sm:$0xff]  ;;  %v499_v2 = vld [vmem:[%s11391_s3 + $0x478] sm:$0xff]  ;;  %v504_v58 = vld [vmem:[%s11391_s3 + $0x4a0] sm:$0xff] }
  0x56   :  { %5446 = vmatprep.subr.bf16.mxu0 %v5445_v25  ;;  %v5463_v3 = vpack.c.bf16 %v493_v0, %v488_v63  ;;  %v5465_v4 = vpack.c.bf16 %v504_v58, %v499_v2  ;;  %v498_v5 = vld [vmem:[%s11391_s3 + $0x470] sm:$0xff]  ;;  %v503_v6 = vld [vmem:[%s11391_s3 + $0x498] sm:$0xff]  ;;  %v512_v10 = vld [vmem:[%s11391_s3 + $0x4e0] sm:$0xff] }
  0x57   :  { %5300 = vmatpush1.bf16.msra.mxu1 %v5299_v31  ;;  %v5467_v8 = vpack.c.bf16 %v503_v6, %v498_v5  ;;  %v507_v9 = vld [vmem:[%s11391_s3 + $0x4b8] sm:$0xff]  ;;  %v509_v11 = vld [vmem:[%s11391_s3 + $0x4c8] sm:$0xff]  ;;  %v514_v13 = vld [vmem:[%s11391_s3 + $0x4f0] sm:$0xff]  ;;  %v7401_v31 = vsub.s32 1, %v7390_v28 }
  0x58   :  { %5302 = vmatprep.subr.bf16.mxu1 %v5301_v34  ;;  %v5309_v12 = vpack.c.bf16 %v512_v10, %v507_v9  ;;  %v506_v14 = vld [vmem:[%s11391_s3 + $0x4b0] sm:$0xff]  ;;  %v511_v15 = vld [vmem:[%s11391_s3 + $0x4d8] sm:$0xff]  ;;  %v5469_v16 = vpack.c.bf16 %v514_v13, %v509_v11  ;;  %v508_v18 = vld [vmem:[%s11391_s3 + $0x4c0] sm:$0xff] }
  0x59   :  { %5448 = vmatpush1.bf16.msra.mxu0 %v5447_v32  ;;  %v5311_v17 = vpack.c.bf16 %v511_v15, %v506_v14  ;;  %v513_v19 = vld [vmem:[%s11391_s3 + $0x4e8] sm:$0xff]  ;;  %v522_v22 = vld [vmem:[%s11391_s3 + $0x530] sm:$0xff]  ;;  %v519_v23 = vld [vmem:[%s11391_s3 + $0x518] sm:$0xff] }
  0x5a   :  { %5450 = vmatprep.subr.bf16.mxu0 %v5449_v37  ;;  %v5471_v20 = vpack.c.bf16 %v513_v19, %v508_v18  ;;  %v517_v21 = vld [vmem:[%s11391_s3 + $0x508] sm:$0xff]  ;;  %v524_v25 = vld [vmem:[%s11391_s3 + $0x540] sm:$0xff]  ;;  %v518_v39 = vld [vmem:[%s11391_s3 + $0x510] sm:$0xff] }
  0x5b   :  { %5304 = vmatpush1.bf16.msra.mxu1 %v5303_v43  ;;  %v5313_v24 = vpack.c.bf16 %v522_v22, %v517_v21  ;;  %v5473_v26 = vpack.c.bf16 %v524_v25, %v519_v23  ;;  %v7398_v30 = vld [vmem:[%s11390_s2] sm:$0x1f]  ;;  %v521_v36 = vld [vmem:[%s11391_s3 + $0x528] sm:$0xff]  ;;  %v523_v40 = vld [vmem:[%s11391_s3 + $0x538] sm:$0xff] }
  0x5c   :  { %5306 = vmatprep.subr.bf16.mxu1 %v5305_v45  ;;  %v113_v32 = vrot.slane %v7398_v30, %v7393_v29  ;;  %v117_v33 = vrot.slane %v7398_v30, %v7401_v31  ;;  %v516_v35 = vld [vmem:[%s11391_s3 + $0x500] sm:$0xff]  ;;  %v527_v41 = vld [vmem:[%s11391_s3 + $0x558] sm:$0xff]  ;;  %v529_v45 = vld [vmem:[%s11391_s3 + $0x568] sm:$0xff]  ;;  %v5475_v49 = vpack.c.bf16 %v523_v40, %v518_v39  ;;  %v125_v59 = vrot.slane %v7398_v30, %v7423_v42 }
  0x5d   :  { %5452 = vmatpush1.bf16.msra.mxu0 %v5451_v44  ;;  %v532_v44 = vld [vmem:[%s11391_s3 + $0x580] sm:$0xff]  ;;  %v534_v46 = vld [vmem:[%s11391_s3 + $0x590] sm:$0xff]  ;;  %v531_v51 = vld [vmem:[%s11391_s3 + $0x578] sm:$0xff] }
  0x5e   :  { %5454 = vmatprep.subr.bf16.mxu0 %v5453_v48  ;;  %v5315_v48 = vpack.c.bf16 %v521_v36, %v516_v35  ;;  %v526_v50 = vld [vmem:[%s11391_s3 + $0x550] sm:$0xff]  ;;  %v533_v56 = vld [vmem:[%s11391_s3 + $0x588] sm:$0xff]  ;;  %v536_v58 = vld [vmem:[%s11391_s3 + $0x5a0] sm:$0xff] }
  0x5f   :  { %5308 = vmatpush1.bf16.msra.mxu1 %v5307_v53  ;;  %v5317_v53 = vpack.c.bf16 %v532_v44, %v527_v41  ;;  %v537_v57 = vld [vmem:[%s11391_s3 + $0x5a8] sm:$0xff]  ;;  %v542_v60 = vld [vmem:[%s11391_s3 + $0x5d0] sm:$0xff]  ;;  %v5319_v0 = vpack.c.bf16 %v531_v51, %v526_v50  ;;  %v543_v9 = vld [vmem:[%s11391_s3 + $0x5d8] sm:$0xff] }
  0x60   :  { %5310 = vmatprep.subr.bf16.mxu1 %v5309_v12  ;;  %v5321_v5 = vpack.c.bf16 %v542_v60, %v537_v57  ;;  %v547_v10 = vld [vmem:[%s11391_s3 + $0x5f8] sm:$0xff]  ;;  %v552_v12 = vld [vmem:[%s11391_s3 + $0x620] sm:$0xff]  ;;  %v549_v13 = vld [vmem:[%s11391_s3 + $0x608] sm:$0xff] }
  0x61   :  { %5456 = vmatpush1.bf16.msra.mxu0 %v5455_v54  ;;  %v5477_v54 = vpack.c.bf16 %v534_v46, %v529_v45  ;;  %v554_v14 = vld [vmem:[%s11391_s3 + $0x630] sm:$0xff]  ;;  %v551_v19 = vld [vmem:[%s11391_s3 + $0x618] sm:$0xff]  ;;  %v548_v22 = vld [vmem:[%s11391_s3 + $0x600] sm:$0xff] }
  0x62   :  { %5458 = vmatprep.subr.bf16.mxu0 %v5457_v55  ;;  %v528_v55 = vld [vmem:[%s11391_s3 + $0x560] sm:$0xff]  ;;  %v546_v18 = vld [vmem:[%s11391_s3 + $0x5f0] sm:$0xff]  ;;  %v5485_v21 = vpack.c.bf16 %v554_v14, %v549_v13  ;;  %v553_v23 = vld [vmem:[%s11391_s3 + $0x628] sm:$0xff] }
  0x63   :  { %5312 = vmatpush1.bf16.msra.mxu1 %v5311_v17  ;;  %v5479_v2 = vpack.c.bf16 %v533_v56, %v528_v55  ;;  %v562_v25 = vld [vmem:[%s11391_s3 + $0x670] sm:$0xff]  ;;  %v564_v27 = vld [vmem:[%s11391_s3 + $0x680] sm:$0xff]  ;;  %v561_v35 = vld [vmem:[%s11391_s3 + $0x668] sm:$0xff] }
  0x64   :  { %5314 = vmatprep.subr.bf16.mxu1 %v5313_v24  ;;  %v557_v24 = vld [vmem:[%s11391_s3 + $0x648] sm:$0xff]  ;;  %v563_v39 = vld [vmem:[%s11391_s3 + $0x678] sm:$0xff]  ;;  %v572_v41 = vld [vmem:[%s11391_s3 + $0x6c0] sm:$0xff] }
  0x65   :  { %5460 = vmatpush1.bf16.msra.mxu0 %v5459_v61  ;;  %v539_v61 = vld [vmem:[%s11391_s3 + $0x5b8] sm:$0xff]  ;;  %v5329_v36 = vpack.c.bf16 %v562_v25, %v557_v24  ;;  %v574_v44 = vld [vmem:[%s11391_s3 + $0x6d0] sm:$0xff]  ;;  %v573_v55 = vld [vmem:[%s11391_s3 + $0x6c8] sm:$0xff] }
  0x66   :  { %5462 = vmatprep.subr.bf16.mxu0 %v5461_v62  ;;  %v544_v62 = vld [vmem:[%s11391_s3 + $0x5e0] sm:$0xff]  ;;  %v567_v40 = vld [vmem:[%s11391_s3 + $0x698] sm:$0xff]  ;;  %v577_v56 = vld [vmem:[%s11391_s3 + $0x6e8] sm:$0xff] }
  0x67   :  { %v5481_v6 = vpack.c.bf16 %v544_v62, %v539_v61  ;;  %v5333_v51 = vpack.c.bf16 %v572_v41, %v567_v40  ;;  %v579_v60 = vld [vmem:[%s11391_s3 + $0x6f8] sm:$0xff]  ;;  %v584_v61 = vld [vmem:[%s11391_s3 + $0x720] sm:$0xff]  ;;  %v586_v14 = vld [vmem:[%s11391_s3 + $0x730] sm:$0xff] }
  0x68   :  { %v604_v24 = vld [vmem:[%s11391_s3 + $0x7c0] sm:$0xff]  ;;  %v614_v40 = vld [vmem:[%s11391_s3 + $0x810] sm:$0xff] }
  0x69   :  { %5464 = vmatpush1.bf16.msra.mxu0 %v5463_v3  ;;  %v541_v3 = vld [vmem:[%s11391_s3 + $0x5c8] sm:$0xff] }
  0x6a   :  { %5466 = vmatprep.subr.bf16.mxu0 %v5465_v4 }
  0x6d   :  { %5468 = vmatpush1.bf16.msra.mxu0 %v5467_v8  ;;  %v538_v8 = vld [vmem:[%s11391_s3 + $0x5b0] sm:$0xff] }
  0x6e   :  { %5470 = vmatprep.subr.bf16.mxu0 %v5469_v16  ;;  %v5323_v16 = vpack.c.bf16 %v541_v3, %v536_v58  ;;  %v5483_v17 = vpack.c.bf16 %v543_v9, %v538_v8  ;;  %v581_v58 = vld [vmem:[%s11391_s3 + $0x708] sm:$0xff]  ;;  %v587_v8 = vld [vmem:[%s11391_s3 + $0x738] sm:$0xff]  ;;  %v592_v9 = vld [vmem:[%s11391_s3 + $0x760] sm:$0xff] }
  0x71   :  { %5472 = vmatpush1.bf16.msra.mxu0 %v5471_v20  ;;  %v5325_v20 = vpack.c.bf16 %v552_v12, %v547_v10  ;;  %v589_v10 = vld [vmem:[%s11391_s3 + $0x748] sm:$0xff] }
  0x72   :  { %5474 = vmatprep.subr.bf16.mxu0 %v5473_v26  ;;  %v559_v26 = vld [vmem:[%s11391_s3 + $0x658] sm:$0xff] }
  0xf3   :  { %v205_v34 = vpop.f32.mrb[0].mxu0 }
  0xf4   :  { %v206_v37 = vadd.f32 %v205_v34, %v113_v32  ;;  %v207_v38 = vpop.f32.mrb[1].mxu0  ;;  %v5327_v32 = vpack.c.bf16 %v551_v19, %v546_v18  ;;  %v556_v34 = vld [vmem:[%s11391_s3 + $0x640] sm:$0xff] }
  0xf5   :  { %v208_v43 = vadd.f32 %v207_v38, %v117_v33  ;;  %v5487_v33 = vpack.c.bf16 %v553_v23, %v548_v22  ;;  %v558_v38 = vld [vmem:[%s11391_s3 + $0x650] sm:$0xff]  ;;  %v5331_v45 = vpack.c.bf16 %v561_v35, %v556_v34  ;;  %v588_v19 = vld [vmem:[%s11391_s3 + $0x740] sm:$0xff]  ;;  %v599_v23 = vld [vmem:[%s11391_s3 + $0x798] sm:$0xff] }
  0xf6   :  { %v7442_v52 = vmax.f32 %v206_v37, 0.0  ;;  %v5489_v37 = vpack.c.bf16 %v564_v27, %v559_v26  ;;  %v5491_v46 = vpack.c.bf16 %v563_v39, %v558_v38  ;;  %v602_v22 = vld [vmem:[%s11391_s3 + $0x7b0] sm:$0xff]  ;;  %v596_v27 = vld [vmem:[%s11391_s3 + $0x780] sm:$0xff]  ;;  %v5505_v34 = vpack.c.bf16 %v604_v24, %v599_v23  ;;  %v609_v39 = vld [vmem:[%s11391_s3 + $0x7e8] sm:$0xff] }
  0xf7   :  { %v7434_v47 = vmax.f32 %v208_v43, 0.0  ;;  %v569_v43 = vld [vmem:[%s11391_s3 + $0x6a8] sm:$0xff]  ;;  %v598_v35 = vld [vmem:[%s11391_s3 + $0x790] sm:$0xff]  ;;  %v612_v38 = vld [vmem:[%s11391_s3 + $0x800] sm:$0xff] }
  0xf8   :  { %v636_v23 = vld [vmem:[%s11391_s3 + $0x8c0] sm:$0xff]  ;;  %v641_v24 = vld [vmem:[%s11391_s3 + $0x8e8] sm:$0xff] }
  0xf9   :  { %847 = vmatprep.mubr.f32.mxu1 %v7434_v47  ;;  %1060 = vmatprep.mubr.f32.mxu0 %v7434_v47  ;;  %v7468_v63 = vpop.f32.mrb[0].mxu1 }
  0xfa   :  { %848 = vmatmul.mubr.f32.vlgmr.msra.gmra.mrb[2].mxu1 %v7442_v52  ;;  %1061 = vmatmul.mubr.f32.vlgmr.msra.gmra.mrb[4].mxu0 %v7442_v52  ;;  %v278_v4 = vpop.f32.mrb[1].mxu1 }
  0xfb   :  { %5316 = vmatpush1.bf16.msra.mxu1 %v5315_v48  ;;  %5476 = vmatpush1.bf16.msra.mxu0 %v5475_v49  ;;  %v279_v11 = vadd.f32 %v278_v4, %v125_v59  ;;  %v566_v48 = vld [vmem:[%s11391_s3 + $0x690] sm:$0xff]  ;;  %v571_v49 = vld [vmem:[%s11391_s3 + $0x6b8] sm:$0xff]  ;;  %v5497_v4 = vpack.c.bf16 %v584_v61, %v579_v60  ;;  %v616_v60 = vld [vmem:[%s11391_s3 + $0x820] sm:$0xff] }
  0xfc   :  { %5318 = vmatprep.subr.bf16.mxu1 %v5317_v53  ;;  %5478 = vmatprep.subr.bf16.mxu0 %v5477_v54  ;;  %v5493_v53 = vpack.c.bf16 %v574_v44, %v569_v43  ;;  %v568_v54 = vld [vmem:[%s11391_s3 + $0x6a0] sm:$0xff]  ;;  %v582_v59 = vld [vmem:[%s11391_s3 + $0x710] sm:$0xff]  ;;  %v5335_v62 = vpack.c.bf16 %v571_v49, %v566_v48  ;;  %v5509_v48 = vpack.c.bf16 %v614_v40, %v609_v39  ;;  %v621_v61 = vld [vmem:[%s11391_s3 + $0x848] sm:$0xff] }
  0xfd   :  { %v7494_v15 = vmax.f32 %v279_v11, 0.0  ;;  %v5337_v3 = vpack.c.bf16 %v582_v59, %v577_v56  ;;  %v594_v11 = vld [vmem:[%s11391_s3 + $0x770] sm:$0xff]  ;;  %v608_v49 = vld [vmem:[%s11391_s3 + $0x7e0] sm:$0xff]  ;;  %v651_v40 = vld [vmem:[%s11391_s3 + $0x938] sm:$0xff] }
  0xfe   :  { %v5501_v18 = vpack.c.bf16 %v594_v11, %v589_v10  ;;  %v606_v44 = vld [vmem:[%s11391_s3 + $0x7d0] sm:$0xff]  ;;  %v624_v56 = vld [vmem:[%s11391_s3 + $0x860] sm:$0xff]  ;;  %v631_v11 = vld [vmem:[%s11391_s3 + $0x898] sm:$0xff] }
  0xff   :  { %5320 = vmatpush1.bf16.msra.mxu1 %v5319_v0  ;;  %5480 = vmatpush1.bf16.msra.mxu0 %v5479_v2  ;;  %v5495_v0 = vpack.c.bf16 %v573_v55, %v568_v54  ;;  %v576_v2 = vld [vmem:[%s11391_s3 + $0x6e0] sm:$0xff]  ;;  %v622_v54 = vld [vmem:[%s11391_s3 + $0x850] sm:$0xff]  ;;  %v619_v55 = vld [vmem:[%s11391_s3 + $0x838] sm:$0xff] }
 0x100   :  { %5322 = vmatprep.subr.bf16.mxu1 %v5321_v5  ;;  %5482 = vmatprep.subr.bf16.mxu0 %v5481_v6  ;;  %v578_v5 = vld [vmem:[%s11391_s3 + $0x6f0] sm:$0xff]  ;;  %v583_v6 = vld [vmem:[%s11391_s3 + $0x718] sm:$0xff]  ;;  %v5339_v12 = vpack.c.bf16 %v581_v58, %v576_v2 }
 0x101   :  { %918 = vmatprep.mubr.f32.mxu1 %v7494_v15  ;;  %1131 = vmatprep.mubr.f32.mxu0 %v7494_v15  ;;  %v5499_v13 = vpack.c.bf16 %v583_v6, %v578_v5  ;;  %v618_v2 = vld [vmem:[%s11391_s3 + $0x830] sm:$0xff]  ;;  %v623_v58 = vld [vmem:[%s11391_s3 + $0x858] sm:$0xff]  ;;  %v629_v5 = vld [vmem:[%s11391_s3 + $0x888] sm:$0xff] }
 0x102   :  { %v634_v6 = vld [vmem:[%s11391_s3 + $0x8b0] sm:$0xff] }
 0x103   :  { %5324 = vmatpush1.bf16.msra.mxu1 %v5323_v16  ;;  %5484 = vmatpush1.bf16.msra.mxu0 %v5483_v17  ;;  %v591_v16 = vld [vmem:[%s11391_s3 + $0x758] sm:$0xff]  ;;  %v5341_v17 = vpack.c.bf16 %v592_v9, %v587_v8  ;;  %v5355_v8 = vpack.c.bf16 %v621_v61, %v616_v60  ;;  %v5515_v9 = vpack.c.bf16 %v623_v58, %v618_v2  ;;  %v626_v10 = vld [vmem:[%s11391_s3 + $0x870] sm:$0xff]  ;;  %v672_v2 = vld [vmem:[%s11391_s3 + $0x9e0] sm:$0xff] }
 0x104   :  { %5326 = vmatprep.subr.bf16.mxu1 %v5325_v20  ;;  %5486 = vmatprep.subr.bf16.mxu0 %v5485_v21  ;;  %v593_v20 = vld [vmem:[%s11391_s3 + $0x768] sm:$0xff]  ;;  %v5343_v25 = vpack.c.bf16 %v591_v16, %v586_v14  ;;  %v628_v14 = vld [vmem:[%s11391_s3 + $0x880] sm:$0xff]  ;;  %v646_v39 = vld [vmem:[%s11391_s3 + $0x910] sm:$0xff] }
 0x105   :  { %v597_v21 = vld [vmem:[%s11391_s3 + $0x788] sm:$0xff]  ;;  %v5503_v26 = vpack.c.bf16 %v593_v20, %v588_v19  ;;  %v639_v19 = vld [vmem:[%s11391_s3 + $0x8d8] sm:$0xff]  ;;  %v644_v20 = vld [vmem:[%s11391_s3 + $0x900] sm:$0xff] }
 0x106   :  { %v633_v16 = vld [vmem:[%s11391_s3 + $0x8a8] sm:$0xff]  ;;  %v658_v61 = vld [vmem:[%s11391_s3 + $0x970] sm:$0xff] }
 0x107   :  { %5328 = vmatpush1.bf16.msra.mxu1 %v5327_v32  ;;  %5488 = vmatpush1.bf16.msra.mxu0 %v5487_v33  ;;  %v7552_v50 = vpop.f32.mrb[2].mxu0  ;;  %v601_v32 = vld [vmem:[%s11391_s3 + $0x7a8] sm:$0xff]  ;;  %v5345_v33 = vpack.c.bf16 %v602_v22, %v597_v21  ;;  %v5359_v21 = vpack.c.bf16 %v631_v11, %v626_v10  ;;  %v5519_v22 = vpack.c.bf16 %v633_v16, %v628_v14  ;;  %v682_v16 = vld [vmem:[%s11391_s3 + $0xa30] sm:$0xff] }
 0x108   :  { %5330 = vmatprep.subr.bf16.mxu1 %v5329_v36  ;;  %5490 = vmatprep.subr.bf16.mxu0 %v5489_v37  ;;  %v5008_v57 = vpop.f32.mrb[3].mxu0  ;;  %v603_v36 = vld [vmem:[%s11391_s3 + $0x7b8] sm:$0xff]  ;;  %v5347_v41 = vpack.c.bf16 %v601_v32, %v596_v27  ;;  %v638_v27 = vld [vmem:[%s11391_s3 + $0x8d0] sm:$0xff]  ;;  %v669_v58 = vld [vmem:[%s11391_s3 + $0x9c8] sm:$0xff] }
 0x109   :  { %v607_v37 = vld [vmem:[%s11391_s3 + $0x7d8] sm:$0xff]  ;;  %v5507_v43 = vpack.c.bf16 %v603_v36, %v598_v35  ;;  %v649_v35 = vld [vmem:[%s11391_s3 + $0x928] sm:$0xff]  ;;  %v654_v36 = vld [vmem:[%s11391_s3 + $0x950] sm:$0xff] }
 0x10a   :  { %v643_v32 = vld [vmem:[%s11391_s3 + $0x8f8] sm:$0xff]  ;;  %v677_v14 = vld [vmem:[%s11391_s3 + $0xa08] sm:$0xff] }
 0x10b   :  { %5332 = vmatpush1.bf16.msra.mxu1 %v5331_v45  ;;  %5492 = vmatpush1.bf16.msra.mxu0 %v5491_v46  ;;  %v611_v45 = vld [vmem:[%s11391_s3 + $0x7f8] sm:$0xff]  ;;  %v5349_v46 = vpack.c.bf16 %v612_v38, %v607_v37  ;;  %v5363_v37 = vpack.c.bf16 %v641_v24, %v636_v23  ;;  %v5523_v38 = vpack.c.bf16 %v643_v32, %v638_v27  ;;  %v681_v23 = vld [vmem:[%s11391_s3 + $0xa28] sm:$0xff]  ;;  %v692_v32 = vld [vmem:[%s11391_s3 + $0xa80] sm:$0xff] }
 0x10c   :  { %5334 = vmatprep.subr.bf16.mxu1 %v5333_v51  ;;  %5494 = vmatprep.subr.bf16.mxu0 %v5493_v53  ;;  %v613_v51 = vld [vmem:[%s11391_s3 + $0x808] sm:$0xff]  ;;  %v5351_v57 = vpack.c.bf16 %v611_v45, %v606_v44  ;;  %v648_v44 = vld [vmem:[%s11391_s3 + $0x920] sm:$0xff]  ;;  %v5377_v24 = vpack.c.bf16 %v682_v16, %v677_v14  ;;  %v687_v27 = vld [vmem:[%s11391_s3 + $0xa58] sm:$0xff] }
 0x10d   :  { %v617_v53 = vld [vmem:[%s11391_s3 + $0x828] sm:$0xff]  ;;  %v5511_v59 = vpack.c.bf16 %v613_v51, %v608_v49  ;;  %v659_v49 = vld [vmem:[%s11391_s3 + $0x978] sm:$0xff]  ;;  %v664_v51 = vld [vmem:[%s11391_s3 + $0x9a0] sm:$0xff] }
 0x10e   :  { %v653_v45 = vld [vmem:[%s11391_s3 + $0x948] sm:$0xff]  ;;  %v5529_v60 = vpack.c.bf16 %v664_v51, %v659_v49  ;;  %v704_v49 = vld [vmem:[%s11391_s3 + $0xae0] sm:$0xff]  ;;  %v719_v14 = vld [vmem:[%s11391_s3 + $0xb58] sm:$0xff] }
 0x10f   :  { %5336 = vmatpush1.bf16.msra.mxu1 %v5335_v62  ;;  %5496 = vmatpush1.bf16.msra.mxu0 %v5495_v0  ;;  %v5353_v62 = vpack.c.bf16 %v622_v54, %v617_v53  ;;  %v5513_v0 = vpack.c.bf16 %v624_v56, %v619_v55  ;;  %v7765_v53 = vsub.s32 2, %v7390_v28  ;;  %v5367_v54 = vpack.c.bf16 %v651_v40, %v646_v39  ;;  %v656_v56 = vld [vmem:[%s11391_s3 + $0x960] sm:$0xff]  ;;  %v691_v39 = vld [vmem:[%s11391_s3 + $0xa78] sm:$0xff] }
 0x110   :  { %5338 = vmatprep.subr.bf16.mxu1 %v5337_v3  ;;  %5498 = vmatprep.subr.bf16.mxu0 %v5497_v4  ;;  %v627_v3 = vld [vmem:[%s11391_s3 + $0x878] sm:$0xff]  ;;  %v632_v4 = vld [vmem:[%s11391_s3 + $0x8a0] sm:$0xff]  ;;  %v5527_v55 = vpack.c.bf16 %v653_v45, %v648_v44  ;;  %v5381_v40 = vpack.c.bf16 %v692_v32, %v687_v27  ;;  %v693_v44 = vld [vmem:[%s11391_s3 + $0xa88] sm:$0xff] }
 0x111   :  { %v697_v45 = vld [vmem:[%s11391_s3 + $0xaa8] sm:$0xff]  ;;  %v724_v16 = vld [vmem:[%s11391_s3 + $0xb80] sm:$0xff]  ;;  %v734_v27 = vld [vmem:[%s11391_s3 + $0xbd0] sm:$0xff] }
 0x113   :  { %5340 = vmatpush1.bf16.msra.mxu1 %v5339_v12  ;;  %5500 = vmatpush1.bf16.msra.mxu0 %v5499_v13  ;;  %v5357_v12 = vpack.c.bf16 %v632_v4, %v627_v3  ;;  %v5517_v13 = vpack.c.bf16 %v634_v6, %v629_v5  ;;  %v674_v3 = vld [vmem:[%s11391_s3 + $0x9f0] sm:$0xff]  ;;  %v121_v4 = vrot.slane %v7398_v30, %v7765_v53 }
 0x114   :  { %5342 = vmatprep.subr.bf16.mxu1 %v5341_v17  ;;  %5502 = vmatprep.subr.bf16.mxu0 %v5501_v18  ;;  %v637_v17 = vld [vmem:[%s11391_s3 + $0x8c8] sm:$0xff]  ;;  %v642_v18 = vld [vmem:[%s11391_s3 + $0x8f0] sm:$0xff]  ;;  %v5533_v11 = vpack.c.bf16 %v674_v3, %v669_v58 }
 0x115   :  { %v714_v58 = vld [vmem:[%s11391_s3 + $0xb30] sm:$0xff] }
 0x117   :  { %5344 = vmatpush1.bf16.msra.mxu1 %v5343_v25  ;;  %5504 = vmatpush1.bf16.msra.mxu0 %v5503_v26  ;;  %v5361_v25 = vpack.c.bf16 %v642_v18, %v637_v17  ;;  %v5521_v26 = vpack.c.bf16 %v644_v20, %v639_v19  ;;  %v679_v17 = vld [vmem:[%s11391_s3 + $0xa18] sm:$0xff]  ;;  %v684_v18 = vld [vmem:[%s11391_s3 + $0xa40] sm:$0xff]  ;;  %v277_v19 = vadd.f32 %v7468_v63, %v121_v4  ;;  %v678_v63 = vld [vmem:[%s11391_s3 + $0xa10] sm:$0xff] }
 0x118   :  { %5346 = vmatprep.subr.bf16.mxu1 %v5345_v33  ;;  %5506 = vmatprep.subr.bf16.mxu0 %v5505_v34  ;;  %v647_v33 = vld [vmem:[%s11391_s3 + $0x918] sm:$0xff]  ;;  %v652_v34 = vld [vmem:[%s11391_s3 + $0x940] sm:$0xff] }
 0x11b   :  { %5348 = vmatpush1.bf16.msra.mxu1 %v5347_v41  ;;  %5508 = vmatpush1.bf16.msra.mxu0 %v5507_v43  ;;  %v5365_v41 = vpack.c.bf16 %v652_v34, %v647_v33  ;;  %v5525_v43 = vpack.c.bf16 %v654_v36, %v649_v35  ;;  %v689_v33 = vld [vmem:[%s11391_s3 + $0xa68] sm:$0xff]  ;;  %v694_v34 = vld [vmem:[%s11391_s3 + $0xa90] sm:$0xff]  ;;  %v7842_v35 = vmax.f32 %v277_v19, 0.0  ;;  %v716_v19 = vld [vmem:[%s11391_s3 + $0xb40] sm:$0xff] }
 0x11c   :  { %5350 = vmatprep.subr.bf16.mxu1 %v5349_v46  ;;  %5510 = vmatprep.subr.bf16.mxu0 %v5509_v48  ;;  %v657_v46 = vld [vmem:[%s11391_s3 + $0x968] sm:$0xff]  ;;  %v662_v48 = vld [vmem:[%s11391_s3 + $0x990] sm:$0xff] }
 0x11f   :  { %5352 = vmatpush1.bf16.msra.mxu1 %v5351_v57  ;;  %5512 = vmatpush1.bf16.msra.mxu0 %v5511_v59  ;;  %v661_v57 = vld [vmem:[%s11391_s3 + $0x988] sm:$0xff]  ;;  %v5369_v59 = vpack.c.bf16 %v662_v48, %v657_v46  ;;  %v702_v46 = vld [vmem:[%s11391_s3 + $0xad0] sm:$0xff]  ;;  %v699_v48 = vld [vmem:[%s11391_s3 + $0xab8] sm:$0xff] }
 0x120   :  { %5354 = vmatprep.subr.bf16.mxu1 %v5353_v62  ;;  %5514 = vmatprep.subr.bf16.mxu0 %v5513_v0  ;;  %v663_v62 = vld [vmem:[%s11391_s3 + $0x998] sm:$0xff]  ;;  %v5371_v5 = vpack.c.bf16 %v661_v57, %v656_v56  ;;  %v701_v56 = vld [vmem:[%s11391_s3 + $0xac8] sm:$0xff]  ;;  %v5385_v57 = vpack.c.bf16 %v702_v46, %v697_v45  ;;  %v744_v45 = vld [vmem:[%s11391_s3 + $0xc20] sm:$0xff]  ;;  %v7969_v46 = vsub.s32 4, %v7390_v28 }
 0x121   :  { %v667_v0 = vld [vmem:[%s11391_s3 + $0x9b8] sm:$0xff]  ;;  %v5531_v6 = vpack.c.bf16 %v663_v62, %v658_v61  ;;  %v738_v28 = vld [vmem:[%s11391_s3 + $0xbf0] sm:$0xff] }
 0x122   :  { %v5373_v10 = vpack.c.bf16 %v672_v2, %v667_v0  ;;  %v703_v61 = vld [vmem:[%s11391_s3 + $0xad8] sm:$0xff]  ;;  %v712_v0 = vld [vmem:[%s11391_s3 + $0xb20] sm:$0xff]  ;;  %v709_v2 = vld [vmem:[%s11391_s3 + $0xb08] sm:$0xff] }
 0x123   :  { %5356 = vmatpush1.bf16.msra.mxu1 %v5355_v8  ;;  %5516 = vmatpush1.bf16.msra.mxu0 %v5515_v9  ;;  %v666_v8 = vld [vmem:[%s11391_s3 + $0x9b0] sm:$0xff]  ;;  %v671_v9 = vld [vmem:[%s11391_s3 + $0x9d8] sm:$0xff] }
 0x124   :  { %5358 = vmatprep.subr.bf16.mxu1 %v5357_v12  ;;  %5518 = vmatprep.subr.bf16.mxu0 %v5517_v13  ;;  %v668_v12 = vld [vmem:[%s11391_s3 + $0x9c0] sm:$0xff]  ;;  %v673_v13 = vld [vmem:[%s11391_s3 + $0x9e8] sm:$0xff]  ;;  %v5375_v20 = vpack.c.bf16 %v671_v9, %v666_v8  ;;  %v707_v62 = vld [vmem:[%s11391_s3 + $0xaf8] sm:$0xff]  ;;  %v5549_v9 = vpack.c.bf16 %v714_v58, %v709_v2 }
 0x125   :  { %v5389_v8 = vpack.c.bf16 %v712_v0, %v707_v62  ;;  %v754_v62 = vld [vmem:[%s11391_s3 + $0xc70] sm:$0xff]  ;;  %v129_v0 = vrot.slane %v7398_v30, %v7969_v46  ;;  %v748_v30 = vld [vmem:[%s11391_s3 + $0xc40] sm:$0xff] }
 0x127   :  { %5360 = vmatpush1.bf16.msra.mxu1 %v5359_v21  ;;  %5520 = vmatpush1.bf16.msra.mxu0 %v5519_v22  ;;  %v5535_v21 = vpack.c.bf16 %v673_v13, %v668_v12  ;;  %v676_v22 = vld [vmem:[%s11391_s3 + $0xa00] sm:$0xff]  ;;  %v717_v12 = vld [vmem:[%s11391_s3 + $0xb48] sm:$0xff]  ;;  %v722_v13 = vld [vmem:[%s11391_s3 + $0xb70] sm:$0xff] }
 0x128   :  { %5362 = vmatprep.subr.bf16.mxu1 %v5361_v25  ;;  %5522 = vmatprep.subr.bf16.mxu0 %v5521_v26  ;;  %v5537_v25 = vpack.c.bf16 %v684_v18, %v679_v17  ;;  %v683_v26 = vld [vmem:[%s11391_s3 + $0xa38] sm:$0xff]  ;;  %v5379_v36 = vpack.c.bf16 %v681_v23, %v676_v22  ;;  %v5553_v22 = vpack.c.bf16 %v724_v16, %v719_v14  ;;  %v718_v23 = vld [vmem:[%s11391_s3 + $0xb50] sm:$0xff] }
 0x12b   :  { %5364 = vmatpush1.bf16.msra.mxu1 %v5363_v37  ;;  %5524 = vmatpush1.bf16.msra.mxu0 %v5523_v38  ;;  %v5539_v37 = vpack.c.bf16 %v683_v26, %v678_v63  ;;  %v686_v38 = vld [vmem:[%s11391_s3 + $0xa50] sm:$0xff]  ;;  %v732_v63 = vld [vmem:[%s11391_s3 + $0xbc0] sm:$0xff]  ;;  %v729_v26 = vld [vmem:[%s11391_s3 + $0xba8] sm:$0xff] }
 0x12c   :  { %5366 = vmatprep.subr.bf16.mxu1 %v5365_v41  ;;  %5526 = vmatprep.subr.bf16.mxu0 %v5525_v43  ;;  %v5541_v41 = vpack.c.bf16 %v694_v34, %v689_v33  ;;  %v688_v43 = vld [vmem:[%s11391_s3 + $0xa60] sm:$0xff]  ;;  %v5383_v51 = vpack.c.bf16 %v691_v39, %v686_v38  ;;  %v726_v34 = vld [vmem:[%s11391_s3 + $0xb90] sm:$0xff]  ;;  %v5557_v38 = vpack.c.bf16 %v734_v27, %v729_v26 }
 0x12d   :  { %v728_v39 = vld [vmem:[%s11391_s3 + $0xba0] sm:$0xff] }
 0x12f   :  { %5368 = vmatpush1.bf16.msra.mxu1 %v5367_v54  ;;  %5528 = vmatpush1.bf16.msra.mxu0 %v5527_v55  ;;  %v5543_v54 = vpack.c.bf16 %v693_v44, %v688_v43  ;;  %v696_v55 = vld [vmem:[%s11391_s3 + $0xaa0] sm:$0xff]  ;;  %v742_v43 = vld [vmem:[%s11391_s3 + $0xc10] sm:$0xff]  ;;  %v739_v44 = vld [vmem:[%s11391_s3 + $0xbf8] sm:$0xff] }
 0x130   :  { %5370 = vmatprep.subr.bf16.mxu1 %v5369_v59  ;;  %5530 = vmatprep.subr.bf16.mxu0 %v5529_v60  ;;  %v5545_v59 = vpack.c.bf16 %v704_v49, %v699_v48  ;;  %v698_v60 = vld [vmem:[%s11391_s3 + $0xab0] sm:$0xff]  ;;  %v5387_v3 = vpack.c.bf16 %v701_v56, %v696_v55  ;;  %v5561_v56 = vpack.c.bf16 %v744_v45, %v739_v44 }
 0x131   :  { %v5547_v4 = vpack.c.bf16 %v703_v61, %v698_v60  ;;  %v752_v60 = vld [vmem:[%s11391_s3 + $0xc60] sm:$0xff]  ;;  %v749_v61 = vld [vmem:[%s11391_s3 + $0xc48] sm:$0xff] }
 0x133   :  { %5372 = vmatpush1.bf16.msra.mxu1 %v5371_v5  ;;  %5532 = vmatpush1.bf16.msra.mxu0 %v5531_v6  ;;  %v706_v5 = vld [vmem:[%s11391_s3 + $0xaf0] sm:$0xff]  ;;  %v711_v6 = vld [vmem:[%s11391_s3 + $0xb18] sm:$0xff] }
 0x134   :  { %5374 = vmatprep.subr.bf16.mxu1 %v5373_v10  ;;  %5534 = vmatprep.subr.bf16.mxu0 %v5533_v11  ;;  %v708_v10 = vld [vmem:[%s11391_s3 + $0xb00] sm:$0xff]  ;;  %v713_v11 = vld [vmem:[%s11391_s3 + $0xb28] sm:$0xff]  ;;  %v5391_v17 = vpack.c.bf16 %v711_v6, %v706_v5  ;;  %v5565_v6 = vpack.c.bf16 %v754_v62, %v749_v61  ;;  %v390_v62 = vld [vmem:[%s11391_s3 + $0x110] sm:$0xff] }
 0x135   :  { %v5551_v18 = vpack.c.bf16 %v713_v11, %v708_v10  ;;  %v445_v10 = vld [vmem:[%s11391_s3 + $0x2c8] sm:$0xff]  ;;  %v600_v11 = vld [vmem:[%s11391_s3 + $0x7a0] sm:$0xff] }
 0x137   :  { %5376 = vmatpush1.bf16.msra.mxu1 %v5375_v20  ;;  %5536 = vmatpush1.bf16.msra.mxu0 %v5535_v21  ;;  %v721_v20 = vld [vmem:[%s11391_s3 + $0xb68] sm:$0xff]  ;;  %v5393_v21 = vpack.c.bf16 %v722_v13, %v717_v12  ;;  %v348_v13 = vadd.f32 %v7552_v50, %v129_v0  ;;  %v520_v50 = vld [vmem:[%s11391_s3 + $0x520] sm:$0xff]  ;;  %v395_v0 = vld [vmem:[%s11391_s3 + $0x138] sm:$0xff] }
 0x138   :  { %5378 = vmatprep.subr.bf16.mxu1 %v5377_v24  ;;  %5538 = vmatprep.subr.bf16.mxu0 %v5537_v25  ;;  %v723_v24 = vld [vmem:[%s11391_s3 + $0xb78] sm:$0xff]  ;;  %v5395_v32 = vpack.c.bf16 %v721_v20, %v716_v19  ;;  %v605_v12 = vld [vmem:[%s11391_s3 + $0x7c8] sm:$0xff]  ;;  %v360_v19 = vld [vmem:[%s11391_s3 + $0x20] sm:$0xff] }
 0x139   :  { %v727_v25 = vld [vmem:[%s11391_s3 + $0xb98] sm:$0xff]  ;;  %v5555_v33 = vpack.c.bf16 %v723_v24, %v718_v23  ;;  %v365_v20 = vld [vmem:[%s11391_s3 + $0x48] sm:$0xff]  ;;  %v8037_v23 = vmax.f32 %v348_v13, 0.0  ;;  %v560_v13 = vld [vmem:[%s11391_s3 + $0x660] sm:$0xff] }
 0x13a   :  { %919 = vmatmul.mubr.f32.vlgmr.msra.gmra.mrb[2].mxu1 %v7842_v35  ;;  %1132 = vmatmul.mubr.f32.vlgmr.msra.gmra.mrb[4].mxu0 %v7842_v35  ;;  %v455_v24 = vld [vmem:[%s11391_s3 + $0x318] sm:$0xff]  ;;  %v5571_v26 = vpack.c.bf16 %v365_v20, %v360_v19  ;;  %v650_v19 = vld [vmem:[%s11391_s3 + $0x930] sm:$0xff] }
 0x13b   :  { %5380 = vmatpush1.bf16.msra.mxu1 %v5379_v36  ;;  %5540 = vmatpush1.bf16.msra.mxu0 %v5539_v37  ;;  %v731_v36 = vld [vmem:[%s11391_s3 + $0xbb8] sm:$0xff]  ;;  %v5397_v37 = vpack.c.bf16 %v732_v63, %v727_v25  ;;  %v610_v25 = vld [vmem:[%s11391_s3 + $0x7f0] sm:$0xff] }
 0x13c   :  { %5382 = vmatprep.subr.bf16.mxu1 %v5381_v40  ;;  %5542 = vmatprep.subr.bf16.mxu0 %v5541_v41  ;;  %v733_v40 = vld [vmem:[%s11391_s3 + $0xbc8] sm:$0xff]  ;;  %v5399_v48 = vpack.c.bf16 %v731_v36, %v726_v34  ;;  %v615_v63 = vld [vmem:[%s11391_s3 + $0x818] sm:$0xff]  ;;  %v530_v34 = vld [vmem:[%s11391_s3 + $0x570] sm:$0xff] }
 0x13d   :  { %989 = vmatprep.mubr.f32.mxu1 %v6730_v7  ;;  %1202 = vmatprep.mubr.f32.mxu0 %v6730_v7  ;;  %v737_v41 = vld [vmem:[%s11391_s3 + $0xbe8] sm:$0xff]  ;;  %v5559_v49 = vpack.c.bf16 %v733_v40, %v728_v39  ;;  %v460_v39 = vld [vmem:[%s11391_s3 + $0x340] sm:$0xff]  ;;  %v655_v20 = vld [vmem:[%s11391_s3 + $0x958] sm:$0xff] }
 0x13e   :  { %v5401_v55 = vpack.c.bf16 %v742_v43, %v737_v41  ;;  %v465_v40 = vld [vmem:[%s11391_s3 + $0x368] sm:$0xff]  ;;  %v620_v41 = vld [vmem:[%s11391_s3 + $0x840] sm:$0xff] }
 0x13f   :  { %5384 = vmatpush1.bf16.msra.mxu1 %v5383_v51  ;;  %5544 = vmatpush1.bf16.msra.mxu0 %v5543_v54  ;;  %v736_v51 = vld [vmem:[%s11391_s3 + $0xbe0] sm:$0xff]  ;;  %v741_v54 = vld [vmem:[%s11391_s3 + $0xc08] sm:$0xff] }
 0x140   :  { %5386 = vmatprep.subr.bf16.mxu1 %v5385_v57  ;;  %5546 = vmatprep.subr.bf16.mxu0 %v5545_v59  ;;  %v743_v57 = vld [vmem:[%s11391_s3 + $0xc18] sm:$0xff]  ;;  %v5403_v2 = vpack.c.bf16 %v741_v54, %v736_v51  ;;  %v625_v43 = vld [vmem:[%s11391_s3 + $0x868] sm:$0xff]  ;;  %v540_v54 = vld [vmem:[%s11391_s3 + $0x5c0] sm:$0xff] }
 0x141   :  { %v747_v59 = vld [vmem:[%s11391_s3 + $0xc38] sm:$0xff]  ;;  %v5563_v58 = vpack.c.bf16 %v743_v57, %v738_v28  ;;  %v385_v51 = vld [vmem:[%s11391_s3 + $0xe8] sm:$0xff]  ;;  %v630_v28 = vld [vmem:[%s11391_s3 + $0x890] sm:$0xff] }
 0x142   :  { %v5405_v5 = vpack.c.bf16 %v752_v60, %v747_v59  ;;  %v635_v57 = vld [vmem:[%s11391_s3 + $0x8b8] sm:$0xff] }
 0x143   :  { %5388 = vmatpush1.bf16.msra.mxu1 %v5387_v3  ;;  %5548 = vmatpush1.bf16.msra.mxu0 %v5547_v4  ;;  %v746_v3 = vld [vmem:[%s11391_s3 + $0xc30] sm:$0xff]  ;;  %v751_v4 = vld [vmem:[%s11391_s3 + $0xc58] sm:$0xff] }
 0x144   :  { %5390 = vmatprep.subr.bf16.mxu1 %v5389_v8  ;;  %5550 = vmatprep.subr.bf16.mxu0 %v5549_v9  ;;  %v753_v8 = vld [vmem:[%s11391_s3 + $0xc68] sm:$0xff]  ;;  %v440_v9 = vld [vmem:[%s11391_s3 + $0x2a0] sm:$0xff]  ;;  %v5407_v14 = vpack.c.bf16 %v751_v4, %v746_v3  ;;  %v555_v3 = vld [vmem:[%s11391_s3 + $0x638] sm:$0xff] }
 0x145   :  { %v5567_v16 = vpack.c.bf16 %v753_v8, %v748_v30  ;;  %v480_v4 = vld [vmem:[%s11391_s3 + $0x3e0] sm:$0xff]  ;;  %v645_v30 = vld [vmem:[%s11391_s3 + $0x908] sm:$0xff]  ;;  %v5583_v8 = vpack.c.bf16 %v395_v0, %v390_v62 }
 0x146   :  { %v1428_v62 = vld [vmem:[%s11393_s5 + $0x20] sm:$0xff] }
 0x147   :  { %5392 = vmatpush1.bf16.msra.mxu1 %v5391_v17  ;;  %5552 = vmatpush1.bf16.msra.mxu0 %v5551_v18  ;;  %v5569_v17 = vpack.c.bf16 %v445_v10, %v440_v9  ;;  %v5601_v18 = vpack.c.bf16 %v605_v12, %v600_v11  ;;  %v400_v11 = vld [vmem:[%s11391_s3 + $0x160] sm:$0xff]  ;;  %v405_v12 = vld [vmem:[%s11391_s3 + $0x188] sm:$0xff] }
 0x148   :  { %5394 = vmatprep.subr.bf16.mxu1 %v5393_v21  ;;  %5554 = vmatprep.subr.bf16.mxu0 %v5553_v22  ;;  %v525_v21 = vld [vmem:[%s11391_s3 + $0x548] sm:$0xff]  ;;  %v450_v22 = vld [vmem:[%s11391_s3 + $0x2f0] sm:$0xff] }
 0x149   :  { %v5603_v27 = vpack.c.bf16 %v525_v21, %v520_v50  ;;  %v5573_v36 = vpack.c.bf16 %v455_v24, %v450_v22  ;;  %v5587_v50 = vpack.c.bf16 %v405_v12, %v400_v11  ;;  %v410_v24 = vld [vmem:[%s11391_s3 + $0x1b0] sm:$0xff]  ;;  %v695_v11 = vld [vmem:[%s11391_s3 + $0xa98] sm:$0xff] }
 0x14b   :  { %5396 = vmatpush1.bf16.msra.mxu1 %v5395_v32  ;;  %5556 = vmatpush1.bf16.msra.mxu0 %v5555_v33  ;;  %v370_v32 = vld [vmem:[%s11391_s3 + $0x70] sm:$0xff]  ;;  %v375_v33 = vld [vmem:[%s11391_s3 + $0x98] sm:$0xff] }
 0x14c   :  { %5398 = vmatprep.subr.bf16.mxu1 %v5397_v37  ;;  %5558 = vmatprep.subr.bf16.mxu0 %v5557_v38  ;;  %v5605_v37 = vpack.c.bf16 %v615_v63, %v610_v25  ;;  %v535_v38 = vld [vmem:[%s11391_s3 + $0x598] sm:$0xff]  ;;  %v5575_v44 = vpack.c.bf16 %v375_v33, %v370_v32  ;;  %v570_v63 = vld [vmem:[%s11391_s3 + $0x6b0] sm:$0xff]  ;;  %v500_v32 = vld [vmem:[%s11391_s3 + $0x480] sm:$0xff] }
 0x14d   :  { %v5607_v45 = vpack.c.bf16 %v535_v38, %v530_v34  ;;  %v415_v25 = vld [vmem:[%s11391_s3 + $0x1d8] sm:$0xff]  ;;  %v505_v33 = vld [vmem:[%s11391_s3 + $0x4a8] sm:$0xff]  ;;  %v660_v34 = vld [vmem:[%s11391_s3 + $0x980] sm:$0xff] }
 0x14f   :  { %5400 = vmatpush1.bf16.msra.mxu1 %v5399_v48  ;;  %5560 = vmatpush1.bf16.msra.mxu0 %v5559_v49  ;;  %v5577_v48 = vpack.c.bf16 %v465_v40, %v460_v39  ;;  %v380_v49 = vld [vmem:[%s11391_s3 + $0xc0] sm:$0xff]  ;;  %v5593_v39 = vpack.c.bf16 %v505_v33, %v500_v32 }
 0x150   :  { %5402 = vmatprep.subr.bf16.mxu1 %v5401_v55  ;;  %5562 = vmatprep.subr.bf16.mxu0 %v5561_v56  ;;  %v470_v55 = vld [vmem:[%s11391_s3 + $0x390] sm:$0xff]  ;;  %v475_v56 = vld [vmem:[%s11391_s3 + $0x3b8] sm:$0xff]  ;;  %v5579_v59 = vpack.c.bf16 %v385_v51, %v380_v49  ;;  %v420_v40 = vld [vmem:[%s11391_s3 + $0x200] sm:$0xff] }
 0x151   :  { %v5581_v61 = vpack.c.bf16 %v475_v56, %v470_v55  ;;  %v515_v49 = vld [vmem:[%s11391_s3 + $0x4f8] sm:$0xff]  ;;  %v670_v51 = vld [vmem:[%s11391_s3 + $0x9d0] sm:$0xff] }
 0x152   :  { %v430_v56 = vld [vmem:[%s11391_s3 + $0x250] sm:$0xff] }
 0x153   :  { %5404 = vmatpush1.bf16.msra.mxu1 %v5403_v2  ;;  %5564 = vmatpush1.bf16.msra.mxu0 %v5563_v58  ;;  %v550_v2 = vld [vmem:[%s11391_s3 + $0x610] sm:$0xff]  ;;  %v5613_v58 = vpack.c.bf16 %v635_v57, %v630_v28  ;;  %v435_v28 = vld [vmem:[%s11391_s3 + $0x278] sm:$0xff] }
 0x154   :  { %5406 = vmatprep.subr.bf16.mxu1 %v5405_v5  ;;  %5566 = vmatprep.subr.bf16.mxu0 %v5565_v6  ;;  %v485_v5 = vld [vmem:[%s11391_s3 + $0x408] sm:$0xff]  ;;  %v640_v6 = vld [vmem:[%s11391_s3 + $0x8e0] sm:$0xff]  ;;  %v5615_v9 = vpack.c.bf16 %v555_v3, %v550_v2  ;;  %v5599_v0 = vpack.c.bf16 %v435_v28, %v430_v56  ;;  %v1454_v28 = vld [vmem:[%s11393_s5 + $0xf0] sm:$0xff] }
 0x155   :  { %v5585_v10 = vpack.c.bf16 %v485_v5, %v480_v4  ;;  %v685_v3 = vld [vmem:[%s11391_s3 + $0xa48] sm:$0xff]  ;;  %v1424_v5 = vld [vmem:[%s11393_s5] sm:$0xff] }
 0x157   :  { %5408 = vmatpush1.bf16.msra.mxu1 %v5407_v14  ;;  %5568 = vmatpush1.bf16.msra.mxu0 %v5567_v16  ;;  %v5617_v14 = vpack.c.bf16 %v645_v30, %v640_v6  ;;  %v565_v16 = vld [vmem:[%s11391_s3 + $0x688] sm:$0xff]  ;;  %v1427_v6 = vld [vmem:[%s11393_s5 + $0x18] sm:$0xff] }
 0x158   :  { %5570 = vmatprep.subr.bf16.mxu1 %v5569_v17  ;;  %5602 = vmatprep.subr.bf16.mxu0 %v5601_v18  ;;  %v490_v17 = vld [vmem:[%s11391_s3 + $0x430] sm:$0xff]  ;;  %v495_v18 = vld [vmem:[%s11391_s3 + $0x458] sm:$0xff]  ;;  %v5619_v21 = vpack.c.bf16 %v565_v16, %v560_v13  ;;  %v5659_v12 = vpack.c.bf16 %v1427_v6, %v1424_v5  ;;  %v1433_v16 = vld [vmem:[%s11393_s5 + $0x48] sm:$0xff] }
 0x159   :  { %v5589_v22 = vpack.c.bf16 %v495_v18, %v490_v17  ;;  %v1437_v18 = vld [vmem:[%s11393_s5 + $0x68] sm:$0xff]  ;;  %v1467_v6 = vld [vmem:[%s11393_s5 + $0x158] sm:$0xff] }
 0x15a   :  { %990 = vmatmul.mubr.f32.vlgmr.msra.gmra.mrb[2].mxu1 %v8037_v23  ;;  %1203 = vmatmul.mubr.f32.vlgmr.msra.gmra.mrb[4].mxu0 %v8037_v23 }
 0x15b   :  { %5572 = vmatpush3.bf16.msra.mxu1 %v5571_v26  ;;  %1273 = vmatprep.mubr.f32.mxu1 %v7434_v47  ;;  %v5609_v47 = vpack.c.bf16 %v625_v43, %v620_v41  ;;  %v5621_v26 = vpack.c.bf16 %v655_v20, %v650_v19  ;;  %v425_v41 = vld [vmem:[%s11391_s3 + $0x228] sm:$0xff]  ;;  %v580_v43 = vld [vmem:[%s11391_s3 + $0x700] sm:$0xff] }
 0x15c   :  { %5604 = vmatpush3.bf16.msra.mxu0 %v5603_v27  ;;  %1343 = vmatprep.mubr.f32.mxu0 %v7494_v15  ;;  %v545_v15 = vld [vmem:[%s11391_s3 + $0x5e8] sm:$0xff]  ;;  %v575_v27 = vld [vmem:[%s11391_s3 + $0x6d8] sm:$0xff]  ;;  %v700_v19 = vld [vmem:[%s11391_s3 + $0xac0] sm:$0xff] }
 0x15d   :  { %5574 = vmatprep.subr.bf16.mxu1 %v5573_v36  ;;  %5606 = vmatprep.subr.bf16.mxu0 %v5605_v37  ;;  %v5611_v60 = vpack.c.bf16 %v545_v15, %v540_v54  ;;  %v665_v36 = vld [vmem:[%s11391_s3 + $0x9a8] sm:$0xff]  ;;  %v5591_v37 = vpack.c.bf16 %v415_v25, %v410_v24  ;;  %v5623_v38 = vpack.c.bf16 %v575_v27, %v570_v63  ;;  %v675_v54 = vld [vmem:[%s11391_s3 + $0x9f8] sm:$0xff]  ;;  %v1446_v63 = vld [vmem:[%s11393_s5 + $0xb0] sm:$0xff] }
 0x15e   :  { %v5629_v57 = vpack.c.bf16 %v675_v54, %v670_v51  ;;  %v1443_v25 = vld [vmem:[%s11393_s5 + $0x98] sm:$0xff]  ;;  %v1458_v54 = vld [vmem:[%s11393_s5 + $0x110] sm:$0xff] }
 0x15f   :  { %5576 = vmatpush3.bf16.msra.mxu1 %v5575_v44  ;;  %v5625_v44 = vpack.c.bf16 %v665_v36, %v660_v34  ;;  %v715_v27 = vld [vmem:[%s11391_s3 + $0xb38] sm:$0xff]  ;;  %v5669_v33 = vpack.c.bf16 %v1446_v63, %v1443_v25  ;;  %v1442_v34 = vld [vmem:[%s11393_s5 + $0x90] sm:$0xff]  ;;  %v1445_v36 = vld [vmem:[%s11393_s5 + $0xa8] sm:$0xff] }
 0x160   :  { %5608 = vmatpush3.bf16.msra.mxu0 %v5607_v45  ;;  %5578 = vmatprep.subr.bf16.mxu1 %v5577_v48  ;;  %v585_v45 = vld [vmem:[%s11391_s3 + $0x728] sm:$0xff]  ;;  %v510_v48 = vld [vmem:[%s11391_s3 + $0x4d0] sm:$0xff]  ;;  %v1455_v51 = vld [vmem:[%s11393_s5 + $0xf8] sm:$0xff] }
 0x161   :  { %5610 = vmatprep.subr.bf16.mxu0 %v5609_v47  ;;  %v5595_v47 = vpack.c.bf16 %v425_v41, %v420_v40  ;;  %v5627_v15 = vpack.c.bf16 %v585_v45, %v580_v43  ;;  %v5597_v55 = vpack.c.bf16 %v515_v49, %v510_v48  ;;  %v720_v40 = vld [vmem:[%s11391_s3 + $0xb60] sm:$0xff]  ;;  %v725_v41 = vld [vmem:[%s11391_s3 + $0xb88] sm:$0xff]  ;;  %v5671_v43 = vpack.c.bf16 %v1445_v36, %v1442_v34  ;;  %v1451_v48 = vld [vmem:[%s11393_s5 + $0xd8] sm:$0xff] }
 0x162   :  { %v1448_v45 = vld [vmem:[%s11393_s5 + $0xc0] sm:$0xff]  ;;  %v5646_v49 = vpack.c.bf16 %v725_v41, %v720_v40  ;;  %v5677_v56 = vpack.c.bf16 %v1458_v54, %v1455_v51  ;;  %v1475_v63 = vld [vmem:[%s11393_s5 + $0x198] sm:$0xff]  ;;  %v1478_v41 = vld [vmem:[%s11393_s5 + $0x1b0] sm:$0xff] }
 0x163   :  { %5580 = vmatpush3.bf16.msra.mxu1 %v5579_v59  ;;  %v590_v59 = vld [vmem:[%s11391_s3 + $0x750] sm:$0xff]  ;;  %v1472_v25 = vld [vmem:[%s11393_s5 + $0x180] sm:$0xff]  ;;  %v1435_v36 = vld [vmem:[%s11393_s5 + $0x58] sm:$0xff] }
 0x164   :  { %5612 = vmatpush3.bf16.msra.mxu0 %v5611_v60  ;;  %5582 = vmatprep.subr.bf16.mxu1 %v5581_v61  ;;  %v595_v60 = vld [vmem:[%s11391_s3 + $0x778] sm:$0xff]  ;;  %v1425_v61 = vld [vmem:[%s11393_s5 + $0x8] sm:$0xff]  ;;  %v1432_v34 = vld [vmem:[%s11393_s5 + $0x40] sm:$0xff] }
 0x165   :  { %5614 = vmatprep.subr.bf16.mxu0 %v5613_v58  ;;  %v5631_v2 = vpack.c.bf16 %v595_v60, %v590_v59  ;;  %v680_v58 = vld [vmem:[%s11391_s3 + $0xa20] sm:$0xff]  ;;  %v5657_v4 = vpack.c.bf16 %v1428_v62, %v1425_v61  ;;  %v1461_v60 = vld [vmem:[%s11393_s5 + $0x128] sm:$0xff] }
 0x166   :  { %v5634_v30 = vpack.c.bf16 %v685_v3, %v680_v58  ;;  %v1464_v61 = vld [vmem:[%s11393_s5 + $0x140] sm:$0xff]  ;;  %v1441_v51 = vld [vmem:[%s11393_s5 + $0x88] sm:$0xff] }
 0x167   :  { %5584 = vmatpush3.bf16.msra.mxu1 %v5583_v8  ;;  %v1431_v8 = vld [vmem:[%s11393_s5 + $0x38] sm:$0xff]  ;;  %v740_v62 = vld [vmem:[%s11391_s3 + $0xc00] sm:$0xff]  ;;  %v5681_v58 = vpack.c.bf16 %v1464_v61, %v1461_v60  ;;  %v1494_v60 = vld [vmem:[%s11393_s5 + $0x230] sm:$0xff] }
 0x168   :  { %5616 = vmatpush3.bf16.msra.mxu0 %v5615_v9  ;;  %5586 = vmatprep.subr.bf16.mxu1 %v5585_v10  ;;  %v1434_v9 = vld [vmem:[%s11393_s5 + $0x50] sm:$0xff]  ;;  %v1460_v3 = vld [vmem:[%s11393_s5 + $0x120] sm:$0xff] }
 0x169   :  { %5618 = vmatprep.subr.bf16.mxu0 %v5617_v14  ;;  %v690_v10 = vld [vmem:[%s11391_s3 + $0xa70] sm:$0xff]  ;;  %v5661_v13 = vpack.c.bf16 %v1434_v9, %v1431_v8  ;;  %v755_v9 = vld [vmem:[%s11391_s3 + $0xc78] sm:$0xff] }
 0x16a   :  { %v1430_v14 = vld [vmem:[%s11393_s5 + $0x30] sm:$0xff]  ;;  %v5637_v17 = vpack.c.bf16 %v695_v11, %v690_v10 }
 0x16b   :  { %5588 = vmatpush3.bf16.msra.mxu1 %v5587_v50  ;;  %v5663_v20 = vpack.c.bf16 %v1433_v16, %v1430_v14  ;;  %v750_v8 = vld [vmem:[%s11391_s3 + $0xc50] sm:$0xff]  ;;  %v1469_v16 = vld [vmem:[%s11393_s5 + $0x168] sm:$0xff] }
 0x16c   :  { %5620 = vmatpush3.bf16.msra.mxu0 %v5619_v21  ;;  %5590 = vmatprep.subr.bf16.mxu1 %v5589_v22  ;;  %v1436_v21 = vld [vmem:[%s11393_s5 + $0x60] sm:$0xff]  ;;  %v1439_v22 = vld [vmem:[%s11393_s5 + $0x78] sm:$0xff]  ;;  %v1474_v11 = vld [vmem:[%s11393_s5 + $0x190] sm:$0xff] }
 0x16d   :  { %5622 = vmatprep.subr.bf16.mxu0 %v5621_v26  ;;  %v710_v26 = vld [vmem:[%s11391_s3 + $0xb10] sm:$0xff]  ;;  %v5667_v32 = vpack.c.bf16 %v1439_v22, %v1436_v21  ;;  %v1480_v21 = vld [vmem:[%s11393_s5 + $0x1c0] sm:$0xff]  ;;  %v1483_v22 = vld [vmem:[%s11393_s5 + $0x1d8] sm:$0xff] }
 0x16e   :  { %v1466_v14 = vld [vmem:[%s11393_s5 + $0x150] sm:$0xff] }
 0x16f   :  { %5592 = vmatpush3.bf16.msra.mxu1 %v5591_v37  ;;  %v5643_v37 = vpack.c.bf16 %v715_v27, %v710_v26  ;;  %v1479_v27 = vld [vmem:[%s11393_s5 + $0x1b8] sm:$0xff] }
 0x170   :  { %5624 = vmatpush3.bf16.msra.mxu0 %v5623_v38  ;;  %5594 = vmatprep.subr.bf16.mxu1 %v5593_v39  ;;  %v1449_v38 = vld [vmem:[%s11393_s5 + $0xc8] sm:$0xff]  ;;  %v1452_v39 = vld [vmem:[%s11393_s5 + $0xe0] sm:$0xff] }
 0x171   :  { %5626 = vmatprep.subr.bf16.mxu0 %v5625_v44  ;;  %v5673_v44 = vpack.c.bf16 %v1452_v39, %v1449_v38  ;;  %v1486_v38 = vld [vmem:[%s11393_s5 + $0x1f0] sm:$0xff]  ;;  %v1489_v39 = vld [vmem:[%s11393_s5 + $0x208] sm:$0xff] }
 0x173   :  { %5596 = vmatpush3.bf16.msra.mxu1 %v5595_v47  ;;  %v730_v47 = vld [vmem:[%s11391_s3 + $0xbb0] sm:$0xff] }
 0x174   :  { %5628 = vmatpush3.bf16.msra.mxu0 %v5627_v15  ;;  %5598 = vmatprep.subr.bf16.mxu1 %v5597_v55  ;;  %v735_v15 = vld [vmem:[%s11391_s3 + $0xbd8] sm:$0xff]  ;;  %v5675_v55 = vpack.c.bf16 %v1451_v48, %v1448_v45  ;;  %v1485_v45 = vld [vmem:[%s11393_s5 + $0x1e8] sm:$0xff]  ;;  %v5825_v48 = vpack.c.bf16 %v1489_v39, %v1486_v38  ;;  %v1462_v38 = vld [vmem:[%s11393_s5 + $0x130] sm:$0xff] }
 0x175   :  { %5630 = vmatprep.subr.bf16.mxu0 %v5629_v57  ;;  %v1457_v57 = vld [vmem:[%s11393_s5 + $0x108] sm:$0xff]  ;;  %v5649_v59 = vpack.c.bf16 %v735_v15, %v730_v47  ;;  %v1492_v47 = vld [vmem:[%s11393_s5 + $0x220] sm:$0xff]  ;;  %v1495_v15 = vld [vmem:[%s11393_s5 + $0x238] sm:$0xff] }
 0x176   :  { %v5829_v61 = vpack.c.bf16 %v1495_v15, %v1492_v47  ;;  %v1465_v39 = vld [vmem:[%s11393_s5 + $0x148] sm:$0xff]  ;;  %v1468_v47 = vld [vmem:[%s11393_s5 + $0x160] sm:$0xff]  ;;  %v1471_v15 = vld [vmem:[%s11393_s5 + $0x178] sm:$0xff] }
 0x177   :  { %5600 = vmatpush3.bf16.msra.mxu1 %v5599_v0  ;;  %v745_v0 = vld [vmem:[%s11391_s3 + $0xc28] sm:$0xff] }
 0x178   :  { %5632 = vmatpush3.bf16.msra.mxu0 %v5631_v2  ;;  %5633 = vmatprep.subr.bf16.mxu1 %v6731_v1  ;;  %v5679_v2 = vpack.c.bf16 %v1457_v57, %v1454_v28  ;;  %v5652_v5 = vpack.c.bf16 %v745_v0, %v740_v62  ;;  %v1487_v28 = vld [vmem:[%s11393_s5 + $0x1f8] sm:$0xff]  ;;  %v1444_v62 = vld [vmem:[%s11393_s5 + $0xa0] sm:$0xff] }
 0x179   :  { %5658 = vmatprep.subr.bf16.mxu0 %v5657_v4  ;;  %v1463_v4 = vld [vmem:[%s11393_s5 + $0x138] sm:$0xff] }
 0x17a   :  { %1274 = vmatmul.mubr.f32.vlgmr.msra.gmra.mrb[4].mxu1 %v7442_v52  ;;  %v1440_v52 = vld [vmem:[%s11393_s5 + $0x80] sm:$0xff]  ;;  %v5683_v10 = vpack.c.bf16 %v1463_v4, %v1460_v3  ;;  %v1447_v0 = vld [vmem:[%s11393_s5 + $0xb8] sm:$0xff]  ;;  %v1501_v3 = vld [vmem:[%s11393_s5 + $0x268] sm:$0xff] }
 0x17b   :  { %1344 = vmatmul.mubr.f32.vlgmr.msra.gmra.mrb[6].mxu0 %v7842_v35  ;;  %5635 = vmatpush3.bf16.msra.mxu1 %v5634_v30  ;;  %v705_v35 = vld [vmem:[%s11391_s3 + $0xae8] sm:$0xff]  ;;  %v5665_v50 = vpack.c.bf16 %v1440_v52, %v1437_v18  ;;  %v1470_v30 = vld [vmem:[%s11393_s5 + $0x170] sm:$0xff]  ;;  %v1476_v52 = vld [vmem:[%s11393_s5 + $0x1a0] sm:$0xff] }
 0x17c   :  { %5636 = vmatprep.subr.bf16.mxu1 %v6731_v1  ;;  %5041 = vmatprep.mubr.msk.f32.mxu1 %vm6732_vm1, %v6730_v7  ;;  %v5640_v24 = vpack.c.bf16 %v705_v35, %v700_v19  ;;  %v1473_v18 = vld [vmem:[%s11393_s5 + $0x188] sm:$0xff]  ;;  %v1426_v35 = vld [vmem:[%s11393_s5 + $0x10] sm:$0xff] }
 0x17d   :  { %5660 = vmatpush1.bf16.msra.mxu0 %v5659_v12  ;;  %v1477_v12 = vld [vmem:[%s11393_s5 + $0x1a8] sm:$0xff] }
 0x17e   :  { %5662 = vmatprep.subr.bf16.mxu0 %v5661_v13  ;;  %v5685_v13 = vpack.c.bf16 %v1470_v30, %v1467_v6  ;;  %v5817_v19 = vpack.c.bf16 %v1477_v12, %v1474_v11  ;;  %v1493_v6 = vld [vmem:[%s11393_s5 + $0x228] sm:$0xff]  ;;  %v5831_v30 = vpack.c.bf16 %v1447_v0, %v1444_v62  ;;  %v1450_v11 = vld [vmem:[%s11393_s5 + $0xd0] sm:$0xff]  ;;  %v1524_v0 = vld [vmem:[%s11393_s5 + $0x320] sm:$0xff] }
 0x17f   :  { %5638 = vmatpush3.bf16.msra.mxu1 %v5637_v17  ;;  %v5655_v17 = vpack.c.bf16 %v755_v9, %v750_v8  ;;  %v1497_v8 = vld [vmem:[%s11393_s5 + $0x248] sm:$0xff]  ;;  %v1500_v9 = vld [vmem:[%s11393_s5 + $0x260] sm:$0xff] }
 0x180   :  { %5639 = vmatprep.subr.bf16.mxu1 %v6731_v1  ;;  %v1453_v12 = vld [vmem:[%s11393_s5 + $0xe8] sm:$0xff] }
 0x181   :  { %5664 = vmatpush1.bf16.msra.mxu0 %v5663_v20  ;;  %v1429_v20 = vld [vmem:[%s11393_s5 + $0x28] sm:$0xff] }
 0x182   :  { %5666 = vmatprep.subr.bf16.mxu0 %v5665_v50  ;;  %v5687_v50 = vpack.c.bf16 %v1469_v16, %v1466_v14  ;;  %v5819_v26 = vpack.c.bf16 %v1429_v20, %v1426_v35  ;;  %v1504_v14 = vld [vmem:[%s11393_s5 + $0x280] sm:$0xff]  ;;  %v1507_v16 = vld [vmem:[%s11393_s5 + $0x298] sm:$0xff]  ;;  %v1506_v20 = vld [vmem:[%s11393_s5 + $0x290] sm:$0xff] }
 0x183   :  { %5641 = vmatpush3.bf16.msra.mxu1 %v5640_v24  ;;  %v5689_v24 = vpack.c.bf16 %v1476_v52, %v1473_v18  ;;  %v1496_v18 = vld [vmem:[%s11393_s5 + $0x240] sm:$0xff]  ;;  %v1499_v52 = vld [vmem:[%s11393_s5 + $0x258] sm:$0xff]  ;;  %v1521_v62 = vld [vmem:[%s11393_s5 + $0x308] sm:$0xff] }
 0x184   :  { %5642 = vmatprep.subr.bf16.mxu1 %v6731_v1  ;;  %v1503_v35 = vld [vmem:[%s11393_s5 + $0x278] sm:$0xff] }
 0x185   :  { %5668 = vmatpush1.bf16.msra.mxu0 %v5667_v32  ;;  %v1482_v32 = vld [vmem:[%s11393_s5 + $0x1d0] sm:$0xff] }
 0x186   :  { %5670 = vmatprep.subr.bf16.mxu0 %v5669_v33  ;;  %v5821_v33 = vpack.c.bf16 %v1483_v22, %v1480_v21  ;;  %v5693_v40 = vpack.c.bf16 %v1482_v32, %v1479_v27  ;;  %v1456_v21 = vld [vmem:[%s11393_s5 + $0x100] sm:$0xff]  ;;  %v1459_v22 = vld [vmem:[%s11393_s5 + $0x118] sm:$0xff]  ;;  %v1502_v27 = vld [vmem:[%s11393_s5 + $0x270] sm:$0xff] }
 0x187   :  { %5644 = vmatpush3.bf16.msra.mxu1 %v5643_v37  ;;  %v5691_v37 = vpack.c.bf16 %v1475_v63, %v1472_v25  ;;  %v1510_v25 = vld [vmem:[%s11393_s5 + $0x2b0] sm:$0xff]  ;;  %v1513_v63 = vld [vmem:[%s11393_s5 + $0x2c8] sm:$0xff] }
 0x188   :  { %5645 = vmatprep.subr.bf16.mxu1 %v6731_v1  ;;  %v1505_v32 = vld [vmem:[%s11393_s5 + $0x288] sm:$0xff] }
 0x189   :  { %5672 = vmatpush1.bf16.msra.mxu0 %v5671_v43  ;;  %v1481_v43 = vld [vmem:[%s11393_s5 + $0x1c8] sm:$0xff] }
 0x18a   :  { %5674 = vmatprep.subr.bf16.mxu0 %v5673_v44  ;;  %v5823_v44 = vpack.c.bf16 %v1435_v36, %v1432_v34  ;;  %v5695_v54 = vpack.c.bf16 %v1481_v43, %v1478_v41  ;;  %v1509_v34 = vld [vmem:[%s11393_s5 + $0x2a8] sm:$0xff]  ;;  %v1512_v36 = vld [vmem:[%s11393_s5 + $0x2c0] sm:$0xff] }
 0x18b   :  { %5647 = vmatpush3.bf16.msra.mxu1 %v5646_v49  ;;  %v1438_v49 = vld [vmem:[%s11393_s5 + $0x70] sm:$0xff]  ;;  %v1516_v41 = vld [vmem:[%s11393_s5 + $0x2e0] sm:$0xff]  ;;  %v5713_v43 = vpack.c.bf16 %v1512_v36, %v1509_v34 }
 0x18c   :  { %5648 = vmatprep.subr.bf16.mxu1 %v6731_v1  ;;  %v5827_v57 = vpack.c.bf16 %v1441_v51, %v1438_v49  ;;  %v1515_v49 = vld [vmem:[%s11393_s5 + $0x2d8] sm:$0xff]  ;;  %v1518_v51 = vld [vmem:[%s11393_s5 + $0x2f0] sm:$0xff] }
 0x18d   :  { %5676 = vmatpush1.bf16.msra.mxu0 %v5675_v55 }
 0x18e   :  { %5678 = vmatprep.subr.bf16.mxu0 %v5677_v56  ;;  %v1484_v56 = vld [vmem:[%s11393_s5 + $0x1e0] sm:$0xff] }
 0x18f   :  { %5650 = vmatpush3.bf16.msra.mxu1 %v5649_v59  ;;  %v1491_v59 = vld [vmem:[%s11393_s5 + $0x218] sm:$0xff] }
 0x190   :  { %5651 = vmatprep.subr.bf16.mxu1 %v6731_v1  ;;  %v5701_v4 = vpack.c.bf16 %v1494_v60, %v1491_v59  ;;  %v1517_v59 = vld [vmem:[%s11393_s5 + $0x2e8] sm:$0xff] }
 0x191   :  { %5680 = vmatpush1.bf16.msra.mxu0 %v5679_v2  ;;  %v5699_v2 = vpack.c.bf16 %v1487_v28, %v1484_v56  ;;  %v1570_v56 = vld [vmem:[%s11393_s5 + $0x490] sm:$0xff]  ;;  %v5717_v28 = vpack.c.bf16 %v1518_v51, %v1515_v49  ;;  %v1573_v60 = vld [vmem:[%s11393_s5 + $0x4a8] sm:$0xff] }
 0x192   :  { %5682 = vmatprep.subr.bf16.mxu0 %v5681_v58  ;;  %v1498_v58 = vld [vmem:[%s11393_s5 + $0x250] sm:$0xff]  ;;  %v1537_v51 = vld [vmem:[%s11393_s5 + $0x388] sm:$0xff] }
 0x193   :  { %5653 = vmatpush3.bf16.msra.mxu1 %v5652_v5  ;;  %v1490_v5 = vld [vmem:[%s11393_s5 + $0x210] sm:$0xff] }
 0x194   :  { %5654 = vmatprep.subr.bf16.mxu1 %v6731_v1  ;;  %v1534_v49 = vld [vmem:[%s11393_s5 + $0x370] sm:$0xff] }
 0x195   :  { %5684 = vmatpush1.bf16.msra.mxu0 %v5683_v10  ;;  %v5833_v10 = vpack.c.bf16 %v1501_v3, %v1498_v58  ;;  %v5721_v3 = vpack.c.bf16 %v1524_v0, %v1521_v62  ;;  %v1540_v62 = vld [vmem:[%s11393_s5 + $0x3a0] sm:$0xff]  ;;  %v1543_v0 = vld [vmem:[%s11393_s5 + $0x3b8] sm:$0xff] }
 0x196   :  { %5686 = vmatprep.subr.bf16.mxu0 %v5685_v13  ;;  %v5703_v13 = vpack.c.bf16 %v1493_v6, %v1490_v5 }
 0x197   :  { %5656 = vmatpush3.bf16.msra.mxu1 %v5655_v17  ;;  %v5705_v17 = vpack.c.bf16 %v1500_v9, %v1497_v8 }
 0x198   :  { %5818 = vmatprep.subr.bf16.mxu1 %v5817_v19  ;;  %v5835_v19 = vpack.c.bf16 %v1453_v12, %v1450_v11 }
 0x199   :  { %5688 = vmatpush1.bf16.msra.mxu0 %v5687_v50  ;;  %v5837_v50 = vpack.c.bf16 %v1507_v16, %v1504_v14  ;;  %v1523_v14 = vld [vmem:[%s11393_s5 + $0x318] sm:$0xff]  ;;  %v1522_v16 = vld [vmem:[%s11393_s5 + $0x310] sm:$0xff] }
 0x19a   :  { %5042 = vmatmul.mubr.f32.vlgmr.msra.gmra.mrb[6].mxu1 %v8037_v23  ;;  %5690 = vmatprep.subr.bf16.mxu0 %v5689_v24  ;;  %v1488_v23 = vld [vmem:[%s11393_s5 + $0x200] sm:$0xff]  ;;  %v5707_v24 = vpack.c.bf16 %v1499_v52, %v1496_v18  ;;  %v1527_v52 = vld [vmem:[%s11393_s5 + $0x338] sm:$0xff] }
 0x19b   :  { %5820 = vmatpush3.bf16.msra.mxu1 %v5819_v26  ;;  %v5697_v55 = vpack.c.bf16 %v1488_v23, %v1485_v45  ;;  %v5709_v26 = vpack.c.bf16 %v1506_v20, %v1503_v35  ;;  %v1511_v45 = vld [vmem:[%s11393_s5 + $0x2b8] sm:$0xff]  ;;  %v1530_v35 = vld [vmem:[%s11393_s5 + $0x350] sm:$0xff]  ;;  %v1576_v20 = vld [vmem:[%s11393_s5 + $0x4c0] sm:$0xff] }
 0x19c   :  { %5822 = vmatprep.subr.bf16.mxu1 %v5821_v33  ;;  %v5839_v33 = vpack.c.bf16 %v1459_v22, %v1456_v21  ;;  %v1519_v23 = vld [vmem:[%s11393_s5 + $0x2f8] sm:$0xff]  ;;  %v5725_v34 = vpack.c.bf16 %v1530_v35, %v1527_v52 }
 0x19d   :  { %5692 = vmatpush1.bf16.msra.mxu0 %v5691_v37  ;;  %v5841_v37 = vpack.c.bf16 %v1513_v63, %v1510_v25  ;;  %v1526_v25 = vld [vmem:[%s11393_s5 + $0x330] sm:$0xff]  ;;  %v1529_v63 = vld [vmem:[%s11393_s5 + $0x348] sm:$0xff]  ;;  %v1603_v52 = vld [vmem:[%s11393_s5 + $0x598] sm:$0xff] }
 0x19e   :  { %5694 = vmatprep.subr.bf16.mxu0 %v5693_v40  ;;  %v5711_v40 = vpack.c.bf16 %v1505_v32, %v1502_v27  ;;  %v1528_v27 = vld [vmem:[%s11393_s5 + $0x340] sm:$0xff]  ;;  %v1531_v32 = vld [vmem:[%s11393_s5 + $0x358] sm:$0xff] }
 0x19f   :  { %5824 = vmatpush3.bf16.msra.mxu1 %v5823_v44  ;;  %v1508_v44 = vld [vmem:[%s11393_s5 + $0x2a0] sm:$0xff] }
 0x1a0   :  { %5826 = vmatprep.subr.bf16.mxu1 %v5825_v48  ;;  %v5843_v48 = vpack.c.bf16 %v1465_v39, %v1462_v38  ;;  %v1582_v38 = vld [vmem:[%s11393_s5 + $0x4f0] sm:$0xff]  ;;  %v1585_v39 = vld [vmem:[%s11393_s5 + $0x508] sm:$0xff] }
 0x1a1   :  { %5696 = vmatpush1.bf16.msra.mxu0 %v5695_v54  ;;  %v5845_v54 = vpack.c.bf16 %v1519_v23, %v1516_v41  ;;  %v5727_v41 = vpack.c.bf16 %v1529_v63, %v1526_v25  ;;  %v1555_v25 = vld [vmem:[%s11393_s5 + $0x418] sm:$0xff]  ;;  %v1557_v63 = vld [vmem:[%s11393_s5 + $0x428] sm:$0xff] }
 0x1a2   :  { %5698 = vmatprep.subr.bf16.mxu0 %v5697_v55  ;;  %v5715_v55 = vpack.c.bf16 %v1511_v45, %v1508_v44  ;;  %v1532_v44 = vld [vmem:[%s11393_s5 + $0x360] sm:$0xff]  ;;  %v1535_v45 = vld [vmem:[%s11393_s5 + $0x378] sm:$0xff] }
 0x1a3   :  { %5828 = vmatpush3.bf16.msra.mxu1 %v5827_v57  ;;  %v1514_v57 = vld [vmem:[%s11393_s5 + $0x2d0] sm:$0xff] }
 0x1a4   :  { %5830 = vmatprep.subr.bf16.mxu1 %v5829_v61  ;;  %v5847_v61 = vpack.c.bf16 %v1471_v15, %v1468_v47  ;;  %v5719_v58 = vpack.c.bf16 %v1517_v59, %v1514_v57  ;;  %v1542_v47 = vld [vmem:[%s11393_s5 + $0x3b0] sm:$0xff]  ;;  %v1588_v15 = vld [vmem:[%s11393_s5 + $0x520] sm:$0xff]  ;;  %v1541_v59 = vld [vmem:[%s11393_s5 + $0x3a8] sm:$0xff] }
 0x1a5   :  { %5700 = vmatpush1.bf16.msra.mxu0 %v5699_v2  ;;  %v5849_v2 = vpack.c.bf16 %v1573_v60, %v1570_v56  ;;  %v5731_v56 = vpack.c.bf16 %v1535_v45, %v1532_v44  ;;  %v1538_v57 = vld [vmem:[%s11393_s5 + $0x390] sm:$0xff]  ;;  %v1612_v45 = vld [vmem:[%s11393_s5 + $0x5e0] sm:$0xff] }
 0x1a6   :  { %5702 = vmatprep.subr.bf16.mxu0 %v5701_v4  ;;  %v8572_v4 = vld [vmem:[%s11392_s4] sm:$0x1f]  ;;  %v1566_v44 = vld [vmem:[%s11393_s5 + $0x470] sm:$0xff] }
 0x1a7   :  { %5832 = vmatpush3.bf16.msra.mxu1 %v5831_v30  ;;  %v761_v5 = vrot.slane %v8572_v4, %v7393_v29  ;;  %v765_v6 = vrot.slane %v8572_v4, %v7401_v31  ;;  %v773_v30 = vrot.slane %v8572_v4, %v7423_v42 }
 0x1a8   :  { %5834 = vmatprep.subr.bf16.mxu1 %v5833_v10  ;;  %v1520_v10 = vld [vmem:[%s11393_s5 + $0x300] sm:$0xff] }
 0x1a9   :  { %5704 = vmatpush1.bf16.msra.mxu0 %v5703_v13  ;;  %v5723_v22 = vpack.c.bf16 %v1523_v14, %v1520_v10  ;;  %v1547_v10 = vld [vmem:[%s11393_s5 + $0x3d8] sm:$0xff]  ;;  %v1549_v14 = vld [vmem:[%s11393_s5 + $0x3e8] sm:$0xff] }
 0x1aa   :  { %5706 = vmatprep.subr.bf16.mxu0 %v5705_v17  ;;  %v1525_v17 = vld [vmem:[%s11393_s5 + $0x328] sm:$0xff] }
 0x1ab   :  { %5836 = vmatpush3.bf16.msra.mxu1 %v5835_v19 }
 0x1ac   :  { %5838 = vmatprep.subr.bf16.mxu1 %v5837_v50  ;;  %v1579_v50 = vld [vmem:[%s11393_s5 + $0x4d8] sm:$0xff] }
 0x1ad   :  { %5708 = vmatpush1.bf16.msra.mxu0 %v5707_v24  ;;  %v5851_v24 = vpack.c.bf16 %v1525_v17, %v1522_v16  ;;  %v5853_v36 = vpack.c.bf16 %v1579_v50, %v1576_v20  ;;  %v1551_v16 = vld [vmem:[%s11393_s5 + $0x3f8] sm:$0xff]  ;;  %v1554_v17 = vld [vmem:[%s11393_s5 + $0x410] sm:$0xff]  ;;  %v1553_v50 = vld [vmem:[%s11393_s5 + $0x408] sm:$0xff] }
 0x1ae   :  { %5710 = vmatprep.subr.bf16.mxu0 %v5709_v26  ;;  %v1550_v20 = vld [vmem:[%s11393_s5 + $0x3f0] sm:$0xff] }
 0x1af   :  { %5840 = vmatpush3.bf16.msra.mxu1 %v5839_v33  ;;  %v1533_v33 = vld [vmem:[%s11393_s5 + $0x368] sm:$0xff] }
 0x1b0   :  { %5842 = vmatprep.subr.bf16.mxu1 %v5841_v37  ;;  %v1536_v37 = vld [vmem:[%s11393_s5 + $0x380] sm:$0xff] }
 0x1b1   :  { %5712 = vmatpush1.bf16.msra.mxu0 %v5711_v40  ;;  %v5729_v23 = vpack.c.bf16 %v1536_v37, %v1533_v33  ;;  %v5743_v33 = vpack.c.bf16 %v1553_v50, %v1550_v20  ;;  %v1559_v37 = vld [vmem:[%s11393_s5 + $0x438] sm:$0xff]  ;;  %v1624_v20 = vld [vmem:[%s11393_s5 + $0x640] sm:$0xff] }
 0x1b2   :  { %5714 = vmatprep.subr.bf16.mxu0 %v5713_v43  ;;  %v5855_v43 = vpack.c.bf16 %v1531_v32, %v1528_v27  ;;  %v1606_v27 = vld [vmem:[%s11393_s5 + $0x5b0] sm:$0xff]  ;;  %v1609_v32 = vld [vmem:[%s11393_s5 + $0x5c8] sm:$0xff]  ;;  %v1627_v50 = vld [vmem:[%s11393_s5 + $0x658] sm:$0xff] }
 0x1b3   :  { %5844 = vmatpush3.bf16.msra.mxu1 %v5843_v48  ;;  %v5857_v48 = vpack.c.bf16 %v1585_v39, %v1582_v38  ;;  %v5873_v39 = vpack.c.bf16 %v1609_v32, %v1606_v27  ;;  %v1583_v32 = vld [vmem:[%s11393_s5 + $0x4f8] sm:$0xff] }
 0x1b4   :  { %5846 = vmatprep.subr.bf16.mxu1 %v5845_v54  ;;  %v1539_v54 = vld [vmem:[%s11393_s5 + $0x398] sm:$0xff] }
 0x1b5   :  { %5716 = vmatpush1.bf16.msra.mxu0 %v5715_v55  ;;  %v1591_v55 = vld [vmem:[%s11393_s5 + $0x538] sm:$0xff]  ;;  %v5733_v60 = vpack.c.bf16 %v1542_v47, %v1539_v54  ;;  %v769_v54 = vrot.slane %v8572_v4, %v7765_v53 }
 0x1b6   :  { %5718 = vmatprep.subr.bf16.mxu0 %v5717_v28  ;;  %v5859_v28 = vpack.c.bf16 %v1537_v51, %v1534_v49  ;;  %v1562_v51 = vld [vmem:[%s11393_s5 + $0x450] sm:$0xff] }
 0x1b7   :  { %5848 = vmatpush3.bf16.msra.mxu1 %v5847_v61  ;;  %v5861_v61 = vpack.c.bf16 %v1591_v55, %v1588_v15  ;;  %v1565_v55 = vld [vmem:[%s11393_s5 + $0x468] sm:$0xff] }
 0x1b8   :  { %5850 = vmatprep.subr.bf16.mxu1 %v5849_v2  ;;  %v1545_v2 = vld [vmem:[%s11393_s5 + $0x3c8] sm:$0xff] }
 0x1b9   :  { %5720 = vmatpush1.bf16.msra.mxu0 %v5719_v58  ;;  %v1548_v58 = vld [vmem:[%s11393_s5 + $0x3e0] sm:$0xff] }
 0x1ba   :  { %5722 = vmatprep.subr.bf16.mxu0 %v5721_v3  ;;  %v1594_v3 = vld [vmem:[%s11393_s5 + $0x550] sm:$0xff] }
 0x22d   :  { %v991_v8 = vpop.f32.mrb[2].mxu1  ;;  %v8580_v9 = vpop.f32.mrb[4].mxu0 }
 0x22e   :  { %v6660_v11 = vadd.f32 %v991_v8, %v761_v5  ;;  %v993_v12 = vpop.f32.mrb[3].mxu1  ;;  %v1206_v13 = vpop.f32.mrb[5].mxu0  ;;  %v1597_v5 = vld [vmem:[%s11393_s5 + $0x568] sm:$0xff]  ;;  %v1544_v8 = vld [vmem:[%s11393_s5 + $0x3c0] sm:$0xff] }
 0x22f   :  { %v6661_v18 = vadd.f32 %v993_v12, %v765_v6  ;;  %v6663_v19 = vadd.f32 %v1206_v13, %v773_v30  ;;  %v5735_v6 = vpack.c.bf16 %v1541_v59, %v1538_v57  ;;  %v5863_v30 = vpack.c.bf16 %v1543_v0, %v1540_v62  ;;  %v1546_v13 = vld [vmem:[%s11393_s5 + $0x3d0] sm:$0xff]  ;;  %v1569_v57 = vld [vmem:[%s11393_s5 + $0x488] sm:$0xff]  ;;  %v1572_v59 = vld [vmem:[%s11393_s5 + $0x4a0] sm:$0xff] }
 0x230   :  { %v1419_v26 = vmax.f32 %v6660_v11, 0.0  ;;  %v5737_v11 = vpack.c.bf16 %v1548_v58, %v1545_v2  ;;  %v5865_v12 = vpack.c.bf16 %v1597_v5, %v1594_v3  ;;  %v5867_v35 = vpack.c.bf16 %v1549_v14, %v1546_v13  ;;  %v1568_v2 = vld [vmem:[%s11393_s5 + $0x480] sm:$0xff] }
 0x231   :  { %v1420_v21 = vmax.f32 %v6661_v18, 0.0  ;;  %v1422_v40 = vmax.f32 %v6663_v19, 0.0  ;;  %v1600_v18 = vld [vmem:[%s11393_s5 + $0x580] sm:$0xff]  ;;  %v5739_v19 = vpack.c.bf16 %v1547_v10, %v1544_v8  ;;  %v5751_v62 = vpack.c.bf16 %v1565_v55, %v1562_v51  ;;  %v1621_v8 = vld [vmem:[%s11393_s5 + $0x628] sm:$0xff]  ;;  %v1642_v55 = vld [vmem:[%s11393_s5 + $0x6d0] sm:$0xff] }
 0x232   :  { %v8776_v58 = vadd.f32 %v8580_v9, %v769_v54  ;;  %v1592_v54 = vld [vmem:[%s11393_s5 + $0x540] sm:$0xff] }
 0x233   :  { %1745 = vmatprep.mubr.f32.mxu0 %v1420_v21  ;;  %1958 = vmatprep.mubr.f32.mxu1 %v1420_v21  ;;  %v5741_v21 = vpack.c.bf16 %v1554_v17, %v1551_v16 }
 0x234   :  { %1746 = vmatmul.mubr.f32.vlgmr.msra.gmra.mrb[8].mxu0 %v1419_v26  ;;  %1959 = vmatmul.mubr.f32.vlgmr.msra.gmra.mrb[8].mxu1 %v1419_v26  ;;  %v1560_v26 = vld [vmem:[%s11393_s5 + $0x440] sm:$0xff] }
 0x235   :  { %5724 = vmatpush1.bf16.msra.mxu0 %v5723_v22  ;;  %5852 = vmatpush3.bf16.msra.mxu1 %v5851_v24  ;;  %v5869_v22 = vpack.c.bf16 %v1603_v52, %v1600_v18  ;;  %v1552_v24 = vld [vmem:[%s11393_s5 + $0x400] sm:$0xff]  ;;  %v5745_v38 = vpack.c.bf16 %v1560_v26, %v1557_v63  ;;  %v1574_v18 = vld [vmem:[%s11393_s5 + $0x4b0] sm:$0xff]  ;;  %v1421_v52 = vmax.f32 %v8776_v58, 0.0  ;;  %v5885_v63 = vpack.c.bf16 %v1627_v50, %v1624_v20  ;;  %v1663_v50 = vld [vmem:[%s11393_s5 + $0x778] sm:$0xff] }
 0x236   :  { %1816 = vmatprep.mubr.f32.mxu0 %v1422_v40  ;;  %2028 = vmatprep.mubr.f32.mxu1 %v1422_v40  ;;  %v1558_v40 = vld [vmem:[%s11393_s5 + $0x430] sm:$0xff]  ;;  %v1580_v26 = vld [vmem:[%s11393_s5 + $0x4e0] sm:$0xff]  ;;  %v1635_v58 = vld [vmem:[%s11393_s5 + $0x698] sm:$0xff] }
 0x237   :  { %5726 = vmatprep.subr.bf16.mxu0 %v5725_v34  ;;  %5854 = vmatprep.subr.bf16.mxu1 %v5853_v36  ;;  %v5871_v34 = vpack.c.bf16 %v1555_v25, %v1552_v24  ;;  %v1556_v36 = vld [vmem:[%s11393_s5 + $0x420] sm:$0xff] }
 0x238   :  { %v1660_v20 = vld [vmem:[%s11393_s5 + $0x760] sm:$0xff] }
 0x239   :  { %5728 = vmatpush1.bf16.msra.mxu0 %v5727_v41  ;;  %5856 = vmatpush3.bf16.msra.mxu1 %v5855_v43  ;;  %v1561_v41 = vld [vmem:[%s11393_s5 + $0x448] sm:$0xff]  ;;  %v1563_v43 = vld [vmem:[%s11393_s5 + $0x458] sm:$0xff] }
 0x23a   :  { %5730 = vmatprep.subr.bf16.mxu0 %v5729_v23  ;;  %5858 = vmatprep.subr.bf16.mxu1 %v5857_v48  ;;  %v1615_v23 = vld [vmem:[%s11393_s5 + $0x5f8] sm:$0xff]  ;;  %v5747_v48 = vpack.c.bf16 %v1559_v37, %v1556_v36  ;;  %v5875_v49 = vpack.c.bf16 %v1561_v41, %v1558_v40  ;;  %v5749_v47 = vpack.c.bf16 %v1566_v44, %v1563_v43  ;;  %v1590_v37 = vld [vmem:[%s11393_s5 + $0x530] sm:$0xff]  ;;  %v1589_v43 = vld [vmem:[%s11393_s5 + $0x528] sm:$0xff] }
 0x23b   :  { %v5877_v15 = vpack.c.bf16 %v1615_v23, %v1612_v45  ;;  %v1587_v36 = vld [vmem:[%s11393_s5 + $0x518] sm:$0xff]  ;;  %v1586_v40 = vld [vmem:[%s11393_s5 + $0x510] sm:$0xff]  ;;  %v1636_v44 = vld [vmem:[%s11393_s5 + $0x6a0] sm:$0xff] }
 0x23c   :  { %v5765_v41 = vpack.c.bf16 %v1590_v37, %v1587_v36  ;;  %v1639_v45 = vld [vmem:[%s11393_s5 + $0x6b8] sm:$0xff]  ;;  %v1593_v23 = vld [vmem:[%s11393_s5 + $0x548] sm:$0xff] }
 0x23d   :  { %5732 = vmatpush1.bf16.msra.mxu0 %v5731_v56  ;;  %5860 = vmatpush3.bf16.msra.mxu1 %v5859_v28  ;;  %v1564_v56 = vld [vmem:[%s11393_s5 + $0x460] sm:$0xff]  ;;  %v1567_v28 = vld [vmem:[%s11393_s5 + $0x478] sm:$0xff]  ;;  %v5891_v51 = vpack.c.bf16 %v1639_v45, %v1636_v44  ;;  %v1629_v44 = vld [vmem:[%s11393_s5 + $0x668] sm:$0xff] }
 0x23e   :  { %5734 = vmatprep.subr.bf16.mxu0 %v5733_v60  ;;  %5862 = vmatprep.subr.bf16.mxu1 %v5861_v61  ;;  %v777_v61 = vrot.slane %v8572_v4, %v7969_v46  ;;  %v5879_v0 = vpack.c.bf16 %v1567_v28, %v1564_v56  ;;  %v1618_v4 = vld [vmem:[%s11393_s5 + $0x610] sm:$0xff]  ;;  %v1645_v56 = vld [vmem:[%s11393_s5 + $0x6e8] sm:$0xff]  ;;  %v1599_v28 = vld [vmem:[%s11393_s5 + $0x578] sm:$0xff] }
 0x23f   :  { %v5882_v17 = vpack.c.bf16 %v1621_v8, %v1618_v4  ;;  %v1604_v8 = vld [vmem:[%s11393_s5 + $0x5a0] sm:$0xff]  ;;  %v1619_v36 = vld [vmem:[%s11393_s5 + $0x618] sm:$0xff] }
 0x240   :  { %v1623_v37 = vld [vmem:[%s11393_s5 + $0x638] sm:$0xff]  ;;  %v1632_v45 = vld [vmem:[%s11393_s5 + $0x680] sm:$0xff] }
 0x241   :  { %5736 = vmatpush1.bf16.msra.mxu0 %v5735_v6  ;;  %5864 = vmatpush3.bf16.msra.mxu1 %v5863_v30  ;;  %v5753_v6 = vpack.c.bf16 %v1572_v59, %v1569_v57  ;;  %v1571_v30 = vld [vmem:[%s11393_s5 + $0x498] sm:$0xff]  ;;  %v1602_v57 = vld [vmem:[%s11393_s5 + $0x590] sm:$0xff] }
 0x242   :  { %5738 = vmatprep.subr.bf16.mxu0 %v5737_v11  ;;  %5866 = vmatprep.subr.bf16.mxu1 %v5865_v12  ;;  %v1575_v11 = vld [vmem:[%s11393_s5 + $0x4b8] sm:$0xff]  ;;  %v1578_v12 = vld [vmem:[%s11393_s5 + $0x4d0] sm:$0xff]  ;;  %v5755_v16 = vpack.c.bf16 %v1571_v30, %v1568_v2  ;;  %v1648_v2 = vld [vmem:[%s11393_s5 + $0x700] sm:$0xff] }
 0x245   :  { %5740 = vmatpush1.bf16.msra.mxu0 %v5739_v19  ;;  %5868 = vmatpush3.bf16.msra.mxu1 %v5867_v35  ;;  %v5757_v19 = vpack.c.bf16 %v1578_v12, %v1575_v11  ;;  %v1577_v35 = vld [vmem:[%s11393_s5 + $0x4c8] sm:$0xff]  ;;  %v1654_v11 = vld [vmem:[%s11393_s5 + $0x730] sm:$0xff] }
 0x246   :  { %5742 = vmatprep.subr.bf16.mxu0 %v5741_v21  ;;  %5870 = vmatprep.subr.bf16.mxu1 %v5869_v22  ;;  %v1581_v21 = vld [vmem:[%s11393_s5 + $0x4e8] sm:$0xff]  ;;  %v1584_v22 = vld [vmem:[%s11393_s5 + $0x500] sm:$0xff]  ;;  %v5759_v25 = vpack.c.bf16 %v1577_v35, %v1574_v18  ;;  %v1610_v18 = vld [vmem:[%s11393_s5 + $0x5d0] sm:$0xff] }
 0x247   :  { %v5761_v27 = vpack.c.bf16 %v1584_v22, %v1581_v21  ;;  %v1657_v12 = vld [vmem:[%s11393_s5 + $0x748] sm:$0xff]  ;;  %v1620_v22 = vld [vmem:[%s11393_s5 + $0x620] sm:$0xff] }
 0x248   :  { %v1613_v35 = vld [vmem:[%s11393_s5 + $0x5e8] sm:$0xff] }
 0x249   :  { %5744 = vmatpush1.bf16.msra.mxu0 %v5743_v33  ;;  %5872 = vmatpush3.bf16.msra.mxu1 %v5871_v34  ;;  %v1630_v33 = vld [vmem:[%s11393_s5 + $0x670] sm:$0xff]  ;;  %v1633_v34 = vld [vmem:[%s11393_s5 + $0x688] sm:$0xff] }
 0x24a   :  { %5746 = vmatprep.subr.bf16.mxu0 %v5745_v38  ;;  %5874 = vmatprep.subr.bf16.mxu1 %v5873_v39  ;;  %v5763_v38 = vpack.c.bf16 %v1583_v32, %v1580_v26  ;;  %v5888_v39 = vpack.c.bf16 %v1633_v34, %v1630_v33  ;;  %v1617_v21 = vld [vmem:[%s11393_s5 + $0x608] sm:$0xff]  ;;  %v5903_v26 = vpack.c.bf16 %v1663_v50, %v1660_v20  ;;  %v1616_v34 = vld [vmem:[%s11393_s5 + $0x600] sm:$0xff] }
 0x24b   :  { %v5785_v33 = vpack.c.bf16 %v1620_v22, %v1617_v21  ;;  %v2124_v20 = vld [vmem:[%s11395_s7 + $0x88] sm:$0xff]  ;;  %v2107_v50 = vld [vmem:[%s11395_s7] sm:$0xff] }
 0x24c   :  { %v2108_v22 = vld [vmem:[%s11395_s7 + $0x8] sm:$0xff] }
 0x24d   :  { %5748 = vmatpush1.bf16.msra.mxu0 %v5747_v48  ;;  %5876 = vmatpush3.bf16.msra.mxu1 %v5875_v49  ;;  %v4579_v60 = vpop.f32.mrb[4].mxu1  ;;  %v1596_v48 = vld [vmem:[%s11393_s5 + $0x560] sm:$0xff]  ;;  %v5767_v49 = vpack.c.bf16 %v1589_v43, %v1586_v40  ;;  %v1625_v43 = vld [vmem:[%s11393_s5 + $0x648] sm:$0xff] }
 0x24e   :  { %v4614_v3 = vpop.f32.mrb[6].mxu0  ;;  %v4580_v5 = vpop.f32.mrb[5].mxu1  ;;  %5750 = vmatprep.subr.bf16.mxu0 %v5749_v47  ;;  %5878 = vmatprep.subr.bf16.mxu1 %v5877_v15  ;;  %v5769_v47 = vpack.c.bf16 %v1596_v48, %v1593_v23  ;;  %v1595_v15 = vld [vmem:[%s11393_s5 + $0x558] sm:$0xff]  ;;  %v5793_v48 = vpack.c.bf16 %v1632_v45, %v1629_v44  ;;  %v2113_v45 = vld [vmem:[%s11395_s7 + $0x30] sm:$0xff] }
 0x24f   :  { %v4581_v10 = vadd.f32 %v4580_v5, %v4579_v60  ;;  %v4615_v9 = vpop.f32.mrb[7].mxu0  ;;  %v5771_v59 = vpack.c.bf16 %v1595_v15, %v1592_v54  ;;  %v5894_v60 = vpack.c.bf16 %v1645_v56, %v1642_v55  ;;  %v1605_v5 = vld [vmem:[%s11393_s5 + $0x5a8] sm:$0xff]  ;;  %v1634_v15 = vld [vmem:[%s11393_s5 + $0x690] sm:$0xff] }
 0x250   :  { %v4616_v13 = vadd.f32 %v4615_v9, %v4614_v3  ;;  %v1651_v3 = vld [vmem:[%s11393_s5 + $0x718] sm:$0xff]  ;;  %v1637_v55 = vld [vmem:[%s11393_s5 + $0x6a8] sm:$0xff] }
 0x251   :  { %v1276_v14 = vadd.f32 %v4581_v10, %v777_v61  ;;  %5752 = vmatpush1.bf16.msra.mxu0 %v5751_v62  ;;  %5880 = vmatpush3.bf16.msra.mxu1 %v5879_v0  ;;  %v1598_v61 = vld [vmem:[%s11393_s5 + $0x570] sm:$0xff]  ;;  %v5773_v62 = vpack.c.bf16 %v1602_v57, %v1599_v28  ;;  %v1601_v0 = vld [vmem:[%s11393_s5 + $0x588] sm:$0xff]  ;;  %v5897_v4 = vpack.c.bf16 %v1651_v3, %v1648_v2  ;;  %v1607_v9 = vld [vmem:[%s11393_s5 + $0x5b8] sm:$0xff] }
 0x252   :  { %5754 = vmatprep.subr.bf16.mxu0 %v5753_v6  ;;  %5881 = vmatprep.subr.bf16.mxu1 %v6731_v1  ;;  %v1608_v6 = vld [vmem:[%s11393_s5 + $0x5c0] sm:$0xff]  ;;  %v5775_v30 = vpack.c.bf16 %v1601_v0, %v1598_v61  ;;  %v1641_v56 = vld [vmem:[%s11393_s5 + $0x6c8] sm:$0xff]  ;;  %v5799_v57 = vpack.c.bf16 %v1637_v55, %v1634_v15  ;;  %v1643_v61 = vld [vmem:[%s11393_s5 + $0x6d8] sm:$0xff] }
 0x253   :  { %v8813_v24 = vadd.f32 %v4616_v13, %v1276_v14  ;;  %v5777_v10 = vpack.c.bf16 %v1608_v6, %v1605_v5  ;;  %v1611_v13 = vld [vmem:[%s11393_s5 + $0x5d8] sm:$0xff]  ;;  %v1614_v14 = vld [vmem:[%s11393_s5 + $0x5f0] sm:$0xff]  ;;  %v1644_v28 = vld [vmem:[%s11393_s5 + $0x6e0] sm:$0xff] }
 0x254   :  { %2029 = vmatmul.mubr.f32.vlgmr.msra.gmra.mrb[10].mxu1 %v1421_v52  ;;  %v1650_v0 = vld [vmem:[%s11393_s5 + $0x710] sm:$0xff]  ;;  %v1649_v6 = vld [vmem:[%s11393_s5 + $0x708] sm:$0xff]  ;;  %v2134_v15 = vld [vmem:[%s11395_s7 + $0xd8] sm:$0xff] }
 0x255   :  { %5756 = vmatpush1.bf16.msra.mxu0 %v5755_v16  ;;  %5883 = vmatpush3.bf16.msra.mxu1 %v5882_v17  ;;  %v5779_v16 = vpack.c.bf16 %v1607_v9, %v1604_v8  ;;  %v5900_v17 = vpack.c.bf16 %v1657_v12, %v1654_v11  ;;  %v1646_v5 = vld [vmem:[%s11393_s5 + $0x6f0] sm:$0xff]  ;;  %v1652_v9 = vld [vmem:[%s11393_s5 + $0x720] sm:$0xff]  ;;  %v1655_v11 = vld [vmem:[%s11393_s5 + $0x738] sm:$0xff] }
 0x256   :  { %5758 = vmatprep.subr.bf16.mxu0 %v5757_v19  ;;  %5884 = vmatprep.subr.bf16.mxu1 %v6731_v1  ;;  %v5781_v19 = vpack.c.bf16 %v1614_v14, %v1611_v13  ;;  %v5807_v8 = vpack.c.bf16 %v1649_v6, %v1646_v5  ;;  %v1659_v12 = vld [vmem:[%s11393_s5 + $0x758] sm:$0xff]  ;;  %v1662_v13 = vld [vmem:[%s11393_s5 + $0x770] sm:$0xff]  ;;  %v5811_v14 = vpack.c.bf16 %v1655_v11, %v1652_v9 }
 0x257   :  { %5076 = vmatprep.mubr.msk.f32.mxu1 %vm6732_vm1, %v6730_v7  ;;  %v2137_v5 = vld [vmem:[%s11395_s7 + $0xf0] sm:$0xff]  ;;  %v2138_v6 = vld [vmem:[%s11395_s7 + $0xf8] sm:$0xff] }
 0x259   :  { %5760 = vmatpush1.bf16.msra.mxu0 %v5759_v25  ;;  %5886 = vmatpush3.bf16.msra.mxu1 %v5885_v63  ;;  %v5783_v63 = vpack.c.bf16 %v1613_v35, %v1610_v18  ;;  %v1661_v18 = vld [vmem:[%s11393_s5 + $0x768] sm:$0xff]  ;;  %v2123_v35 = vld [vmem:[%s11395_s7 + $0x80] sm:$0xff] }
 0x25a   :  { %5762 = vmatprep.subr.bf16.mxu0 %v5761_v27  ;;  %5887 = vmatprep.subr.bf16.mxu1 %v6731_v1  ;;  %v5905_v21 = vpack.c.bf16 %v2124_v20, %v2123_v35 }
 0x25d   :  { %5764 = vmatpush1.bf16.msra.mxu0 %v5763_v38  ;;  %5889 = vmatpush3.bf16.msra.mxu1 %v5888_v39  ;;  %v5787_v39 = vpack.c.bf16 %v1619_v36, %v1616_v34  ;;  %v2127_v34 = vld [vmem:[%s11395_s7 + $0xa0] sm:$0xff]  ;;  %v2128_v36 = vld [vmem:[%s11395_s7 + $0xa8] sm:$0xff] }
 0x25e   :  { %5766 = vmatprep.subr.bf16.mxu0 %v5765_v41  ;;  %5890 = vmatprep.subr.bf16.mxu1 %v6731_v1  ;;  %v1622_v41 = vld [vmem:[%s11393_s5 + $0x630] sm:$0xff] }
 0x25f   :  { %v5791_v23 = vpack.c.bf16 %v1625_v43, %v1622_v41  ;;  %v2130_v41 = vld [vmem:[%s11395_s7 + $0xb8] sm:$0xff] }
 0x261   :  { %5768 = vmatpush1.bf16.msra.mxu0 %v5767_v49  ;;  %5892 = vmatpush3.bf16.msra.mxu1 %v5891_v51  ;;  %v1628_v49 = vld [vmem:[%s11393_s5 + $0x660] sm:$0xff]  ;;  %v1631_v51 = vld [vmem:[%s11393_s5 + $0x678] sm:$0xff] }
 0x262   :  { %5770 = vmatprep.subr.bf16.mxu0 %v5769_v47  ;;  %5893 = vmatprep.subr.bf16.mxu1 %v6731_v1  ;;  %v5795_v54 = vpack.c.bf16 %v1631_v51, %v1628_v49  ;;  %v2132_v49 = vld [vmem:[%s11395_s7 + $0xc8] sm:$0xff] }
 0x265   :  { %5772 = vmatpush1.bf16.msra.mxu0 %v5771_v59  ;;  %5895 = vmatpush3.bf16.msra.mxu1 %v5894_v60  ;;  %v5801_v59 = vpack.c.bf16 %v1644_v28, %v1641_v56  ;;  %v1640_v60 = vld [vmem:[%s11393_s5 + $0x6c0] sm:$0xff]  ;;  %v2117_v28 = vld [vmem:[%s11395_s7 + $0x50] sm:$0xff] }
 0x266   :  { %5774 = vmatprep.subr.bf16.mxu0 %v5773_v62  ;;  %5896 = vmatprep.subr.bf16.mxu1 %v6731_v1  ;;  %v1647_v62 = vld [vmem:[%s11393_s5 + $0x6f8] sm:$0xff]  ;;  %v5803_v2 = vpack.c.bf16 %v1643_v61, %v1640_v60  ;;  %v2136_v60 = vld [vmem:[%s11395_s7 + $0xe8] sm:$0xff] }
 0x267   :  { %v5805_v3 = vpack.c.bf16 %v1650_v0, %v1647_v62  ;;  %v2119_v0 = vld [vmem:[%s11395_s7 + $0x60] sm:$0xff] }
 0x269   :  { %5776 = vmatpush1.bf16.msra.mxu0 %v5775_v30  ;;  %5898 = vmatpush3.bf16.msra.mxu1 %v5897_v4  ;;  %v1653_v30 = vld [vmem:[%s11393_s5 + $0x728] sm:$0xff]  ;;  %v1656_v4 = vld [vmem:[%s11393_s5 + $0x740] sm:$0xff] }
 0x26a   :  { %5778 = vmatprep.subr.bf16.mxu0 %v5777_v10  ;;  %5899 = vmatprep.subr.bf16.mxu1 %v6731_v1  ;;  %v5809_v10 = vpack.c.bf16 %v1656_v4, %v1653_v30  ;;  %v5933_v30 = vpack.c.bf16 %v2138_v6, %v2137_v5  ;;  %v2121_v4 = vld [vmem:[%s11395_s7 + $0x70] sm:$0xff]  ;;  %v2476_v6 = vld [vmem:[%s11399_s11 + $0x8] sm:$0xff] }
 0x26d   :  { %5780 = vmatpush1.bf16.msra.mxu0 %v5779_v16  ;;  %5901 = vmatpush3.bf16.msra.mxu1 %v5900_v17  ;;  %v1415_v25 = vpop.f32.mrb[6].mxu1  ;;  %v5813_v16 = vpack.c.bf16 %v1662_v13, %v1659_v12  ;;  %v1658_v17 = vld [vmem:[%s11393_s5 + $0x750] sm:$0xff]  ;;  %v1664_v13 = vld [vmem:[%s11394_s6] sm:$0x7] }
 0x26e   :  { %v8934_v27 = vadd.f32 %v1415_v25, %v8813_v24  ;;  %v5043_v32 = vpop.f32.mrb[7].mxu1  ;;  %5782 = vmatprep.subr.bf16.mxu0 %v5781_v19  ;;  %5902 = vmatprep.subr.bf16.mxu1 %v6731_v1  ;;  %v1626_v24 = vld [vmem:[%s11393_s5 + $0x650] sm:$0xff]  ;;  %v5815_v19 = vpack.c.bf16 %v1661_v18, %v1658_v17 }
 0x26f   :  { %v5789_v40 = vpack.c.bf16 %v1626_v24, %v1623_v37  ;;  %v2125_v25 = vld [vmem:[%s11395_s7 + $0x90] sm:$0xff]  ;;  %v5913_v24 = vpack.c.bf16 %v2128_v36, %v2127_v34 }
 0x270   :  { %v1423_v38 = vmax.f32 %v8934_v27, 0.0  ;;  %v2109_v32 = vld [vmem:[%s11395_s7 + $0x10] sm:$0xff] }
 0x271   :  { %5784 = vmatpush1.bf16.msra.mxu0 %v5783_v63  ;;  %5904 = vmatpush3.bf16.msra.mxu1 %v5903_v26  ;;  %v2126_v63 = vld [vmem:[%s11395_s7 + $0x98] sm:$0xff]  ;;  %v5907_v26 = vpack.c.bf16 %v2108_v22, %v2107_v50  ;;  %v1669_v22 = vrot.slane %v1664_v13, %v7393_v29 }
 0x272   :  { %5786 = vmatprep.subr.bf16.mxu0 %v5785_v33  ;;  %v5909_v27 = vpack.c.bf16 %v2126_v63, %v2125_v25  ;;  %v2110_v33 = vld [vmem:[%s11395_s7 + $0x18] sm:$0xff]  ;;  %5906 = vmatprep.subr.bf16.mxu1 %v5905_v21  ;;  %v1673_v25 = vrot.slane %v1664_v13, %v7401_v31 }
 0x273   :  { %v5911_v37 = vpack.c.bf16 %v2110_v33, %v2109_v32  ;;  %v2139_v32 = vld [vmem:[%s11395_s7 + $0x100] sm:$0xff]  ;;  %v2140_v33 = vld [vmem:[%s11395_s7 + $0x108] sm:$0xff] }
 0x274   :  { %1817 = vmatmul.mubr.f32.vlgmr.msra.gmra.mrb[8].mxu0 %v1421_v52  ;;  %5077 = vmatmul.mubr.f32.vlgmr.msra.gmra.mrb[12].mxu1 %v1423_v38  ;;  %v1638_v52 = vld [vmem:[%s11393_s5 + $0x6b0] sm:$0xff] }
 0x275   :  { %5788 = vmatpush1.bf16.msra.mxu0 %v5787_v39  ;;  %1887 = vmatprep.mubr.f32.mxu0 %v6730_v7  ;;  %v5797_v47 = vpack.c.bf16 %v1638_v52, %v1635_v58  ;;  %v2112_v39 = vld [vmem:[%s11395_s7 + $0x28] sm:$0xff]  ;;  %v2115_v52 = vld [vmem:[%s11395_s7 + $0x40] sm:$0xff] }
 0x276   :  { %5790 = vmatprep.subr.bf16.mxu0 %v5789_v40  ;;  %5908 = vmatpush3.bf16.msra.mxu1 %v5907_v26  ;;  %v2129_v40 = vld [vmem:[%s11395_s7 + $0xb0] sm:$0xff] }
 0x277   :  { %5910 = vmatprep.subr.bf16.mxu1 %v5909_v27  ;;  %v5917_v44 = vpack.c.bf16 %v2130_v41, %v2129_v40  ;;  %v2143_v41 = vld [vmem:[%s11395_s7 + $0x120] sm:$0xff] }
 0x279   :  { %5792 = vmatpush1.bf16.msra.mxu0 %v5791_v23  ;;  %v2114_v23 = vld [vmem:[%s11395_s7 + $0x38] sm:$0xff] }
 0x27a   :  { %5794 = vmatprep.subr.bf16.mxu0 %v5793_v48  ;;  %5912 = vmatpush3.bf16.msra.mxu1 %v5911_v37  ;;  %v2131_v48 = vld [vmem:[%s11395_s7 + $0xc0] sm:$0xff]  ;;  %v5919_v51 = vpack.c.bf16 %v2114_v23, %v2113_v45  ;;  %v5938_v37 = vpack.c.bf16 %v2140_v33, %v2139_v32  ;;  %v2145_v45 = vld [vmem:[%s11395_s7 + $0x130] sm:$0xff]  ;;  %v2146_v23 = vld [vmem:[%s11395_s7 + $0x138] sm:$0xff] }
 0x27b   :  { %5914 = vmatprep.subr.bf16.mxu1 %v5913_v24  ;;  %v5921_v58 = vpack.c.bf16 %v2132_v49, %v2131_v48  ;;  %v5947_v48 = vpack.c.bf16 %v2146_v23, %v2145_v45  ;;  %v2490_v32 = vld [vmem:[%s11399_s11 + $0x78] sm:$0xff]  ;;  %v2495_v23 = vld [vmem:[%s11399_s11 + $0xa0] sm:$0xff] }
 0x27d   :  { %5796 = vmatpush1.bf16.msra.mxu0 %v5795_v54  ;;  %v2116_v54 = vld [vmem:[%s11395_s7 + $0x48] sm:$0xff] }
 0x27e   :  { %5798 = vmatprep.subr.bf16.mxu0 %v5797_v47  ;;  %v2133_v47 = vld [vmem:[%s11395_s7 + $0xd0] sm:$0xff]  ;;  %v5923_v55 = vpack.c.bf16 %v2116_v54, %v2115_v52  ;;  %v2298_v52 = vld [vmem:[%s11397_s9] sm:$0xff] }
 0x27f   :  { %v5925_v56 = vpack.c.bf16 %v2134_v15, %v2133_v47  ;;  %v2301_v47 = vld [vmem:[%s11397_s9 + $0x18] sm:$0xff]  ;;  %v2300_v15 = vld [vmem:[%s11397_s9 + $0x10] sm:$0xff] }
 0x281   :  { %5800 = vmatpush1.bf16.msra.mxu0 %v5799_v57  ;;  %v2118_v57 = vld [vmem:[%s11395_s7 + $0x58] sm:$0xff] }
 0x282   :  { %5802 = vmatprep.subr.bf16.mxu0 %v5801_v59  ;;  %v2135_v59 = vld [vmem:[%s11395_s7 + $0xe0] sm:$0xff]  ;;  %v5927_v61 = vpack.c.bf16 %v2118_v57, %v2117_v28  ;;  %v2305_v57 = vld [vmem:[%s11397_s9 + $0x38] sm:$0xff] }
 0x283   :  { %v5929_v62 = vpack.c.bf16 %v2136_v60, %v2135_v59  ;;  %v2308_v59 = vld [vmem:[%s11397_s9 + $0x50] sm:$0xff] }
 0x284   :  { %v5953_v60 = vpack.c.bf16 %v2308_v59, %v2305_v57  ;;  %v2505_v57 = vld [vmem:[%s11399_s11 + $0xf0] sm:$0xff]  ;;  %v2510_v59 = vld [vmem:[%s11399_s11 + $0x118] sm:$0xff] }
 0x285   :  { %5804 = vmatpush1.bf16.msra.mxu0 %v5803_v2  ;;  %v2120_v2 = vld [vmem:[%s11395_s7 + $0x68] sm:$0xff] }
 0x286   :  { %5806 = vmatprep.subr.bf16.mxu0 %v5805_v3  ;;  %v5931_v3 = vpack.c.bf16 %v2120_v2, %v2119_v0  ;;  %v2306_v0 = vld [vmem:[%s11397_s9 + $0x40] sm:$0xff] }
 0x289   :  { %5808 = vmatpush1.bf16.msra.mxu0 %v5807_v8  ;;  %v2122_v8 = vld [vmem:[%s11395_s7 + $0x78] sm:$0xff] }
 0x28a   :  { %5810 = vmatprep.subr.bf16.mxu0 %v5809_v10  ;;  %v5935_v10 = vpack.c.bf16 %v2122_v8, %v2121_v4  ;;  %v2478_v4 = vld [vmem:[%s11399_s11 + $0x18] sm:$0xff] }
 0x28d   :  { %5812 = vmatpush1.bf16.msra.mxu0 %v5811_v14  ;;  %v1677_v14 = vrot.slane %v1664_v13, %v7765_v53 }
 0x28e   :  { %5814 = vmatprep.subr.bf16.mxu0 %v5813_v16 }
 0x291   :  { %5816 = vmatpush1.bf16.msra.mxu0 %v5815_v19 }
 0x292   :  { %5957 = vmatprep.subr.bf16.mxu0 %v6731_v1 }
 0x294   :  { %1888 = vmatmul.mubr.f32.vlgmr.msra.gmra.mrb[8].mxu0 %v1423_v38  ;;  %v2111_v38 = vld [vmem:[%s11395_s7 + $0x20] sm:$0xff] }
 0x295   :  { %5106 = vmatprep.mubr.msk.f32.mxu0 %vm6732_vm1, %v6730_v7  ;;  %v5915_v43 = vpack.c.bf16 %v2112_v39, %v2111_v38  ;;  %v2141_v38 = vld [vmem:[%s11395_s7 + $0x110] sm:$0xff]  ;;  %v2142_v39 = vld [vmem:[%s11395_s7 + $0x118] sm:$0xff] }
 0x296   :  { %v5941_v40 = vpack.c.bf16 %v2142_v39, %v2141_v38  ;;  %v2492_v38 = vld [vmem:[%s11399_s11 + $0x88] sm:$0xff] }
 0x297   :  { %5916 = vmatpush3.bf16.msra.mxu1 %v5915_v43  ;;  %v2144_v43 = vld [vmem:[%s11395_s7 + $0x128] sm:$0xff] }
 0x298   :  { %5918 = vmatprep.subr.bf16.mxu1 %v5917_v44  ;;  %v5944_v44 = vpack.c.bf16 %v2144_v43, %v2143_v41  ;;  %v2496_v39 = vld [vmem:[%s11399_s11 + $0xa8] sm:$0xff]  ;;  %v2498_v41 = vld [vmem:[%s11399_s11 + $0xb8] sm:$0xff]  ;;  %v2503_v43 = vld [vmem:[%s11399_s11 + $0xe0] sm:$0xff] }
 0x29b   :  { %5920 = vmatpush3.bf16.msra.mxu1 %v5919_v51  ;;  %v2299_v51 = vld [vmem:[%s11397_s9 + $0x8] sm:$0xff] }
 0x29c   :  { %5922 = vmatprep.subr.bf16.mxu1 %v5921_v58  ;;  %v2302_v58 = vld [vmem:[%s11397_s9 + $0x20] sm:$0xff] }
 0x29d   :  { %v5949_v54 = vpack.c.bf16 %v2302_v58, %v2299_v51  ;;  %v6051_v51 = vpack.c.bf16 %v2503_v43, %v2498_v41  ;;  %v2497_v58 = vld [vmem:[%s11399_s11 + $0xb0] sm:$0xff]  ;;  %v2542_v41 = vld [vmem:[%s11399_s11 + $0x218] sm:$0xff] }
 0x29e   :  { %v2546_v43 = vld [vmem:[%s11399_s11 + $0x238] sm:$0xff] }
 0x29f   :  { %5924 = vmatpush3.bf16.msra.mxu1 %v5923_v55  ;;  %v2303_v55 = vld [vmem:[%s11397_s9 + $0x28] sm:$0xff] }
 0x2a0   :  { %5926 = vmatprep.subr.bf16.mxu1 %v5925_v56  ;;  %v5951_v56 = vpack.c.bf16 %v2301_v47, %v2298_v52  ;;  %v5958_v28 = vpack.c.bf16 %v2303_v55, %v2300_v15  ;;  %v2502_v52 = vld [vmem:[%s11399_s11 + $0xd8] sm:$0xff]  ;;  %v2511_v47 = vld [vmem:[%s11399_s11 + $0x120] sm:$0xff]  ;;  %v2508_v15 = vld [vmem:[%s11399_s11 + $0x108] sm:$0xff] }
 0x2a1   :  { %v2513_v55 = vld [vmem:[%s11399_s11 + $0x130] sm:$0xff] }
 0x2a2   :  { %5959 = vmatpush3.bf16.msra.mxu0 %v5958_v28  ;;  %v6053_v28 = vpack.c.bf16 %v2502_v52, %v2497_v58  ;;  %v2550_v58 = vld [vmem:[%s11399_s11 + $0x258] sm:$0xff] }
 0x2a3   :  { %5928 = vmatpush3.bf16.msra.mxu1 %v5927_v61  ;;  %5960 = vmatprep.subr.bf16.mxu0 %v6731_v1  ;;  %v2304_v61 = vld [vmem:[%s11397_s9 + $0x30] sm:$0xff] }
 0x2a4   :  { %5930 = vmatprep.subr.bf16.mxu1 %v5929_v62  ;;  %v2307_v62 = vld [vmem:[%s11397_s9 + $0x48] sm:$0xff] }
 0x2a5   :  { %v5955_v2 = vpack.c.bf16 %v2307_v62, %v2304_v61  ;;  %v6055_v61 = vpack.c.bf16 %v2513_v55, %v2508_v15  ;;  %v2507_v62 = vld [vmem:[%s11399_s11 + $0x100] sm:$0xff]  ;;  %v2552_v15 = vld [vmem:[%s11399_s11 + $0x268] sm:$0xff] }
 0x2a6   :  { %v2556_v55 = vld [vmem:[%s11399_s11 + $0x288] sm:$0xff] }
 0x2a7   :  { %5932 = vmatpush3.bf16.msra.mxu1 %v5931_v3  ;;  %v2309_v3 = vld [vmem:[%s11397_s9 + $0x58] sm:$0xff] }
 0x2a8   :  { %5934 = vmatprep.subr.bf16.mxu1 %v5933_v30  ;;  %v5961_v5 = vpack.c.bf16 %v2309_v3, %v2306_v0  ;;  %v2481_v30 = vld [vmem:[%s11399_s11 + $0x30] sm:$0xff]  ;;  %v2512_v0 = vld [vmem:[%s11399_s11 + $0x128] sm:$0xff] }
 0x2a9   :  { %v5963_v8 = vpack.c.bf16 %v2481_v30, %v2476_v6  ;;  %v2521_v3 = vld [vmem:[%s11399_s11 + $0x170] sm:$0xff]  ;;  %v2523_v6 = vld [vmem:[%s11399_s11 + $0x180] sm:$0xff]  ;;  %v5977_v30 = vpack.c.bf16 %v2510_v59, %v2505_v57 }
 0x2aa   :  { %5962 = vmatpush3.bf16.msra.mxu0 %v5961_v5  ;;  %v2518_v5 = vld [vmem:[%s11399_s11 + $0x158] sm:$0xff]  ;;  %v2563_v57 = vld [vmem:[%s11399_s11 + $0x2c0] sm:$0xff] }
 0x2ab   :  { %5936 = vmatpush3.bf16.msra.mxu1 %v5935_v10  ;;  %v2483_v10 = vld [vmem:[%s11399_s11 + $0x40] sm:$0xff] }
 0x2ac   :  { %5937 = vmatprep.subr.bf16.mxu1 %v6731_v1 }
 0x307   :  { %v4666_v9 = vpop.f32.mrb[8].mxu1 }
 0x308   :  { %v4667_v11 = vpop.f32.mrb[9].mxu1 }
 0x309   :  { %v4668_v12 = vadd.f32 %v4667_v11, %v4666_v9  ;;  %v6043_v9 = vpack.c.bf16 %v2483_v10, %v2478_v4  ;;  %v6057_v4 = vpack.c.bf16 %v2512_v0, %v2507_v62  ;;  %v2520_v10 = vld [vmem:[%s11399_s11 + $0x168] sm:$0xff] }
 0x30a   :  { %v2560_v62 = vld [vmem:[%s11399_s11 + $0x2a8] sm:$0xff] }
 0x30b   :  { %v1961_v18 = vadd.f32 %v4668_v12, %v1677_v14  ;;  %6044 = vmatprep.subr.bf16.mxu0 %v6043_v9  ;;  %v4526_v14 = vld [vmem:[%s11396_s8] ss:$0 sm:$0xff] }
 0x327   :  { %v4701_v16 = vpop.f32.mrb[10].mxu1 }
 0x328   :  { %v4702_v17 = vpop.f32.mrb[11].mxu1 }
 0x329   :  { %v4703_v19 = vadd.f32 %v4702_v17, %v4701_v16  ;;  %v2475_v16 = vld [vmem:[%s11399_s11] sm:$0xff]  ;;  %v2480_v17 = vld [vmem:[%s11399_s11 + $0x28] sm:$0xff] }
 0x32b   :  { %v2031_v35 = vadd.f32 %v4703_v19, %v1961_v18  ;;  %v2477_v18 = vld [vmem:[%s11399_s11 + $0x10] sm:$0xff]  ;;  %v2482_v19 = vld [vmem:[%s11399_s11 + $0x38] sm:$0xff] }
 0x347   :  { %v2100_v20 = vpop.f32.mrb[12].mxu1 }
 0x348   :  { %v2101_v50 = vadd.f32 %v2100_v20, %v2031_v35  ;;  %v5078_v21 = vpop.f32.mrb[13].mxu1  ;;  %v2486_v35 = vld [vmem:[%s11399_s11 + $0x58] sm:$0xff]  ;;  %v2491_v20 = vld [vmem:[%s11399_s11 + $0x80] sm:$0xff] }
 0x349   :  { %v2493_v21 = vld [vmem:[%s11399_s11 + $0x90] sm:$0xff] }
 0x34a   :  { %v2106_v49 = vmax.f32 %v2101_v50, 0.0  ;;  %v2488_v50 = vld [vmem:[%s11399_s11 + $0x68] sm:$0xff] }
 0x367   :  { %v1889_v63 = vpop.f32.mrb[8].mxu0 }
 0x368   :  { %v6664_v26 = vadd.f32 %v1889_v63, %v1669_v22  ;;  %v1891_v27 = vpop.f32.mrb[9].mxu0  ;;  %v5965_v63 = vpack.c.bf16 %v2480_v17, %v2475_v16  ;;  %v2531_v16 = vld [vmem:[%s11399_s11 + $0x1c0] sm:$0xff]  ;;  %v2528_v17 = vld [vmem:[%s11399_s11 + $0x1a8] sm:$0xff] }
 0x369   :  { %v6665_v34 = vadd.f32 %v1891_v27, %v1673_v25  ;;  %v2485_v27 = vld [vmem:[%s11399_s11 + $0x50] sm:$0xff] }
 0x36a   :  { %v2104_v24 = vmax.f32 %v6664_v26, 0.0  ;;  %v6045_v26 = vpack.c.bf16 %v2482_v19, %v2477_v18  ;;  %v2533_v18 = vld [vmem:[%s11399_s11 + $0x1d0] sm:$0xff] }
 0x36b   :  { %v2105_v36 = vmax.f32 %v6665_v34, 0.0 }
 0x36d   :  { %2222 = vmatprep.mubr.f32.mxu1 %v2105_v36  ;;  %v5967_v36 = vpack.c.bf16 %v2491_v20, %v2486_v35  ;;  %v2525_v20 = vld [vmem:[%s11399_s11 + $0x190] sm:$0xff] }
 0x36e   :  { %2223 = vmatmul.mubr.f32.vlgmr.msra.gmra.mrb[14].mxu1 %v2104_v24  ;;  %v2487_v24 = vld [vmem:[%s11399_s11 + $0x60] sm:$0xff] }
 0x36f   :  { %5939 = vmatpush3.bf16.msra.mxu1 %v5938_v37  ;;  %5095 = vmatprep.mubr.msk.f32.mxu1 %vm6732_vm1, %v6730_v7  ;;  %v6047_v37 = vpack.c.bf16 %v2493_v21, %v2488_v50  ;;  %v6049_v45 = vpack.c.bf16 %v2492_v38, %v2487_v24  ;;  %v2530_v50 = vld [vmem:[%s11399_s11 + $0x1b8] sm:$0xff]  ;;  %v2540_v24 = vld [vmem:[%s11399_s11 + $0x208] sm:$0xff] }
 0x370   :  { %5940 = vmatprep.subr.bf16.mxu1 %v6731_v1 }
 0x373   :  { %5942 = vmatpush3.bf16.msra.mxu1 %v5941_v40  ;;  %v2501_v40 = vld [vmem:[%s11399_s11 + $0xd0] sm:$0xff] }
 0x374   :  { %5943 = vmatprep.subr.bf16.mxu1 %v6731_v1 }
 0x377   :  { %5945 = vmatpush3.bf16.msra.mxu1 %v5944_v44  ;;  %v5969_v44 = vpack.c.bf16 %v2490_v32, %v2485_v27  ;;  %v2541_v27 = vld [vmem:[%s11399_s11 + $0x210] sm:$0xff]  ;;  %v2538_v32 = vld [vmem:[%s11399_s11 + $0x1f8] sm:$0xff] }
 0x378   :  { %5946 = vmatprep.subr.bf16.mxu1 %v6731_v1 }
 0x37b   :  { %5948 = vmatpush3.bf16.msra.mxu1 %v5947_v48  ;;  %v2500_v48 = vld [vmem:[%s11399_s11 + $0xc8] sm:$0xff] }
 0x37c   :  { %5950 = vmatprep.subr.bf16.mxu1 %v5949_v54  ;;  %v2506_v54 = vld [vmem:[%s11399_s11 + $0xf8] sm:$0xff] }
 0x37e   :  { %5096 = vmatmul.mubr.msk.f32.vlgmr.msra.gmra.mrb[16].mxu1 %vm2154_vm2, %v2106_v49  ;;  %v5971_v49 = vpack.c.bf16 %v2501_v40, %v2496_v39  ;;  %v2537_v40 = vld [vmem:[%s11399_s11 + $0x1f0] sm:$0xff] }
 0x37f   :  { %2395 = vmatprep.mubr.f32.mxu1 %v6730_v7  ;;  %5952 = vmatpush1.bf16.msra.mxu1 %v5951_v56  ;;  %v5973_v56 = vpack.c.bf16 %v2500_v48, %v2495_v23  ;;  %v2553_v23 = vld [vmem:[%s11399_s11 + $0x270] sm:$0xff] }
 0x380   :  { %5954 = vmatprep.subr.bf16.mxu1 %v5953_v60  ;;  %v5975_v60 = vpack.c.bf16 %v2511_v47, %v2506_v54  ;;  %v2547_v47 = vld [vmem:[%s11399_s11 + $0x240] sm:$0xff] }
 0x383   :  { %5956 = vmatpush1.bf16.msra.mxu1 %v5955_v2  ;;  %v2516_v2 = vld [vmem:[%s11399_s11 + $0x148] sm:$0xff] }
 0x384   :  { %5964 = vmatprep.subr.bf16.mxu1 %v5963_v8  ;;  %v2515_v8 = vld [vmem:[%s11399_s11 + $0x140] sm:$0xff]  ;;  %v5979_v9 = vpack.c.bf16 %v2521_v3, %v2516_v2  ;;  %v2557_v3 = vld [vmem:[%s11399_s11 + $0x290] sm:$0xff] }
 0x385   :  { %v5981_v19 = vpack.c.bf16 %v2520_v10, %v2515_v8  ;;  %v2573_v8 = vld [vmem:[%s11399_s11 + $0x310] sm:$0xff] }
 0x441   :  { %v4753_v11 = vpop.f32.mrb[14].mxu1 }
 0x442   :  { %v4754_v12 = vpop.f32.mrb[15].mxu1 }
 0x443   :  { %v4755_v13 = vadd.f32 %v4754_v12, %v4753_v11  ;;  %v6059_v11 = vpack.c.bf16 %v2523_v6, %v2518_v5  ;;  %v2517_v12 = vld [vmem:[%s11399_s11 + $0x150] sm:$0xff]  ;;  %v2562_v5 = vld [vmem:[%s11399_s11 + $0x2b8] sm:$0xff] }
 0x444   :  { %v2566_v6 = vld [vmem:[%s11399_s11 + $0x2d8] sm:$0xff] }
 0x445   :  { %v2225_v22 = vadd.f32 %v4755_v13, %v4526_v14  ;;  %v2522_v13 = vld [vmem:[%s11399_s11 + $0x178] sm:$0xff] }
 0x446   :  { %v2526_v14 = vld [vmem:[%s11399_s11 + $0x198] sm:$0xff]  ;;  %v6061_v35 = vpack.c.bf16 %v2522_v13, %v2517_v12 }
 0x447   :  { %v5983_v21 = vpack.c.bf16 %v2531_v16, %v2526_v14  ;;  %v2570_v12 = vld [vmem:[%s11399_s11 + $0x2f8] sm:$0xff]  ;;  %v2567_v16 = vld [vmem:[%s11399_s11 + $0x2e0] sm:$0xff] }
 0x451   :  { %v2294_v25 = vpop.f32.mrb[16].mxu1 }
 0x452   :  { %v2295_v33 = vadd.f32 %v2294_v25, %v2225_v22  ;;  %v5097_v34 = vpop.f32.mrb[17].mxu1  ;;  %v6063_v22 = vpack.c.bf16 %v2533_v18, %v2528_v17  ;;  %v2527_v25 = vld [vmem:[%s11399_s11 + $0x1a0] sm:$0xff]  ;;  %v2572_v17 = vld [vmem:[%s11399_s11 + $0x308] sm:$0xff] }
 0x453   :  { %v5985_v34 = vpack.c.bf16 %v2530_v50, %v2525_v20  ;;  %v2576_v18 = vld [vmem:[%s11399_s11 + $0x328] sm:$0xff]  ;;  %v2583_v20 = vld [vmem:[%s11399_s11 + $0x360] sm:$0xff] }
 0x454   :  { %4528 = vmatmul.mubr.msk.f32.vlgmr.msra.gmra.mrb[18].mxu1 %vm2327_vm3, %v2295_v33  ;;  %5107 = vmatmul.mubr.msk.f32.vlgmr.msra.gmra.mrb[10].mxu0 %vm2327_vm3, %v2295_v33  ;;  %v2543_v33 = vld [vmem:[%s11399_s11 + $0x220] sm:$0xff] }
 0x455   :  { %5966 = vmatpush1.bf16.msra.mxu1 %v5965_v63  ;;  %6046 = vmatpush1.bf16.msra.mxu0 %v6045_v26  ;;  %v2532_v63 = vld [vmem:[%s11399_s11 + $0x1c8] sm:$0xff]  ;;  %v6067_v39 = vpack.c.bf16 %v2543_v33, %v2538_v32  ;;  %v2582_v32 = vld [vmem:[%s11399_s11 + $0x358] sm:$0xff] }
 0x456   :  { %5968 = vmatprep.subr.bf16.mxu1 %v5967_v36  ;;  %6048 = vmatprep.subr.bf16.mxu0 %v6047_v37  ;;  %v2536_v26 = vld [vmem:[%s11399_s11 + $0x1e8] sm:$0xff]  ;;  %v6065_v36 = vpack.c.bf16 %v2532_v63, %v2527_v25  ;;  %v2535_v37 = vld [vmem:[%s11399_s11 + $0x1e0] sm:$0xff]  ;;  %v2586_v33 = vld [vmem:[%s11399_s11 + $0x378] sm:$0xff] }
 0x457   :  { %v5987_v38 = vpack.c.bf16 %v2541_v27, %v2536_v26  ;;  %v5989_v48 = vpack.c.bf16 %v2540_v24, %v2535_v37  ;;  %v2580_v25 = vld [vmem:[%s11399_s11 + $0x348] sm:$0xff]  ;;  %v2577_v27 = vld [vmem:[%s11399_s11 + $0x330] sm:$0xff] }
 0x458   :  { %v2593_v37 = vld [vmem:[%s11399_s11 + $0x3b0] sm:$0xff] }
 0x459   :  { %5970 = vmatpush1.bf16.msra.mxu1 %v5969_v44  ;;  %6050 = vmatpush1.bf16.msra.mxu0 %v6049_v45  ;;  %v2551_v44 = vld [vmem:[%s11399_s11 + $0x260] sm:$0xff]  ;;  %v2548_v45 = vld [vmem:[%s11399_s11 + $0x248] sm:$0xff] }
 0x45a   :  { %5972 = vmatprep.subr.bf16.mxu1 %v5971_v49  ;;  %6052 = vmatprep.subr.bf16.mxu0 %v6051_v51  ;;  %v6069_v49 = vpack.c.bf16 %v2542_v41, %v2537_v40  ;;  %v2545_v51 = vld [vmem:[%s11399_s11 + $0x230] sm:$0xff]  ;;  %v5991_v52 = vpack.c.bf16 %v2551_v44, %v2546_v43  ;;  %v6071_v54 = vpack.c.bf16 %v2553_v23, %v2548_v45  ;;  %v2590_v40 = vld [vmem:[%s11399_s11 + $0x398] sm:$0xff]  ;;  %v2587_v44 = vld [vmem:[%s11399_s11 + $0x380] sm:$0xff] }
 0x45b   :  { %v5993_v59 = vpack.c.bf16 %v2550_v58, %v2545_v51  ;;  %v2592_v45 = vld [vmem:[%s11399_s11 + $0x3a8] sm:$0xff]  ;;  %v2603_v51 = vld [vmem:[%s11399_s11 + $0x400] sm:$0xff] }
 0x45c   :  { %v2596_v23 = vld [vmem:[%s11399_s11 + $0x3c8] sm:$0xff] }
 0x45d   :  { %5974 = vmatpush1.bf16.msra.mxu1 %v5973_v56  ;;  %6054 = vmatpush1.bf16.msra.mxu0 %v6053_v28  ;;  %v2561_v56 = vld [vmem:[%s11399_s11 + $0x2b0] sm:$0xff]  ;;  %v2558_v28 = vld [vmem:[%s11399_s11 + $0x298] sm:$0xff] }
 0x45e   :  { %5976 = vmatprep.subr.bf16.mxu1 %v5975_v60  ;;  %6056 = vmatprep.subr.bf16.mxu0 %v6055_v61  ;;  %v6073_v60 = vpack.c.bf16 %v2552_v15, %v2547_v47  ;;  %v2555_v61 = vld [vmem:[%s11399_s11 + $0x280] sm:$0xff]  ;;  %v5995_v0 = vpack.c.bf16 %v2561_v56, %v2556_v55  ;;  %v6075_v2 = vpack.c.bf16 %v2563_v57, %v2558_v28  ;;  %v2600_v47 = vld [vmem:[%s11399_s11 + $0x3e8] sm:$0xff]  ;;  %v2597_v56 = vld [vmem:[%s11399_s11 + $0x3d0] sm:$0xff] }
 0x45f   :  { %v5997_v10 = vpack.c.bf16 %v2560_v62, %v2555_v61  ;;  %v2602_v28 = vld [vmem:[%s11399_s11 + $0x3f8] sm:$0xff]  ;;  %v2613_v61 = vld [vmem:[%s11399_s11 + $0x450] sm:$0xff] }
 0x460   :  { %v2606_v57 = vld [vmem:[%s11399_s11 + $0x418] sm:$0xff] }
 0x461   :  { %5978 = vmatpush1.bf16.msra.mxu1 %v5977_v30  ;;  %6058 = vmatpush1.bf16.msra.mxu0 %v6057_v4  ;;  %v2571_v30 = vld [vmem:[%s11399_s11 + $0x300] sm:$0xff]  ;;  %v2568_v4 = vld [vmem:[%s11399_s11 + $0x2e8] sm:$0xff] }
 0x462   :  { %5980 = vmatprep.subr.bf16.mxu1 %v5979_v9  ;;  %6060 = vmatprep.subr.bf16.mxu0 %v6059_v11  ;;  %v6077_v9 = vpack.c.bf16 %v2562_v5, %v2557_v3  ;;  %v2565_v11 = vld [vmem:[%s11399_s11 + $0x2d0] sm:$0xff]  ;;  %v5999_v13 = vpack.c.bf16 %v2571_v30, %v2566_v6  ;;  %v6079_v14 = vpack.c.bf16 %v2573_v8, %v2568_v4  ;;  %v2610_v3 = vld [vmem:[%s11399_s11 + $0x438] sm:$0xff]  ;;  %v2607_v30 = vld [vmem:[%s11399_s11 + $0x420] sm:$0xff] }
 0x463   :  { %v6001_v50 = vpack.c.bf16 %v2570_v12, %v2565_v11  ;;  %v2612_v4 = vld [vmem:[%s11399_s11 + $0x448] sm:$0xff]  ;;  %v2623_v11 = vld [vmem:[%s11399_s11 + $0x4a0] sm:$0xff] }
 0x464   :  { %v2616_v8 = vld [vmem:[%s11399_s11 + $0x468] sm:$0xff] }
 0x465   :  { %5982 = vmatpush1.bf16.msra.mxu1 %v5981_v19  ;;  %6062 = vmatpush1.bf16.msra.mxu0 %v6061_v35  ;;  %v2581_v19 = vld [vmem:[%s11399_s11 + $0x350] sm:$0xff]  ;;  %v2578_v35 = vld [vmem:[%s11399_s11 + $0x338] sm:$0xff] }
 0x466   :  { %5984 = vmatprep.subr.bf16.mxu1 %v5983_v21  ;;  %6064 = vmatprep.subr.bf16.mxu0 %v6063_v22  ;;  %v6081_v21 = vpack.c.bf16 %v2572_v17, %v2567_v16  ;;  %v2575_v22 = vld [vmem:[%s11399_s11 + $0x320] sm:$0xff]  ;;  %v6003_v63 = vpack.c.bf16 %v2581_v19, %v2576_v18  ;;  %v6083_v26 = vpack.c.bf16 %v2583_v20, %v2578_v35  ;;  %v2620_v18 = vld [vmem:[%s11399_s11 + $0x488] sm:$0xff]  ;;  %v2617_v19 = vld [vmem:[%s11399_s11 + $0x470] sm:$0xff] }
 0x467   :  { %v6005_v24 = vpack.c.bf16 %v2580_v25, %v2575_v22  ;;  %v2622_v35 = vld [vmem:[%s11399_s11 + $0x498] sm:$0xff]  ;;  %v2631_v22 = vld [vmem:[%s11399_s11 + $0x4e0] sm:$0xff]  ;;  %v2628_v25 = vld [vmem:[%s11399_s11 + $0x4c8] sm:$0xff] }
 0x469   :  { %5986 = vmatpush1.bf16.msra.mxu1 %v5985_v34  ;;  %6066 = vmatpush1.bf16.msra.mxu0 %v6065_v36  ;;  %v2591_v34 = vld [vmem:[%s11399_s11 + $0x3a0] sm:$0xff]  ;;  %v2588_v36 = vld [vmem:[%s11399_s11 + $0x388] sm:$0xff] }
 0x46a   :  { %5988 = vmatprep.subr.bf16.mxu1 %v5987_v38  ;;  %6068 = vmatprep.subr.bf16.mxu0 %v6067_v39  ;;  %v6085_v38 = vpack.c.bf16 %v2582_v32, %v2577_v27  ;;  %v2585_v39 = vld [vmem:[%s11399_s11 + $0x370] sm:$0xff]  ;;  %v6007_v41 = vpack.c.bf16 %v2591_v34, %v2586_v33  ;;  %v6087_v43 = vpack.c.bf16 %v2593_v37, %v2588_v36  ;;  %v2630_v32 = vld [vmem:[%s11399_s11 + $0x4d8] sm:$0xff]  ;;  %v2627_v36 = vld [vmem:[%s11399_s11 + $0x4c0] sm:$0xff] }
 0x46b   :  { %v6009_v58 = vpack.c.bf16 %v2590_v40, %v2585_v39  ;;  %v2625_v27 = vld [vmem:[%s11399_s11 + $0x4b0] sm:$0xff]  ;;  %v2632_v37 = vld [vmem:[%s11399_s11 + $0x4e8] sm:$0xff]  ;;  %v2638_v40 = vld [vmem:[%s11399_s11 + $0x518] sm:$0xff] }
 0x46c   :  { %v6025_v34 = vpack.c.bf16 %v2630_v32, %v2625_v27  ;;  %v2641_v39 = vld [vmem:[%s11399_s11 + $0x530] sm:$0xff] }
 0x46d   :  { %5990 = vmatpush1.bf16.msra.mxu1 %v5989_v48  ;;  %6070 = vmatpush1.bf16.msra.mxu0 %v6069_v49  ;;  %v2601_v48 = vld [vmem:[%s11399_s11 + $0x3f0] sm:$0xff]  ;;  %v2598_v49 = vld [vmem:[%s11399_s11 + $0x3d8] sm:$0xff] }
 0x46e   :  { %5992 = vmatprep.subr.bf16.mxu1 %v5991_v52  ;;  %6072 = vmatprep.subr.bf16.mxu0 %v6071_v54  ;;  %v6089_v52 = vpack.c.bf16 %v2592_v45, %v2587_v44  ;;  %v2595_v54 = vld [vmem:[%s11399_s11 + $0x3c0] sm:$0xff]  ;;  %v6011_v15 = vpack.c.bf16 %v2601_v48, %v2596_v23  ;;  %v6091_v55 = vpack.c.bf16 %v2603_v51, %v2598_v49  ;;  %v2665_v32 = vld [vmem:[%s11399_s11 + $0x5f0] sm:$0xff] }
 0x46f   :  { %v6013_v62 = vpack.c.bf16 %v2600_v47, %v2595_v54  ;;  %v9613_v45 = vld [vmem:[%s11398_s10] sm:$0x7] }
 0x470   :  { %v2315_v23 = vrot.slane %v9613_v45, %v7393_v29  ;;  %v2319_v48 = vrot.slane %v9613_v45, %v7401_v31 }
 0x471   :  { %5994 = vmatpush1.bf16.msra.mxu1 %v5993_v59  ;;  %6074 = vmatpush1.bf16.msra.mxu0 %v6073_v60  ;;  %v2611_v59 = vld [vmem:[%s11399_s11 + $0x440] sm:$0xff]  ;;  %v2608_v60 = vld [vmem:[%s11399_s11 + $0x428] sm:$0xff] }
 0x472   :  { %5996 = vmatprep.subr.bf16.mxu1 %v5995_v0  ;;  %6076 = vmatprep.subr.bf16.mxu0 %v6075_v2  ;;  %v6093_v0 = vpack.c.bf16 %v2602_v28, %v2597_v56  ;;  %v2605_v2 = vld [vmem:[%s11399_s11 + $0x410] sm:$0xff]  ;;  %v6015_v5 = vpack.c.bf16 %v2611_v59, %v2606_v57  ;;  %v6095_v6 = vpack.c.bf16 %v2613_v61, %v2608_v60  ;;  %v2642_v56 = vld [vmem:[%s11399_s11 + $0x538] sm:$0xff]  ;;  %v2651_v59 = vld [vmem:[%s11399_s11 + $0x580] sm:$0xff] }
 0x473   :  { %v6017_v12 = vpack.c.bf16 %v2610_v3, %v2605_v2  ;;  %v2646_v28 = vld [vmem:[%s11399_s11 + $0x558] sm:$0xff]  ;;  %v2648_v60 = vld [vmem:[%s11399_s11 + $0x568] sm:$0xff]  ;;  %v2653_v61 = vld [vmem:[%s11399_s11 + $0x590] sm:$0xff] }
 0x474   :  { %v2645_v3 = vld [vmem:[%s11399_s11 + $0x550] sm:$0xff] }
 0x475   :  { %5998 = vmatpush1.bf16.msra.mxu1 %v5997_v10  ;;  %6078 = vmatpush1.bf16.msra.mxu0 %v6077_v9  ;;  %v2621_v10 = vld [vmem:[%s11399_s11 + $0x490] sm:$0xff]  ;;  %v2618_v9 = vld [vmem:[%s11399_s11 + $0x478] sm:$0xff] }
 0x476   :  { %6000 = vmatprep.subr.bf16.mxu1 %v5999_v13  ;;  %6080 = vmatprep.subr.bf16.mxu0 %v6079_v14  ;;  %v6097_v13 = vpack.c.bf16 %v2612_v4, %v2607_v30  ;;  %v2615_v14 = vld [vmem:[%s11399_s11 + $0x460] sm:$0xff]  ;;  %v6019_v16 = vpack.c.bf16 %v2621_v10, %v2616_v8  ;;  %v6099_v17 = vpack.c.bf16 %v2623_v11, %v2618_v9  ;;  %v2652_v10 = vld [vmem:[%s11399_s11 + $0x588] sm:$0xff]  ;;  %v2661_v11 = vld [vmem:[%s11399_s11 + $0x5d0] sm:$0xff] }
 0x477   :  { %v6021_v20 = vpack.c.bf16 %v2620_v18, %v2615_v14  ;;  %v6031_v30 = vpack.c.bf16 %v2651_v59, %v2646_v28  ;;  %v6111_v4 = vpack.c.bf16 %v2653_v61, %v2648_v60  ;;  %v2647_v8 = vld [vmem:[%s11399_s11 + $0x560] sm:$0xff]  ;;  %v2656_v9 = vld [vmem:[%s11399_s11 + $0x5a8] sm:$0xff]  ;;  %v2494_v28 = vld [vmem:[%s11399_s11 + $0x98] sm:$0xff] }
 0x478   :  { %v2660_v18 = vld [vmem:[%s11399_s11 + $0x5c8] sm:$0xff]  ;;  %v2654_v59 = vld [vmem:[%s11399_s11 + $0x598] sm:$0xff]  ;;  %v2579_v60 = vld [vmem:[%s11399_s11 + $0x340] sm:$0xff] }
 0x479   :  { %6002 = vmatpush1.bf16.msra.mxu1 %v6001_v50  ;;  %6082 = vmatpush1.bf16.msra.mxu0 %v6081_v21  ;;  %v6101_v50 = vpack.c.bf16 %v2622_v35, %v2617_v19  ;;  %v2626_v21 = vld [vmem:[%s11399_s11 + $0x4b8] sm:$0xff]  ;;  %v6035_v19 = vpack.c.bf16 %v2661_v11, %v2656_v9  ;;  %v2584_v61 = vld [vmem:[%s11399_s11 + $0x368] sm:$0xff] }
 0x47a   :  { %6004 = vmatprep.subr.bf16.mxu1 %v6003_v63  ;;  %6084 = vmatprep.subr.bf16.mxu0 %v6083_v26  ;;  %v6023_v63 = vpack.c.bf16 %v2631_v22, %v2626_v21  ;;  %v2633_v26 = vld [vmem:[%s11399_s11 + $0x4f0] sm:$0xff]  ;;  %v2666_v21 = vld [vmem:[%s11399_s11 + $0x5f8] sm:$0xff]  ;;  %v2671_v22 = vld [vmem:[%s11399_s11 + $0x620] sm:$0xff] }
 0x47b   :  { %v6103_v33 = vpack.c.bf16 %v2633_v26, %v2628_v25  ;;  %v2668_v25 = vld [vmem:[%s11399_s11 + $0x608] sm:$0xff] }
 0x47d   :  { %6006 = vmatpush1.bf16.msra.mxu1 %v6005_v24  ;;  %6086 = vmatpush1.bf16.msra.mxu0 %v6085_v38  ;;  %v6105_v24 = vpack.c.bf16 %v2632_v37, %v2627_v36  ;;  %v2636_v38 = vld [vmem:[%s11399_s11 + $0x508] sm:$0xff]  ;;  %v2670_v37 = vld [vmem:[%s11399_s11 + $0x618] sm:$0xff] }
 0x47e   :  { %6008 = vmatprep.subr.bf16.mxu1 %v6007_v41  ;;  %6088 = vmatprep.subr.bf16.mxu0 %v6087_v43  ;;  %v6027_v41 = vpack.c.bf16 %v2641_v39, %v2636_v38  ;;  %v2643_v43 = vld [vmem:[%s11399_s11 + $0x540] sm:$0xff]  ;;  %v2672_v38 = vld [vmem:[%s11399_s11 + $0x628] sm:$0xff] }
 0x47f   :  { %v6107_v44 = vpack.c.bf16 %v2643_v43, %v2638_v40  ;;  %v2559_v39 = vld [vmem:[%s11399_s11 + $0x2a0] sm:$0xff]  ;;  %v2564_v40 = vld [vmem:[%s11399_s11 + $0x2c8] sm:$0xff] }
 0x481   :  { %6010 = vmatpush1.bf16.msra.mxu1 %v6009_v58  ;;  %6090 = vmatpush1.bf16.msra.mxu0 %v6089_v52  ;;  %v2635_v58 = vld [vmem:[%s11399_s11 + $0x500] sm:$0xff]  ;;  %v2640_v52 = vld [vmem:[%s11399_s11 + $0x528] sm:$0xff] }
 0x482   :  { %6012 = vmatprep.subr.bf16.mxu1 %v6011_v15  ;;  %6092 = vmatprep.subr.bf16.mxu0 %v6091_v55  ;;  %v2637_v55 = vld [vmem:[%s11399_s11 + $0x510] sm:$0xff] }
 0x483   :  { %v6109_v2 = vpack.c.bf16 %v2642_v56, %v2637_v55  ;;  %v2489_v56 = vld [vmem:[%s11399_s11 + $0x70] sm:$0xff] }
 0x485   :  { %6014 = vmatpush1.bf16.msra.mxu1 %v6013_v62  ;;  %6094 = vmatpush1.bf16.msra.mxu0 %v6093_v0  ;;  %v6029_v0 = vpack.c.bf16 %v2640_v52, %v2635_v58  ;;  %v2644_v58 = vld [vmem:[%s11399_s11 + $0x548] sm:$0xff]  ;;  %v2574_v52 = vld [vmem:[%s11399_s11 + $0x318] sm:$0xff] }
 0x486   :  { %6016 = vmatprep.subr.bf16.mxu1 %v6015_v5  ;;  %6096 = vmatprep.subr.bf16.mxu0 %v6095_v6  ;;  %v2650_v5 = vld [vmem:[%s11399_s11 + $0x578] sm:$0xff] }
 0x487   :  { %v6033_v14 = vpack.c.bf16 %v2650_v5, %v2645_v3  ;;  %v6131_v3 = vpack.c.bf16 %v2584_v61, %v2579_v60  ;;  %v2499_v5 = vld [vmem:[%s11399_s11 + $0xc0] sm:$0xff]  ;;  %v3165_v60 = vld [vmem:[%s11401_s13 + $0xf8] sm:$0xff] }
 0x488   :  { %v3170_v61 = vld [vmem:[%s11401_s13 + $0x120] sm:$0xff] }
 0x489   :  { %6018 = vmatpush1.bf16.msra.mxu1 %v6017_v12  ;;  %6098 = vmatpush1.bf16.msra.mxu0 %v6097_v13  ;;  %v2658_v12 = vld [vmem:[%s11399_s11 + $0x5b8] sm:$0xff]  ;;  %v2663_v13 = vld [vmem:[%s11399_s11 + $0x5e0] sm:$0xff] }
 0x48a   :  { %6020 = vmatprep.subr.bf16.mxu1 %v6019_v16  ;;  %6100 = vmatprep.subr.bf16.mxu0 %v6099_v17  ;;  %v6113_v16 = vpack.c.bf16 %v2652_v10, %v2647_v8  ;;  %v2655_v17 = vld [vmem:[%s11399_s11 + $0x5a0] sm:$0xff]  ;;  %v6115_v35 = vpack.c.bf16 %v2663_v13, %v2658_v12  ;;  %v2589_v8 = vld [vmem:[%s11399_s11 + $0x390] sm:$0xff]  ;;  %v2594_v10 = vld [vmem:[%s11399_s11 + $0x3b8] sm:$0xff] }
 0x48b   :  { %v6037_v26 = vpack.c.bf16 %v2660_v18, %v2655_v17  ;;  %v6135_v12 = vpack.c.bf16 %v2594_v10, %v2589_v8  ;;  %v2509_v13 = vld [vmem:[%s11399_s11 + $0x110] sm:$0xff]  ;;  %v2674_v17 = vld [vmem:[%s11399_s11 + $0x638] sm:$0xff]  ;;  %v2599_v18 = vld [vmem:[%s11399_s11 + $0x3e0] sm:$0xff]  ;;  %v6179_v8 = vpack.c.bf16 %v3170_v61, %v3165_v60 }
 0x48c   :  { %v3164_v10 = vld [vmem:[%s11401_s13 + $0xf0] sm:$0xff] }
 0x48d   :  { %6022 = vmatpush1.bf16.msra.mxu1 %v6021_v20  ;;  %6102 = vmatpush1.bf16.msra.mxu0 %v6101_v50  ;;  %v2657_v20 = vld [vmem:[%s11399_s11 + $0x5b0] sm:$0xff]  ;;  %v2662_v50 = vld [vmem:[%s11399_s11 + $0x5d8] sm:$0xff] }
 0x48e   :  { %6024 = vmatprep.subr.bf16.mxu1 %v6023_v63  ;;  %6104 = vmatprep.subr.bf16.mxu0 %v6103_v33  ;;  %v2673_v63 = vld [vmem:[%s11399_s11 + $0x630] sm:$0xff]  ;;  %v6117_v27 = vpack.c.bf16 %v2662_v50, %v2657_v20  ;;  %v2323_v33 = vrot.slane %v9613_v45, %v7765_v53  ;;  %v6123_v45 = vpack.c.bf16 %v2564_v40, %v2559_v39  ;;  %v2534_v40 = vld [vmem:[%s11399_s11 + $0x1d8] sm:$0xff] }
 0x48f   :  { %v6119_v36 = vpack.c.bf16 %v2673_v63, %v2668_v25  ;;  %v3140_v20 = vld [vmem:[%s11401_s13 + $0x30] sm:$0xff]  ;;  %v2519_v25 = vld [vmem:[%s11399_s11 + $0x160] sm:$0xff]  ;;  %v2524_v63 = vld [vmem:[%s11399_s11 + $0x188] sm:$0xff] }
 0x490   :  { %v2529_v39 = vld [vmem:[%s11399_s11 + $0x1b0] sm:$0xff] }
 0x491   :  { %6026 = vmatpush1.bf16.msra.mxu1 %v6025_v34  ;;  %6106 = vmatpush1.bf16.msra.mxu0 %v6105_v24  ;;  %v6039_v34 = vpack.c.bf16 %v2671_v22, %v2666_v21  ;;  %v2667_v24 = vld [vmem:[%s11399_s11 + $0x600] sm:$0xff]  ;;  %v3204_v61 = vld [vmem:[%s11401_s13 + $0x230] sm:$0xff] }
 0x492   :  { %6028 = vmatprep.subr.bf16.mxu1 %v6027_v41  ;;  %6108 = vmatprep.subr.bf16.mxu0 %v6107_v44  ;;  %v6041_v41 = vpack.c.bf16 %v2670_v37, %v2665_v32  ;;  %v6121_v43 = vpack.c.bf16 %v2672_v38, %v2667_v24  ;;  %v3150_v37 = vld [vmem:[%s11401_s13 + $0x80] sm:$0xff]  ;;  %v6141_v24 = vpack.c.bf16 %v2524_v63, %v2519_v25 }
 0x493   :  { %v3190_v25 = vld [vmem:[%s11401_s13 + $0x1c0] sm:$0xff] }
 0x527   :  { %v2397_v49 = vpop.f32.mrb[18].mxu1  ;;  %v9619_v51 = vpop.f32.mrb[10].mxu0 }
 0x528   :  { %v2398_v54 = vadd.f32 %v2397_v49, %v2315_v23  ;;  %v2399_v47 = vpop.f32.mrb[19].mxu1  ;;  %v5108_v15 = vpop.f32.mrb[11].mxu0  ;;  %v2469_v44 = vadd.f32 %v9619_v51, %v2323_v33  ;;  %v2479_v23 = vld [vmem:[%s11399_s11 + $0x20] sm:$0xff]  ;;  %v2569_v51 = vld [vmem:[%s11399_s11 + $0x2f0] sm:$0xff] }
 0x529   :  { %v2400_v57 = vadd.f32 %v2399_v47, %v2319_v48  ;;  %v2484_v48 = vld [vmem:[%s11399_s11 + $0x48] sm:$0xff]  ;;  %v2639_v49 = vld [vmem:[%s11399_s11 + $0x520] sm:$0xff]  ;;  %v6127_v55 = vpack.c.bf16 %v2574_v52, %v2569_v51  ;;  %v6145_v51 = vpack.c.bf16 %v2534_v40, %v2529_v39  ;;  %v3200_v40 = vld [vmem:[%s11401_s13 + $0x210] sm:$0xff] }
 0x52a   :  { %v9653_v6 = vmax.f32 %v2398_v54, 0.0  ;;  %v6125_v54 = vpack.c.bf16 %v2484_v48, %v2479_v23  ;;  %v9742_v47 = vmax.f32 %v2469_v44, 0.0  ;;  %v6156_v15 = vpack.c.bf16 %v2644_v58, %v2639_v49  ;;  %v3134_v33 = vld [vmem:[%s11401_s13] sm:$0xff]  ;;  %v2624_v44 = vld [vmem:[%s11399_s11 + $0x4a8] sm:$0xff]  ;;  %v3144_v23 = vld [vmem:[%s11401_s13 + $0x50] sm:$0xff] }
 0x52b   :  { %v9645_v62 = vmax.f32 %v2400_v57, 0.0  ;;  %v2649_v57 = vld [vmem:[%s11399_s11 + $0x570] sm:$0xff]  ;;  %v3149_v48 = vld [vmem:[%s11401_s13 + $0x78] sm:$0xff]  ;;  %v3155_v49 = vld [vmem:[%s11401_s13 + $0xa8] sm:$0xff] }
 0x52c   :  { %v3160_v58 = vld [vmem:[%s11401_s13 + $0xd0] sm:$0xff]  ;;  %v3195_v39 = vld [vmem:[%s11401_s13 + $0x1e8] sm:$0xff] }
 0x52d   :  { %2769 = vmatprep.mubr.f32.mxu1 %v9645_v62  ;;  %2911 = vmatprep.mubr.f32.mxu0 %v9645_v62 }
 0x52e   :  { %2770 = vmatmul.mubr.f32.vlgmr.msra.gmra.mrb[20].mxu1 %v9653_v6  ;;  %2912 = vmatmul.mubr.f32.vlgmr.msra.gmra.mrb[12].mxu0 %v9653_v6 }
 0x52f   :  { %6030 = vmatpush1.bf16.msra.mxu1 %v6029_v0  ;;  %6110 = vmatpush1.bf16.msra.mxu0 %v6109_v2  ;;  %v6129_v0 = vpack.c.bf16 %v2494_v28, %v2489_v56  ;;  %v6159_v2 = vpack.c.bf16 %v2654_v59, %v2649_v57  ;;  %v6173_v56 = vpack.c.bf16 %v3149_v48, %v3144_v23  ;;  %v3154_v57 = vld [vmem:[%s11401_s13 + $0xa0] sm:$0xff]  ;;  %v3159_v59 = vld [vmem:[%s11401_s13 + $0xc8] sm:$0xff]  ;;  %v3172_v48 = vld [vmem:[%s11401_s13 + $0x130] sm:$0xff] }
 0x530   :  { %6032 = vmatprep.subr.bf16.mxu1 %v6031_v30  ;;  %6112 = vmatprep.subr.bf16.mxu0 %v6111_v4  ;;  %v2504_v30 = vld [vmem:[%s11399_s11 + $0xe8] sm:$0xff]  ;;  %v2659_v4 = vld [vmem:[%s11399_s11 + $0x5c0] sm:$0xff]  ;;  %v6175_v28 = vpack.c.bf16 %v3160_v58, %v3155_v49  ;;  %v6191_v49 = vpack.c.bf16 %v3200_v40, %v3195_v39 }
 0x531   :  { %2840 = vmatprep.mubr.f32.mxu1 %v6730_v7  ;;  %2982 = vmatprep.mubr.f32.mxu0 %v6730_v7  ;;  %v6133_v9 = vpack.c.bf16 %v2504_v30, %v2499_v5  ;;  %v2554_v5 = vld [vmem:[%s11399_s11 + $0x278] sm:$0xff]  ;;  %v3194_v58 = vld [vmem:[%s11401_s13 + $0x1e0] sm:$0xff] }
 0x532   :  { %v3137_v30 = vld [vmem:[%s11401_s13 + $0x18] sm:$0xff]  ;;  %v3234_v40 = vld [vmem:[%s11401_s13 + $0x320] sm:$0xff] }
 0x533   :  { %6034 = vmatpush1.bf16.msra.mxu1 %v6033_v14  ;;  %6114 = vmatpush1.bf16.msra.mxu0 %v6113_v16  ;;  %v2514_v14 = vld [vmem:[%s11399_s11 + $0x138] sm:$0xff]  ;;  %v2669_v16 = vld [vmem:[%s11399_s11 + $0x610] sm:$0xff] }
 0x534   :  { %6036 = vmatprep.subr.bf16.mxu1 %v6035_v19  ;;  %6116 = vmatprep.subr.bf16.mxu0 %v6115_v35  ;;  %v2604_v19 = vld [vmem:[%s11399_s11 + $0x408] sm:$0xff]  ;;  %v6137_v50 = vpack.c.bf16 %v2514_v14, %v2509_v13  ;;  %v6165_v21 = vpack.c.bf16 %v2674_v17, %v2669_v16  ;;  %v3136_v16 = vld [vmem:[%s11401_s13 + $0x10] sm:$0xff]  ;;  %v3141_v17 = vld [vmem:[%s11401_s13 + $0x38] sm:$0xff] }
 0x535   :  { %v3135_v35 = vld [vmem:[%s11401_s13 + $0x8] sm:$0xff]  ;;  %v6139_v22 = vpack.c.bf16 %v2604_v19, %v2599_v18  ;;  %v6329_v63 = vpack.c.bf16 %v3141_v17, %v3136_v16  ;;  %v3230_v16 = vld [vmem:[%s11401_s13 + $0x300] sm:$0xff] }
 0x536   :  { %v6167_v32 = vpack.c.bf16 %v3140_v20, %v3135_v35  ;;  %v3147_v18 = vld [vmem:[%s11401_s13 + $0x68] sm:$0xff]  ;;  %v3152_v35 = vld [vmem:[%s11401_s13 + $0x90] sm:$0xff] }
 0x537   :  { %6038 = vmatpush1.bf16.msra.mxu1 %v6037_v26  ;;  %6118 = vmatpush1.bf16.msra.mxu0 %v6117_v27  ;;  %v2609_v26 = vld [vmem:[%s11399_s11 + $0x430] sm:$0xff]  ;;  %v2614_v27 = vld [vmem:[%s11399_s11 + $0x458] sm:$0xff] }
 0x538   :  { %6040 = vmatprep.subr.bf16.mxu1 %v6039_v34  ;;  %6120 = vmatprep.subr.bf16.mxu0 %v6119_v36  ;;  %v3139_v34 = vld [vmem:[%s11401_s13 + $0x28] sm:$0xff]  ;;  %v3145_v36 = vld [vmem:[%s11401_s13 + $0x58] sm:$0xff]  ;;  %v6143_v38 = vpack.c.bf16 %v2614_v27, %v2609_v26  ;;  %v6331_v26 = vpack.c.bf16 %v3152_v35, %v3147_v18  ;;  %v3146_v27 = vld [vmem:[%s11401_s13 + $0x60] sm:$0xff] }
 0x539   :  { %v3191_v35 = vld [vmem:[%s11401_s13 + $0x1c8] sm:$0xff] }
 0x53b   :  { %6042 = vmatpush1.bf16.msra.mxu1 %v6041_v41  ;;  %6122 = vmatpush1.bf16.msra.mxu0 %v6121_v43  ;;  %v2619_v41 = vld [vmem:[%s11399_s11 + $0x480] sm:$0xff]  ;;  %v6169_v43 = vpack.c.bf16 %v3139_v34, %v3134_v33  ;;  %v3157_v33 = vld [vmem:[%s11401_s13 + $0xb8] sm:$0xff] }
 0x53c   :  { %6124 = vmatprep.subr.bf16.mxu1 %v6123_v45  ;;  %6155 = vmatprep.subr.bf16.mxu0 %v6731_v1  ;;  %v6171_v45 = vpack.c.bf16 %v3150_v37, %v3145_v36  ;;  %v6147_v52 = vpack.c.bf16 %v2624_v44, %v2619_v41  ;;  %v3162_v36 = vld [vmem:[%s11401_s13 + $0xe0] sm:$0xff]  ;;  %v3156_v44 = vld [vmem:[%s11401_s13 + $0xb0] sm:$0xff] }
 0x53e   :  { %4530 = vmatmul.mubr.msk.f32.vlgmr.msra.gmra.mrb[20].mxu1 %vm2154_vm2, %v9742_v47  ;;  %4531 = vmatmul.mubr.msk.f32.vlgmr.msra.gmra.mrb[12].mxu0 %vm2154_vm2, %v9742_v47 }
 0x53f   :  { %6126 = vmatpush3.bf16.msra.mxu1 %v6125_v54  ;;  %3053 = vmatprep.mubr.f32.mxu1 %v9645_v62  ;;  %v2664_v62 = vld [vmem:[%s11399_s11 + $0x5e8] sm:$0xff]  ;;  %v2539_v54 = vld [vmem:[%s11399_s11 + $0x200] sm:$0xff] }
 0x540   :  { %6157 = vmatpush3.bf16.msra.mxu0 %v6156_v15  ;;  %6128 = vmatprep.subr.bf16.mxu1 %v6127_v55  ;;  %v6162_v11 = vpack.c.bf16 %v2664_v62, %v2659_v4  ;;  %v2544_v15 = vld [vmem:[%s11399_s11 + $0x228] sm:$0xff]  ;;  %v2629_v55 = vld [vmem:[%s11399_s11 + $0x4d0] sm:$0xff]  ;;  %v6177_v4 = vpack.c.bf16 %v3159_v59, %v3154_v57  ;;  %v3142_v62 = vld [vmem:[%s11401_s13 + $0x40] sm:$0xff] }
 0x541   :  { %6158 = vmatprep.subr.bf16.mxu0 %v6731_v1  ;;  %5125 = vmatprep.mubr.msk.f32.mxu0 %vm6732_vm1, %v6730_v7  ;;  %v6327_v14 = vpack.c.bf16 %v3142_v62, %v3137_v30  ;;  %v3182_v59 = vld [vmem:[%s11401_s13 + $0x180] sm:$0xff]  ;;  %v3181_v62 = vld [vmem:[%s11401_s13 + $0x178] sm:$0xff] }
 0x543   :  { %6130 = vmatpush3.bf16.msra.mxu1 %v6129_v0  ;;  %v6149_v0 = vpack.c.bf16 %v2544_v15, %v2539_v54  ;;  %v3210_v54 = vld [vmem:[%s11401_s13 + $0x260] sm:$0xff] }
 0x544   :  { %6160 = vmatpush3.bf16.msra.mxu0 %v6159_v2  ;;  %6132 = vmatprep.subr.bf16.mxu1 %v6131_v3  ;;  %v2549_v3 = vld [vmem:[%s11399_s11 + $0x250] sm:$0xff] }
 0x545   :  { %6161 = vmatprep.subr.bf16.mxu0 %v6731_v1  ;;  %v6153_v13 = vpack.c.bf16 %v2554_v5, %v2549_v3  ;;  %v3220_v3 = vld [vmem:[%s11401_s13 + $0x2b0] sm:$0xff] }
 0x547   :  { %6134 = vmatpush3.bf16.msra.mxu1 %v6133_v9  ;;  %v3169_v9 = vld [vmem:[%s11401_s13 + $0x118] sm:$0xff] }
 0x548   :  { %6163 = vmatpush3.bf16.msra.mxu0 %v6162_v11  ;;  %6136 = vmatprep.subr.bf16.mxu1 %v6135_v12  ;;  %v3175_v11 = vld [vmem:[%s11401_s13 + $0x148] sm:$0xff]  ;;  %v3180_v12 = vld [vmem:[%s11401_s13 + $0x170] sm:$0xff]  ;;  %v6181_v19 = vpack.c.bf16 %v3169_v9, %v3164_v10 }
 0x549   :  { %6164 = vmatprep.subr.bf16.mxu0 %v6731_v1  ;;  %v6183_v20 = vpack.c.bf16 %v3180_v12, %v3175_v11  ;;  %v3192_v9 = vld [vmem:[%s11401_s13 + $0x1d0] sm:$0xff]  ;;  %v3214_v12 = vld [vmem:[%s11401_s13 + $0x280] sm:$0xff] }
 0x54b   :  { %6138 = vmatpush3.bf16.msra.mxu1 %v6137_v50  ;;  %v3174_v50 = vld [vmem:[%s11401_s13 + $0x140] sm:$0xff] }
 0x54c   :  { %6166 = vmatpush3.bf16.msra.mxu0 %v6165_v21  ;;  %6140 = vmatprep.subr.bf16.mxu1 %v6139_v22  ;;  %v3179_v21 = vld [vmem:[%s11401_s13 + $0x168] sm:$0xff]  ;;  %v3185_v22 = vld [vmem:[%s11401_s13 + $0x198] sm:$0xff] }
 0x54d   :  { %6168 = vmatprep.subr.bf16.mxu0 %v6167_v32  ;;  %v3151_v32 = vld [vmem:[%s11401_s13 + $0x88] sm:$0xff]  ;;  %v6185_v34 = vpack.c.bf16 %v3179_v21, %v3174_v50  ;;  %v6187_v37 = vpack.c.bf16 %v3190_v25, %v3185_v22  ;;  %v3202_v21 = vld [vmem:[%s11401_s13 + $0x220] sm:$0xff]  ;;  %v3224_v25 = vld [vmem:[%s11401_s13 + $0x2d0] sm:$0xff] }
 0x54e   :  { %v6333_v41 = vpack.c.bf16 %v3151_v32, %v3146_v27  ;;  %v3240_v27 = vld [vmem:[%s11401_s13 + $0x350] sm:$0xff] }
 0x54f   :  { %5126 = vmatmul.mubr.msk.f32.vlgmr.msra.gmra.mrb[14].mxu0 %vm2154_vm2, %v9742_v47  ;;  %6142 = vmatpush3.bf16.msra.mxu1 %v6141_v24  ;;  %v2634_v47 = vld [vmem:[%s11399_s11 + $0x4f8] sm:$0xff]  ;;  %v3184_v24 = vld [vmem:[%s11401_s13 + $0x190] sm:$0xff] }
 0x550   :  { %6144 = vmatprep.subr.bf16.mxu1 %v6143_v38  ;;  %6170 = vmatpush1.bf16.msra.mxu0 %v6169_v43  ;;  %v6151_v2 = vpack.c.bf16 %v2634_v47, %v2629_v55  ;;  %v3189_v38 = vld [vmem:[%s11401_s13 + $0x1b8] sm:$0xff]  ;;  %v6335_v43 = vpack.c.bf16 %v3162_v36, %v3157_v33  ;;  %v3171_v47 = vld [vmem:[%s11401_s13 + $0x128] sm:$0xff] }
 0x551   :  { %6172 = vmatprep.subr.bf16.mxu0 %v6171_v45  ;;  %v3167_v45 = vld [vmem:[%s11401_s13 + $0x108] sm:$0xff]  ;;  %v6189_v23 = vpack.c.bf16 %v3189_v38, %v3184_v24  ;;  %v3201_v36 = vld [vmem:[%s11401_s13 + $0x218] sm:$0xff]  ;;  %v3212_v38 = vld [vmem:[%s11401_s13 + $0x270] sm:$0xff] }
 0x552   :  { %v6339_v55 = vpack.c.bf16 %v3172_v48, %v3167_v45  ;;  %v3211_v48 = vld [vmem:[%s11401_s13 + $0x268] sm:$0xff] }
 0x553   :  { %6146 = vmatpush3.bf16.msra.mxu1 %v6145_v51  ;;  %v3199_v51 = vld [vmem:[%s11401_s13 + $0x208] sm:$0xff] }
 0x554   :  { %6148 = vmatprep.subr.bf16.mxu1 %v6147_v52  ;;  %6174 = vmatpush1.bf16.msra.mxu0 %v6173_v56  ;;  %v3205_v52 = vld [vmem:[%s11401_s13 + $0x238] sm:$0xff]  ;;  %v3166_v56 = vld [vmem:[%s11401_s13 + $0x100] sm:$0xff]  ;;  %v6193_v57 = vpack.c.bf16 %v3199_v51, %v3194_v58 }
 0x555   :  { %6176 = vmatprep.subr.bf16.mxu0 %v6175_v28  ;;  %v3177_v28 = vld [vmem:[%s11401_s13 + $0x158] sm:$0xff]  ;;  %v6195_v60 = vpack.c.bf16 %v3210_v54, %v3205_v52  ;;  %v6341_v5 = vpack.c.bf16 %v3171_v47, %v3166_v56  ;;  %v3222_v51 = vld [vmem:[%s11401_s13 + $0x2c0] sm:$0xff]  ;;  %v3244_v54 = vld [vmem:[%s11401_s13 + $0x370] sm:$0xff] }
 0x556   :  { %v6343_v30 = vpack.c.bf16 %v3182_v59, %v3177_v28  ;;  %v3260_v56 = vld [vmem:[%s11401_s13 + $0x3f0] sm:$0xff]  ;;  %v3221_v59 = vld [vmem:[%s11401_s13 + $0x2b8] sm:$0xff] }
 0x557   :  { %6150 = vmatpush3.bf16.msra.mxu1 %v6149_v0  ;;  %v3209_v0 = vld [vmem:[%s11401_s13 + $0x258] sm:$0xff] }
 0x558   :  { %6152 = vmatprep.subr.bf16.mxu1 %v6151_v2  ;;  %6178 = vmatpush1.bf16.msra.mxu0 %v6177_v4  ;;  %v3215_v2 = vld [vmem:[%s11401_s13 + $0x288] sm:$0xff]  ;;  %v3176_v4 = vld [vmem:[%s11401_s13 + $0x150] sm:$0xff]  ;;  %v6197_v10 = vpack.c.bf16 %v3209_v0, %v3204_v61 }
 0x559   :  { %6180 = vmatprep.subr.bf16.mxu0 %v6179_v8  ;;  %v3187_v8 = vld [vmem:[%s11401_s13 + $0x1a8] sm:$0xff]  ;;  %v6199_v11 = vpack.c.bf16 %v3220_v3, %v3215_v2  ;;  %v6345_v17 = vpack.c.bf16 %v3181_v62, %v3176_v4  ;;  %v3232_v0 = vld [vmem:[%s11401_s13 + $0x310] sm:$0xff]  ;;  %v3254_v3 = vld [vmem:[%s11401_s13 + $0x3c0] sm:$0xff] }
 0x55a   :  { %v6347_v18 = vpack.c.bf16 %v3192_v9, %v3187_v8  ;;  %v3270_v4 = vld [vmem:[%s11401_s13 + $0x440] sm:$0xff]  ;;  %v3231_v9 = vld [vmem:[%s11401_s13 + $0x308] sm:$0xff] }
 0x55b   :  { %6154 = vmatpush3.bf16.msra.mxu1 %v6153_v13  ;;  %v3219_v13 = vld [vmem:[%s11401_s13 + $0x2a8] sm:$0xff] }
 0x55c   :  { %6328 = vmatprep.subr.bf16.mxu1 %v6327_v14  ;;  %6182 = vmatpush1.bf16.msra.mxu0 %v6181_v19  ;;  %v3225_v14 = vld [vmem:[%s11401_s13 + $0x2d8] sm:$0xff]  ;;  %v3186_v19 = vld [vmem:[%s11401_s13 + $0x1a0] sm:$0xff]  ;;  %v6201_v50 = vpack.c.bf16 %v3219_v13, %v3214_v12 }
 0x55d   :  { %6184 = vmatprep.subr.bf16.mxu0 %v6183_v20  ;;  %v3197_v20 = vld [vmem:[%s11401_s13 + $0x1f8] sm:$0xff]  ;;  %v6203_v22 = vpack.c.bf16 %v3230_v16, %v3225_v14  ;;  %v6349_v32 = vpack.c.bf16 %v3191_v35, %v3186_v19  ;;  %v3242_v13 = vld [vmem:[%s11401_s13 + $0x360] sm:$0xff]  ;;  %v3264_v16 = vld [vmem:[%s11401_s13 + $0x410] sm:$0xff] }
 0x55e   :  { %3054 = vmatmul.mubr.f32.vlgmr.msra.gmra.mrb[22].mxu1 %v9653_v6  ;;  %v3161_v6 = vld [vmem:[%s11401_s13 + $0xd8] sm:$0xff]  ;;  %v6351_v33 = vpack.c.bf16 %v3202_v21, %v3197_v20  ;;  %v3280_v19 = vld [vmem:[%s11401_s13 + $0x490] sm:$0xff] }
 0x55f   :  { %6330 = vmatpush1.bf16.msra.mxu1 %v6329_v63  ;;  %v6337_v15 = vpack.c.bf16 %v3161_v6, %v3156_v44  ;;  %v3229_v63 = vld [vmem:[%s11401_s13 + $0x2f8] sm:$0xff]  ;;  %v3250_v44 = vld [vmem:[%s11401_s13 + $0x3a0] sm:$0xff] }
 0x560   :  { %6332 = vmatprep.subr.bf16.mxu1 %v6331_v26  ;;  %6186 = vmatpush1.bf16.msra.mxu0 %v6185_v34  ;;  %v3235_v26 = vld [vmem:[%s11401_s13 + $0x328] sm:$0xff]  ;;  %v3196_v34 = vld [vmem:[%s11401_s13 + $0x1f0] sm:$0xff]  ;;  %v6205_v24 = vpack.c.bf16 %v3229_v63, %v3224_v25  ;;  %v3241_v21 = vld [vmem:[%s11401_s13 + $0x358] sm:$0xff] }
 0x561   :  { %6188 = vmatprep.subr.bf16.mxu0 %v6187_v37  ;;  %v3207_v37 = vld [vmem:[%s11401_s13 + $0x248] sm:$0xff]  ;;  %v6207_v39 = vpack.c.bf16 %v3240_v27, %v3235_v26  ;;  %v6353_v6 = vpack.c.bf16 %v3201_v36, %v3196_v34  ;;  %v3252_v63 = vld [vmem:[%s11401_s13 + $0x3b0] sm:$0xff]  ;;  %v3274_v27 = vld [vmem:[%s11401_s13 + $0x460] sm:$0xff] }
 0x562   :  { %v6355_v45 = vpack.c.bf16 %v3212_v38, %v3207_v37  ;;  %v3246_v36 = vld [vmem:[%s11401_s13 + $0x380] sm:$0xff]  ;;  %v3251_v37 = vld [vmem:[%s11401_s13 + $0x3a8] sm:$0xff]  ;;  %v3257_v38 = vld [vmem:[%s11401_s13 + $0x3d8] sm:$0xff] }
 0x563   :  { %6334 = vmatpush1.bf16.msra.mxu1 %v6333_v41  ;;  %v3239_v41 = vld [vmem:[%s11401_s13 + $0x348] sm:$0xff] }
 0x564   :  { %6336 = vmatprep.subr.bf16.mxu1 %v6335_v43  ;;  %6190 = vmatpush1.bf16.msra.mxu0 %v6189_v23  ;;  %v3245_v43 = vld [vmem:[%s11401_s13 + $0x378] sm:$0xff]  ;;  %v3206_v23 = vld [vmem:[%s11401_s13 + $0x240] sm:$0xff]  ;;  %v6209_v58 = vpack.c.bf16 %v3239_v41, %v3234_v40  ;;  %v6373_v40 = vpack.c.bf16 %v3251_v37, %v3246_v36  ;;  %v3307_v36 = vld [vmem:[%s11401_s13 + $0x568] sm:$0xff] }
 0x565   :  { %6192 = vmatprep.subr.bf16.mxu0 %v6191_v49  ;;  %v3217_v49 = vld [vmem:[%s11401_s13 + $0x298] sm:$0xff]  ;;  %v6211_v52 = vpack.c.bf16 %v3250_v44, %v3245_v43  ;;  %v6357_v47 = vpack.c.bf16 %v3211_v48, %v3206_v23  ;;  %v3256_v43 = vld [vmem:[%s11401_s13 + $0x3d0] sm:$0xff] }
 0x566   :  { %v6359_v28 = vpack.c.bf16 %v3222_v51, %v3217_v49  ;;  %v3261_v44 = vld [vmem:[%s11401_s13 + $0x3f8] sm:$0xff]  ;;  %v3266_v49 = vld [vmem:[%s11401_s13 + $0x420] sm:$0xff]  ;;  %v3312_v37 = vld [vmem:[%s11401_s13 + $0x590] sm:$0xff] }
 0x567   :  { %6338 = vmatpush1.bf16.msra.mxu1 %v6337_v15  ;;  %v3249_v15 = vld [vmem:[%s11401_s13 + $0x398] sm:$0xff]  ;;  %v6377_v23 = vpack.c.bf16 %v3261_v44, %v3256_v43  ;;  %v3306_v44 = vld [vmem:[%s11401_s13 + $0x560] sm:$0xff] }
 0x568   :  { %6340 = vmatprep.subr.bf16.mxu1 %v6339_v55  ;;  %6194 = vmatpush1.bf16.msra.mxu0 %v6193_v57  ;;  %v3255_v55 = vld [vmem:[%s11401_s13 + $0x3c8] sm:$0xff]  ;;  %v3216_v57 = vld [vmem:[%s11401_s13 + $0x290] sm:$0xff]  ;;  %v6213_v61 = vpack.c.bf16 %v3249_v15, %v3244_v54  ;;  %v3277_v51 = vld [vmem:[%s11401_s13 + $0x478] sm:$0xff] }
 0x569   :  { %6196 = vmatprep.subr.bf16.mxu0 %v6195_v60  ;;  %v3227_v60 = vld [vmem:[%s11401_s13 + $0x2e8] sm:$0xff]  ;;  %v6215_v2 = vpack.c.bf16 %v3260_v56, %v3255_v55  ;;  %v6361_v62 = vpack.c.bf16 %v3221_v59, %v3216_v57  ;;  %v3276_v55 = vld [vmem:[%s11401_s13 + $0x470] sm:$0xff]  ;;  %v3281_v56 = vld [vmem:[%s11401_s13 + $0x498] sm:$0xff] }
 0x56a   :  { %v6363_v8 = vpack.c.bf16 %v3232_v0, %v3227_v60  ;;  %v3287_v57 = vld [vmem:[%s11401_s13 + $0x4c8] sm:$0xff]  ;;  %v3292_v60 = vld [vmem:[%s11401_s13 + $0x4f0] sm:$0xff]  ;;  %v3289_v0 = vld [vmem:[%s11401_s13 + $0x4d8] sm:$0xff] }
 0x56b   :  { %6342 = vmatpush1.bf16.msra.mxu1 %v6341_v5  ;;  %v3259_v5 = vld [vmem:[%s11401_s13 + $0x3e8] sm:$0xff] }
 0x56c   :  { %6344 = vmatprep.subr.bf16.mxu1 %v6343_v30  ;;  %6198 = vmatpush1.bf16.msra.mxu0 %v6197_v10  ;;  %v3265_v30 = vld [vmem:[%s11401_s13 + $0x418] sm:$0xff]  ;;  %v3226_v10 = vld [vmem:[%s11401_s13 + $0x2e0] sm:$0xff]  ;;  %v6217_v12 = vpack.c.bf16 %v3259_v5, %v3254_v3  ;;  %v6387_v5 = vpack.c.bf16 %v3292_v60, %v3287_v57  ;;  %v3316_v57 = vld [vmem:[%s11401_s13 + $0x5b0] sm:$0xff] }
 0x56d   :  { %6200 = vmatprep.subr.bf16.mxu0 %v6199_v11  ;;  %v3237_v11 = vld [vmem:[%s11401_s13 + $0x338] sm:$0xff]  ;;  %v6219_v14 = vpack.c.bf16 %v3270_v4, %v3265_v30  ;;  %v6365_v35 = vpack.c.bf16 %v3231_v9, %v3226_v10  ;;  %v3286_v30 = vld [vmem:[%s11401_s13 + $0x4c0] sm:$0xff]  ;;  %v3291_v4 = vld [vmem:[%s11401_s13 + $0x4e8] sm:$0xff] }
 0x56e   :  { %v6367_v20 = vpack.c.bf16 %v3242_v13, %v3237_v11  ;;  %v3297_v10 = vld [vmem:[%s11401_s13 + $0x518] sm:$0xff]  ;;  %v3302_v11 = vld [vmem:[%s11401_s13 + $0x540] sm:$0xff] }
 0x56f   :  { %6346 = vmatpush1.bf16.msra.mxu1 %v6345_v17  ;;  %v3269_v17 = vld [vmem:[%s11401_s13 + $0x438] sm:$0xff]  ;;  %v6391_v13 = vpack.c.bf16 %v3302_v11, %v3297_v10  ;;  %v3326_v10 = vld [vmem:[%s11401_s13 + $0x600] sm:$0xff]  ;;  %v3335_v11 = vld [vmem:[%s11401_s13 + $0x648] sm:$0xff] }
 0x570   :  { %6348 = vmatprep.subr.bf16.mxu1 %v6347_v18  ;;  %6202 = vmatpush1.bf16.msra.mxu0 %v6201_v50  ;;  %v3275_v18 = vld [vmem:[%s11401_s13 + $0x468] sm:$0xff]  ;;  %v3236_v50 = vld [vmem:[%s11401_s13 + $0x330] sm:$0xff]  ;;  %v6221_v25 = vpack.c.bf16 %v3269_v17, %v3264_v16  ;;  %v3325_v60 = vld [vmem:[%s11401_s13 + $0x5f8] sm:$0xff] }
 0x571   :  { %6204 = vmatprep.subr.bf16.mxu0 %v6203_v22  ;;  %v3247_v22 = vld [vmem:[%s11401_s13 + $0x388] sm:$0xff]  ;;  %v6223_v26 = vpack.c.bf16 %v3280_v19, %v3275_v18 }
 0x572   :  { %v6371_v34 = vpack.c.bf16 %v3252_v63, %v3247_v22  ;;  %v3296_v63 = vld [vmem:[%s11401_s13 + $0x510] sm:$0xff] }
 0x573   :  { %6350 = vmatpush1.bf16.msra.mxu1 %v6349_v32  ;;  %v3279_v32 = vld [vmem:[%s11401_s13 + $0x488] sm:$0xff] }
 0x574   :  { %6352 = vmatprep.subr.bf16.mxu1 %v6351_v33  ;;  %6206 = vmatpush1.bf16.msra.mxu0 %v6205_v24  ;;  %v6369_v33 = vpack.c.bf16 %v3241_v21, %v3236_v50  ;;  %v6225_v24 = vpack.c.bf16 %v3279_v32, %v3274_v27  ;;  %v3305_v32 = vld [vmem:[%s11401_s13 + $0x558] sm:$0xff] }
 0x575   :  { %6208 = vmatprep.subr.bf16.mxu0 %v6207_v39  ;;  %v3262_v39 = vld [vmem:[%s11401_s13 + $0x400] sm:$0xff] }
 0x576   :  { %v6375_v41 = vpack.c.bf16 %v3262_v39, %v3257_v38 }
 0x577   :  { %6354 = vmatpush1.bf16.msra.mxu1 %v6353_v6  ;;  %v3267_v6 = vld [vmem:[%s11401_s13 + $0x428] sm:$0xff] }
 0x578   :  { %6356 = vmatprep.subr.bf16.mxu1 %v6355_v45  ;;  %6210 = vmatpush1.bf16.msra.mxu0 %v6209_v58  ;;  %v3272_v45 = vld [vmem:[%s11401_s13 + $0x450] sm:$0xff]  ;;  %v3271_v58 = vld [vmem:[%s11401_s13 + $0x448] sm:$0xff] }
 0x579   :  { %6212 = vmatprep.subr.bf16.mxu0 %v6211_v52  ;;  %v6379_v48 = vpack.c.bf16 %v3272_v45, %v3267_v6  ;;  %v3282_v52 = vld [vmem:[%s11401_s13 + $0x4a0] sm:$0xff]  ;;  %v6381_v54 = vpack.c.bf16 %v3271_v58, %v3266_v49  ;;  %v3311_v6 = vld [vmem:[%s11401_s13 + $0x588] sm:$0xff]  ;;  %v3320_v49 = vld [vmem:[%s11401_s13 + $0x5d0] sm:$0xff] }
 0x57a   :  { %v6383_v15 = vpack.c.bf16 %v3282_v52, %v3277_v51  ;;  %v3315_v45 = vld [vmem:[%s11401_s13 + $0x5a8] sm:$0xff]  ;;  %v3317_v58 = vld [vmem:[%s11401_s13 + $0x5b8] sm:$0xff]  ;;  %v3322_v51 = vld [vmem:[%s11401_s13 + $0x5e0] sm:$0xff] }
 0x57b   :  { %6358 = vmatpush1.bf16.msra.mxu1 %v6357_v47  ;;  %v3285_v47 = vld [vmem:[%s11401_s13 + $0x4b8] sm:$0xff] }
 0x57c   :  { %6360 = vmatprep.subr.bf16.mxu1 %v6359_v28  ;;  %6214 = vmatpush1.bf16.msra.mxu0 %v6213_v61  ;;  %v3290_v28 = vld [vmem:[%s11401_s13 + $0x4e0] sm:$0xff]  ;;  %v3284_v61 = vld [vmem:[%s11401_s13 + $0x4b0] sm:$0xff] }
 0x57d   :  { %6216 = vmatprep.subr.bf16.mxu0 %v6215_v2  ;;  %v6227_v59 = vpack.c.bf16 %v3290_v28, %v3285_v47  ;;  %v6385_v2 = vpack.c.bf16 %v3281_v56, %v3276_v55  ;;  %v6229_v3 = vpack.c.bf16 %v3289_v0, %v3284_v61  ;;  %v3314_v55 = vld [vmem:[%s11401_s13 + $0x5a0] sm:$0xff]  ;;  %v3319_v56 = vld [vmem:[%s11401_s13 + $0x5c8] sm:$0xff]  ;;  %v6239_v47 = vpack.c.bf16 %v3320_v49, %v3315_v45 }
 0x57e   :  { %v6399_v28 = vpack.c.bf16 %v3322_v51, %v3317_v58  ;;  %v3330_v61 = vld [vmem:[%s11401_s13 + $0x620] sm:$0xff]  ;;  %v3327_v0 = vld [vmem:[%s11401_s13 + $0x608] sm:$0xff] }
 0x57f   :  { %6362 = vmatpush1.bf16.msra.mxu1 %v6361_v62  ;;  %v3295_v62 = vld [vmem:[%s11401_s13 + $0x508] sm:$0xff]  ;;  %v3362_v49 = vld [vmem:[%s11401_s13 + $0x720] sm:$0xff] }
 0x580   :  { %6364 = vmatprep.subr.bf16.mxu1 %v6363_v8  ;;  %6218 = vmatpush1.bf16.msra.mxu0 %v6217_v12  ;;  %v3300_v8 = vld [vmem:[%s11401_s13 + $0x530] sm:$0xff]  ;;  %v6389_v12 = vpack.c.bf16 %v3291_v4, %v3286_v30  ;;  %v3329_v4 = vld [vmem:[%s11401_s13 + $0x618] sm:$0xff]  ;;  %v3355_v45 = vld [vmem:[%s11401_s13 + $0x6e8] sm:$0xff] }
 0x581   :  { %6220 = vmatprep.subr.bf16.mxu0 %v6219_v14  ;;  %v6231_v9 = vpack.c.bf16 %v3300_v8, %v3295_v62  ;;  %v10253_v14 = vld [vmem:[%s11400_s12] sm:$0x1f]  ;;  %v3324_v30 = vld [vmem:[%s11401_s13 + $0x5f0] sm:$0xff]  ;;  %v6243_v62 = vpack.c.bf16 %v3330_v61, %v3325_v60  ;;  %v3367_v60 = vld [vmem:[%s11401_s13 + $0x748] sm:$0xff] }
 0x582   :  { %v2680_v16 = vrot.slane %v10253_v14, %v7393_v29  ;;  %v2684_v17 = vrot.slane %v10253_v14, %v7401_v31  ;;  %v2692_v18 = vrot.slane %v10253_v14, %v7423_v42  ;;  %v3372_v61 = vld [vmem:[%s11401_s13 + $0x770] sm:$0xff] }
 0x583   :  { %6366 = vmatpush1.bf16.msra.mxu1 %v6365_v35 }
 0x584   :  { %6368 = vmatprep.subr.bf16.mxu1 %v6367_v20  ;;  %6222 = vmatpush1.bf16.msra.mxu0 %v6221_v25  ;;  %v3294_v20 = vld [vmem:[%s11401_s13 + $0x500] sm:$0xff]  ;;  %v3299_v25 = vld [vmem:[%s11401_s13 + $0x528] sm:$0xff] }
 0x585   :  { %6224 = vmatprep.subr.bf16.mxu0 %v6223_v26  ;;  %v3301_v26 = vld [vmem:[%s11401_s13 + $0x538] sm:$0xff]  ;;  %v6233_v38 = vpack.c.bf16 %v3299_v25, %v3294_v20  ;;  %v3339_v20 = vld [vmem:[%s11401_s13 + $0x668] sm:$0xff]  ;;  %v3336_v25 = vld [vmem:[%s11401_s13 + $0x650] sm:$0xff] }
 0x586   :  { %v6393_v39 = vpack.c.bf16 %v3301_v26, %v3296_v63  ;;  %v3341_v63 = vld [vmem:[%s11401_s13 + $0x678] sm:$0xff] }
 0x587   :  { %6370 = vmatpush1.bf16.msra.mxu1 %v6369_v33  ;;  %v3345_v26 = vld [vmem:[%s11401_s13 + $0x698] sm:$0xff] }
 0x588   :  { %6372 = vmatprep.subr.bf16.mxu1 %v6371_v34  ;;  %6226 = vmatpush1.bf16.msra.mxu0 %v6225_v24  ;;  %v3310_v34 = vld [vmem:[%s11401_s13 + $0x580] sm:$0xff] }
 0x589   :  { %6228 = vmatprep.subr.bf16.mxu0 %v6227_v59  ;;  %v3321_v59 = vld [vmem:[%s11401_s13 + $0x5d8] sm:$0xff] }
 0x58b   :  { %6374 = vmatpush1.bf16.msra.mxu1 %v6373_v40  ;;  %v3304_v40 = vld [vmem:[%s11401_s13 + $0x550] sm:$0xff] }
 0x58c   :  { %6376 = vmatprep.subr.bf16.mxu1 %v6375_v41  ;;  %6230 = vmatpush1.bf16.msra.mxu0 %v6229_v3  ;;  %v3309_v41 = vld [vmem:[%s11401_s13 + $0x578] sm:$0xff]  ;;  %v6241_v3 = vpack.c.bf16 %v3319_v56, %v3314_v55 }
 0x58d   :  { %6232 = vmatprep.subr.bf16.mxu0 %v6231_v9  ;;  %v3331_v9 = vld [vmem:[%s11401_s13 + $0x628] sm:$0xff] }
 0x58f   :  { %6378 = vmatpush1.bf16.msra.mxu1 %v6377_v23  ;;  %v6235_v23 = vpack.c.bf16 %v3310_v34, %v3305_v32  ;;  %v3350_v32 = vld [vmem:[%s11401_s13 + $0x6c0] sm:$0xff]  ;;  %v3352_v34 = vld [vmem:[%s11401_s13 + $0x6d0] sm:$0xff] }
 0x590   :  { %6380 = vmatprep.subr.bf16.mxu1 %v6379_v48  ;;  %v6395_v48 = vpack.c.bf16 %v3312_v37, %v3307_v36  ;;  %v6409_v37 = vpack.c.bf16 %v3341_v63, %v3336_v25  ;;  %v3376_v63 = vld [vmem:[%s11401_s13 + $0x790] sm:$0xff] }
 0x593   :  { %6382 = vmatpush1.bf16.msra.mxu1 %v6381_v54  ;;  %v6237_v54 = vpack.c.bf16 %v3309_v41, %v3304_v40  ;;  %v6251_v40 = vpack.c.bf16 %v3350_v32, %v3345_v26  ;;  %v3381_v26 = vld [vmem:[%s11401_s13 + $0x7b8] sm:$0xff] }
 0x594   :  { %6384 = vmatprep.subr.bf16.mxu1 %v6383_v15  ;;  %v6397_v15 = vpack.c.bf16 %v3311_v6, %v3306_v44  ;;  %v3346_v44 = vld [vmem:[%s11401_s13 + $0x6a0] sm:$0xff]  ;;  %v3351_v6 = vld [vmem:[%s11401_s13 + $0x6c8] sm:$0xff] }
 0x595   :  { %v6413_v51 = vpack.c.bf16 %v3351_v6, %v3346_v44 }
 0x597   :  { %6386 = vmatpush1.bf16.msra.mxu1 %v6385_v2  ;;  %v3332_v2 = vld [vmem:[%s11401_s13 + $0x630] sm:$0xff] }
 0x598   :  { %6388 = vmatprep.subr.bf16.mxu1 %v6387_v5  ;;  %v6401_v5 = vpack.c.bf16 %v3321_v59, %v3316_v57  ;;  %v6403_v8 = vpack.c.bf16 %v3332_v2, %v3327_v0  ;;  %v3365_v57 = vld [vmem:[%s11401_s13 + $0x738] sm:$0xff]  ;;  %v3370_v59 = vld [vmem:[%s11401_s13 + $0x760] sm:$0xff] }
 0x59b   :  { %6390 = vmatpush1.bf16.msra.mxu1 %v6389_v12  ;;  %v3340_v12 = vld [vmem:[%s11401_s13 + $0x670] sm:$0xff] }
 0x59c   :  { %6392 = vmatprep.subr.bf16.mxu1 %v6391_v13  ;;  %v3337_v13 = vld [vmem:[%s11401_s13 + $0x658] sm:$0xff] }
 0x611   :  { %v2842_v19 = vpop.f32.mrb[20].mxu1  ;;  %v10261_v35 = vpop.f32.mrb[12].mxu0 }
 0x612   :  { %v6666_v50 = vadd.f32 %v2842_v19, %v2680_v16  ;;  %v2844_v21 = vpop.f32.mrb[21].mxu1  ;;  %v2986_v22 = vpop.f32.mrb[13].mxu0  ;;  %v3342_v16 = vld [vmem:[%s11401_s13 + $0x680] sm:$0xff] }
 0x613   :  { %v6667_v27 = vadd.f32 %v2844_v21, %v2684_v17  ;;  %v6669_v33 = vadd.f32 %v2986_v22, %v2692_v18  ;;  %v6245_v17 = vpack.c.bf16 %v3329_v4, %v3324_v30  ;;  %v6405_v18 = vpack.c.bf16 %v3331_v9, %v3326_v10  ;;  %v3334_v19 = vld [vmem:[%s11401_s13 + $0x640] sm:$0xff]  ;;  %v3375_v10 = vld [vmem:[%s11401_s13 + $0x788] sm:$0xff]  ;;  %v3380_v9 = vld [vmem:[%s11401_s13 + $0x7b0] sm:$0xff] }
 0x614   :  { %v10295_v43 = vmax.f32 %v6666_v50, 0.0  ;;  %v6247_v21 = vpack.c.bf16 %v3340_v12, %v3335_v11  ;;  %v6407_v22 = vpack.c.bf16 %v3342_v16, %v3337_v13  ;;  %v6249_v36 = vpack.c.bf16 %v3339_v20, %v3334_v19  ;;  %v3377_v11 = vld [vmem:[%s11401_s13 + $0x798] sm:$0xff]  ;;  %v3382_v12 = vld [vmem:[%s11401_s13 + $0x7c0] sm:$0xff]  ;;  %v3379_v20 = vld [vmem:[%s11401_s13 + $0x7a8] sm:$0xff] }
 0x615   :  { %v10287_v24 = vmax.f32 %v6667_v27, 0.0  ;;  %v10317_v52 = vmax.f32 %v6669_v33, 0.0  ;;  %v3347_v33 = vld [vmem:[%s11401_s13 + $0x6a8] sm:$0xff]  ;;  %v6259_v30 = vpack.c.bf16 %v3370_v59, %v3365_v57  ;;  %v6419_v4 = vpack.c.bf16 %v3372_v61, %v3367_v60  ;;  %v3374_v19 = vld [vmem:[%s11401_s13 + $0x780] sm:$0xff]  ;;  %v3396_v57 = vld [vmem:[%s11401_s13 + $0x830] sm:$0xff] }
 0x616   :  { %v6411_v41 = vpack.c.bf16 %v3352_v34, %v3347_v33  ;;  %v2696_v16 = vrot.slane %v10253_v14, %v7969_v46  ;;  %v6423_v25 = vpack.c.bf16 %v3382_v12, %v3377_v11  ;;  %v3390_v33 = vld [vmem:[%s11401_s13 + $0x800] sm:$0xff]  ;;  %v3387_v34 = vld [vmem:[%s11401_s13 + $0x7e8] sm:$0xff]  ;;  %v3401_v59 = vld [vmem:[%s11401_s13 + $0x858] sm:$0xff] }
 0x617   :  { %3625 = vmatprep.mubr.f32.mxu0 %v10287_v24  ;;  %3838 = vmatprep.mubr.f32.mxu1 %v10287_v24  ;;  %v3405_v60 = vld [vmem:[%s11401_s13 + $0x878] sm:$0xff]  ;;  %v3410_v61 = vld [vmem:[%s11401_s13 + $0x8a0] sm:$0xff]  ;;  %v3415_v11 = vld [vmem:[%s11401_s13 + $0x8c8] sm:$0xff] }
 0x618   :  { %3626 = vmatmul.mubr.f32.vlgmr.msra.gmra.mrb[16].mxu0 %v10295_v43  ;;  %3839 = vmatmul.mubr.f32.vlgmr.msra.gmra.mrb[24].mxu1 %v10295_v43  ;;  %v3420_v12 = vld [vmem:[%s11401_s13 + $0x8f0] sm:$0xff] }
 0x619   :  { %6234 = vmatpush1.bf16.msra.mxu0 %v6233_v38  ;;  %6394 = vmatpush1.bf16.msra.mxu1 %v6393_v39  ;;  %v3344_v38 = vld [vmem:[%s11401_s13 + $0x690] sm:$0xff]  ;;  %v3349_v39 = vld [vmem:[%s11401_s13 + $0x6b8] sm:$0xff] }
 0x61a   :  { %3696 = vmatprep.mubr.f32.mxu0 %v10317_v52  ;;  %3909 = vmatprep.mubr.f32.mxu1 %v10317_v52  ;;  %v6253_v58 = vpack.c.bf16 %v3349_v39, %v3344_v38  ;;  %v6265_v38 = vpack.c.bf16 %v3379_v20, %v3374_v19  ;;  %v6425_v39 = vpack.c.bf16 %v3381_v26, %v3376_v63  ;;  %v3414_v19 = vld [vmem:[%s11401_s13 + $0x8c0] sm:$0xff]  ;;  %v3419_v20 = vld [vmem:[%s11401_s13 + $0x8e8] sm:$0xff]  ;;  %v3421_v63 = vld [vmem:[%s11401_s13 + $0x8f8] sm:$0xff] }
 0x61b   :  { %6236 = vmatprep.subr.bf16.mxu0 %v6235_v23  ;;  %6396 = vmatprep.subr.bf16.mxu1 %v6395_v48  ;;  %v3360_v23 = vld [vmem:[%s11401_s13 + $0x710] sm:$0xff]  ;;  %v3357_v48 = vld [vmem:[%s11401_s13 + $0x6f8] sm:$0xff] }
 0x61c   :  { %v6255_v55 = vpack.c.bf16 %v3360_v23, %v3355_v45  ;;  %v6415_v56 = vpack.c.bf16 %v3362_v49, %v3357_v48  ;;  %v3386_v45 = vld [vmem:[%s11401_s13 + $0x7e0] sm:$0xff]  ;;  %v3391_v23 = vld [vmem:[%s11401_s13 + $0x808] sm:$0xff]  ;;  %v3425_v26 = vld [vmem:[%s11401_s13 + $0x918] sm:$0xff] }
 0x61d   :  { %6238 = vmatpush1.bf16.msra.mxu0 %v6237_v54  ;;  %6398 = vmatpush1.bf16.msra.mxu1 %v6397_v15  ;;  %v3354_v54 = vld [vmem:[%s11401_s13 + $0x6e0] sm:$0xff]  ;;  %v3359_v15 = vld [vmem:[%s11401_s13 + $0x708] sm:$0xff] }
 0x61e   :  { %6240 = vmatprep.subr.bf16.mxu0 %v6239_v47  ;;  %6400 = vmatprep.subr.bf16.mxu1 %v6399_v28  ;;  %v3356_v47 = vld [vmem:[%s11401_s13 + $0x6f0] sm:$0xff]  ;;  %v3361_v28 = vld [vmem:[%s11401_s13 + $0x718] sm:$0xff]  ;;  %v6257_v0 = vpack.c.bf16 %v3359_v15, %v3354_v54  ;;  %v3395_v48 = vld [vmem:[%s11401_s13 + $0x828] sm:$0xff] }
 0x61f   :  { %v6417_v2 = vpack.c.bf16 %v3361_v28, %v3356_v47  ;;  %v3402_v54 = vld [vmem:[%s11401_s13 + $0x860] sm:$0xff] }
 0x621   :  { %6242 = vmatpush1.bf16.msra.mxu0 %v6241_v3  ;;  %6402 = vmatpush1.bf16.msra.mxu1 %v6401_v5  ;;  %v3364_v3 = vld [vmem:[%s11401_s13 + $0x730] sm:$0xff]  ;;  %v3369_v5 = vld [vmem:[%s11401_s13 + $0x758] sm:$0xff] }
 0x622   :  { %v10377_v50 = vpop.f32.mrb[14].mxu0  ;;  %6244 = vmatprep.subr.bf16.mxu0 %v6243_v62  ;;  %6404 = vmatprep.subr.bf16.mxu1 %v6403_v8  ;;  %v3366_v62 = vld [vmem:[%s11401_s13 + $0x740] sm:$0xff]  ;;  %v3371_v8 = vld [vmem:[%s11401_s13 + $0x768] sm:$0xff] }
 0x623   :  { %v5127_v27 = vpop.f32.mrb[15].mxu0 }
 0x624   :  { %v3385_v27 = vld [vmem:[%s11401_s13 + $0x7d8] sm:$0xff] }
 0x625   :  { %6246 = vmatpush1.bf16.msra.mxu0 %v6245_v17  ;;  %6406 = vmatpush1.bf16.msra.mxu1 %v6405_v18  ;;  %v6261_v17 = vpack.c.bf16 %v3369_v5, %v3364_v3  ;;  %v6421_v18 = vpack.c.bf16 %v3371_v8, %v3366_v62  ;;  %v6267_v44 = vpack.c.bf16 %v3390_v33, %v3385_v27  ;;  %v3430_v27 = vld [vmem:[%s11401_s13 + $0x940] sm:$0xff]  ;;  %v3432_v33 = vld [vmem:[%s11401_s13 + $0x950] sm:$0xff] }
 0x626   :  { %6248 = vmatprep.subr.bf16.mxu0 %v6247_v21  ;;  %6408 = vmatprep.subr.bf16.mxu1 %v6407_v22  ;;  %v6263_v22 = vpack.c.bf16 %v3380_v9, %v3375_v10  ;;  %v6433_v5 = vpack.c.bf16 %v3401_v59, %v3396_v57  ;;  %v6275_v62 = vpack.c.bf16 %v3410_v61, %v3405_v60  ;;  %v3406_v10 = vld [vmem:[%s11401_s13 + $0x880] sm:$0xff]  ;;  %v3411_v9 = vld [vmem:[%s11401_s13 + $0x8a8] sm:$0xff]  ;;  %v3452_v60 = vld [vmem:[%s11401_s13 + $0x9f0] sm:$0xff] }
 0x627   :  { %v3450_v57 = vld [vmem:[%s11401_s13 + $0x9e0] sm:$0xff]  ;;  %v3447_v59 = vld [vmem:[%s11401_s13 + $0x9c8] sm:$0xff] }
 0x629   :  { %6250 = vmatpush1.bf16.msra.mxu0 %v6249_v36  ;;  %6410 = vmatpush1.bf16.msra.mxu1 %v6409_v37  ;;  %v3392_v36 = vld [vmem:[%s11401_s13 + $0x810] sm:$0xff] }
 0x62a   :  { %6252 = vmatprep.subr.bf16.mxu0 %v6251_v40  ;;  %6412 = vmatprep.subr.bf16.mxu1 %v6411_v41  ;;  %v3384_v40 = vld [vmem:[%s11401_s13 + $0x7d0] sm:$0xff]  ;;  %v3389_v41 = vld [vmem:[%s11401_s13 + $0x7f8] sm:$0xff]  ;;  %v6427_v6 = vpack.c.bf16 %v3392_v36, %v3387_v34  ;;  %v6281_v34 = vpack.c.bf16 %v3419_v20, %v3414_v19 }
 0x62b   :  { %v6269_v15 = vpack.c.bf16 %v3389_v41, %v3384_v40  ;;  %v3426_v41 = vld [vmem:[%s11401_s13 + $0x920] sm:$0xff] }
 0x62d   :  { %6254 = vmatpush1.bf16.msra.mxu0 %v6253_v58  ;;  %6414 = vmatpush1.bf16.msra.mxu1 %v6413_v51  ;;  %v3400_v58 = vld [vmem:[%s11401_s13 + $0x850] sm:$0xff]  ;;  %v3397_v51 = vld [vmem:[%s11401_s13 + $0x838] sm:$0xff] }
 0x62e   :  { %6256 = vmatprep.subr.bf16.mxu0 %v6255_v55  ;;  %6416 = vmatprep.subr.bf16.mxu1 %v6415_v56  ;;  %v6429_v55 = vpack.c.bf16 %v3391_v23, %v3386_v45  ;;  %v3399_v56 = vld [vmem:[%s11401_s13 + $0x848] sm:$0xff]  ;;  %v6271_v47 = vpack.c.bf16 %v3400_v58, %v3395_v48  ;;  %v6431_v28 = vpack.c.bf16 %v3402_v54, %v3397_v51  ;;  %v3440_v45 = vld [vmem:[%s11401_s13 + $0x990] sm:$0xff]  ;;  %v3437_v23 = vld [vmem:[%s11401_s13 + $0x978] sm:$0xff] }
 0x62f   :  { %v3442_v48 = vld [vmem:[%s11401_s13 + $0x9a0] sm:$0xff] }
 0x630   :  { %v3434_v54 = vld [vmem:[%s11401_s13 + $0x960] sm:$0xff] }
 0x631   :  { %6258 = vmatpush1.bf16.msra.mxu0 %v6257_v0  ;;  %6418 = vmatpush1.bf16.msra.mxu1 %v6417_v2  ;;  %v4802_v13 = vpop.f32.mrb[22].mxu1  ;;  %v3407_v0 = vld [vmem:[%s11401_s13 + $0x888] sm:$0xff]  ;;  %v3412_v2 = vld [vmem:[%s11401_s13 + $0x8b0] sm:$0xff] }
 0x632   :  { %v4803_v21 = vpop.f32.mrb[23].mxu1  ;;  %6260 = vmatprep.subr.bf16.mxu0 %v6259_v30  ;;  %6420 = vmatprep.subr.bf16.mxu1 %v6419_v4  ;;  %v3404_v30 = vld [vmem:[%s11401_s13 + $0x870] sm:$0xff]  ;;  %v3409_v4 = vld [vmem:[%s11401_s13 + $0x898] sm:$0xff]  ;;  %v6435_v8 = vpack.c.bf16 %v3412_v2, %v3407_v0 }
 0x633   :  { %v4804_v32 = vadd.f32 %v4803_v21, %v4802_v13  ;;  %v3417_v13 = vld [vmem:[%s11401_s13 + $0x8d8] sm:$0xff]  ;;  %v6279_v21 = vpack.c.bf16 %v3420_v12, %v3415_v11  ;;  %v3444_v2 = vld [vmem:[%s11401_s13 + $0x9b0] sm:$0xff]  ;;  %v3462_v11 = vld [vmem:[%s11401_s13 + $0xa40] sm:$0xff] }
 0x635   :  { %v3056_v37 = vadd.f32 %v4804_v32, %v2696_v16  ;;  %6262 = vmatpush1.bf16.msra.mxu0 %v6261_v17  ;;  %6422 = vmatpush1.bf16.msra.mxu1 %v6421_v18  ;;  %v3422_v16 = vld [vmem:[%s11401_s13 + $0x900] sm:$0xff]  ;;  %v6277_v17 = vpack.c.bf16 %v3409_v4, %v3404_v30  ;;  %v6437_v18 = vpack.c.bf16 %v3411_v9, %v3406_v10  ;;  %v3427_v32 = vld [vmem:[%s11401_s13 + $0x928] sm:$0xff]  ;;  %v3457_v9 = vld [vmem:[%s11401_s13 + $0xa18] sm:$0xff] }
 0x636   :  { %6264 = vmatprep.subr.bf16.mxu0 %v6263_v22  ;;  %6424 = vmatprep.subr.bf16.mxu1 %v6423_v25  ;;  %v6439_v22 = vpack.c.bf16 %v3422_v16, %v3417_v13  ;;  %v3416_v25 = vld [vmem:[%s11401_s13 + $0x8d0] sm:$0xff]  ;;  %v6443_v40 = vpack.c.bf16 %v3432_v33, %v3427_v32  ;;  %v6451_v4 = vpack.c.bf16 %v3452_v60, %v3447_v59  ;;  %v3455_v10 = vld [vmem:[%s11401_s13 + $0xa08] sm:$0xff]  ;;  %v3454_v16 = vld [vmem:[%s11401_s13 + $0xa00] sm:$0xff] }
 0x637   :  { %v10511_v49 = vadd.f32 %v10377_v50, %v3056_v37  ;;  %v3394_v50 = vld [vmem:[%s11401_s13 + $0x820] sm:$0xff]  ;;  %v6441_v36 = vpack.c.bf16 %v3421_v63, %v3416_v25  ;;  %v3424_v37 = vld [vmem:[%s11401_s13 + $0x910] sm:$0xff]  ;;  %v6455_v20 = vpack.c.bf16 %v3462_v11, %v3457_v9  ;;  %v3465_v25 = vld [vmem:[%s11401_s13 + $0xa58] sm:$0xff] }
 0x638   :  { %v6273_v3 = vpack.c.bf16 %v3399_v56, %v3394_v50  ;;  %v6447_v50 = vpack.c.bf16 %v3442_v48, %v3437_v23  ;;  %v3436_v56 = vld [vmem:[%s11401_s13 + $0x970] sm:$0xff]  ;;  %v3467_v63 = vld [vmem:[%s11401_s13 + $0xa68] sm:$0xff]  ;;  %v3494_v11 = vld [vmem:[%s11401_s13 + $0xb40] sm:$0xff] }
 0x639   :  { %6266 = vmatpush1.bf16.msra.mxu0 %v6265_v38  ;;  %6426 = vmatpush1.bf16.msra.mxu1 %v6425_v39  ;;  %v3429_v38 = vld [vmem:[%s11401_s13 + $0x938] sm:$0xff]  ;;  %v6283_v39 = vpack.c.bf16 %v3430_v27, %v3425_v26  ;;  %v3472_v26 = vld [vmem:[%s11401_s13 + $0xa90] sm:$0xff] }
 0x63a   :  { %6268 = vmatprep.subr.bf16.mxu0 %v6267_v44  ;;  %6428 = vmatprep.subr.bf16.mxu1 %v6427_v6  ;;  %v3431_v44 = vld [vmem:[%s11401_s13 + $0x948] sm:$0xff]  ;;  %v6285_v58 = vpack.c.bf16 %v3429_v38, %v3424_v37  ;;  %v3464_v33 = vld [vmem:[%s11401_s13 + $0xa50] sm:$0xff]  ;;  %v6459_v38 = vpack.c.bf16 %v3472_v26, %v3467_v63  ;;  %v3509_v26 = vld [vmem:[%s11401_s13 + $0xbb8] sm:$0xff] }
 0x63b   :  { %v3435_v6 = vld [vmem:[%s11401_s13 + $0x968] sm:$0xff]  ;;  %v6445_v51 = vpack.c.bf16 %v3431_v44, %v3426_v41  ;;  %v3480_v44 = vld [vmem:[%s11401_s13 + $0xad0] sm:$0xff] }
 0x63c   :  { %v3475_v41 = vld [vmem:[%s11401_s13 + $0xaa8] sm:$0xff]  ;;  %v3504_v63 = vld [vmem:[%s11401_s13 + $0xb90] sm:$0xff] }
 0x63d   :  { %6270 = vmatpush1.bf16.msra.mxu0 %v6269_v15  ;;  %6430 = vmatpush1.bf16.msra.mxu1 %v6429_v55  ;;  %v3439_v15 = vld [vmem:[%s11401_s13 + $0x988] sm:$0xff]  ;;  %v6287_v55 = vpack.c.bf16 %v3440_v45, %v3435_v6  ;;  %v3477_v6 = vld [vmem:[%s11401_s13 + $0xab8] sm:$0xff]  ;;  %v3482_v45 = vld [vmem:[%s11401_s13 + $0xae0] sm:$0xff] }
 0x63e   :  { %6272 = vmatprep.subr.bf16.mxu0 %v6271_v47  ;;  %6432 = vmatprep.subr.bf16.mxu1 %v6431_v28  ;;  %v3441_v47 = vld [vmem:[%s11401_s13 + $0x998] sm:$0xff]  ;;  %v6289_v61 = vpack.c.bf16 %v3439_v15, %v3434_v54  ;;  %v6303_v54 = vpack.c.bf16 %v3480_v44, %v3475_v41  ;;  %v6463_v15 = vpack.c.bf16 %v3482_v45, %v3477_v6  ;;  %v3514_v6 = vld [vmem:[%s11401_s13 + $0xbe0] sm:$0xff]  ;;  %v3519_v45 = vld [vmem:[%s11401_s13 + $0xc08] sm:$0xff] }
 0x63f   :  { %v3445_v28 = vld [vmem:[%s11401_s13 + $0x9b8] sm:$0xff]  ;;  %v6449_v0 = vpack.c.bf16 %v3441_v47, %v3436_v56  ;;  %v3490_v47 = vld [vmem:[%s11401_s13 + $0xb20] sm:$0xff]  ;;  %v6317_v41 = vpack.c.bf16 %v3509_v26, %v3504_v63 }
 0x640   :  { %v6291_v30 = vpack.c.bf16 %v3450_v57, %v3445_v28  ;;  %v3485_v56 = vld [vmem:[%s11401_s13 + $0xaf8] sm:$0xff]  ;;  %v3487_v28 = vld [vmem:[%s11401_s13 + $0xb08] sm:$0xff]  ;;  %v3492_v57 = vld [vmem:[%s11401_s13 + $0xb30] sm:$0xff] }
 0x641   :  { %6274 = vmatpush1.bf16.msra.mxu0 %v6273_v3  ;;  %6434 = vmatpush1.bf16.msra.mxu1 %v6433_v5  ;;  %v3449_v3 = vld [vmem:[%s11401_s13 + $0x9d8] sm:$0xff]  ;;  %v2688_v5 = vrot.slane %v10253_v14, %v7765_v53  ;;  %v3460_v14 = vld [vmem:[%s11401_s13 + $0xa30] sm:$0xff] }
 0x642   :  { %6276 = vmatprep.subr.bf16.mxu0 %v6275_v62  ;;  %6436 = vmatprep.subr.bf16.mxu1 %v6435_v8  ;;  %v3446_v62 = vld [vmem:[%s11401_s13 + $0x9c0] sm:$0xff]  ;;  %v3451_v8 = vld [vmem:[%s11401_s13 + $0x9e8] sm:$0xff]  ;;  %v6293_v12 = vpack.c.bf16 %v3449_v3, %v3444_v2  ;;  %v6295_v19 = vpack.c.bf16 %v3460_v14, %v3455_v10  ;;  %v6307_v2 = vpack.c.bf16 %v3490_v47, %v3485_v56 }
 0x643   :  { %v6453_v13 = vpack.c.bf16 %v3451_v8, %v3446_v62  ;;  %v6467_v3 = vpack.c.bf16 %v3492_v57, %v3487_v28  ;;  %v3500_v62 = vld [vmem:[%s11401_s13 + $0xb70] sm:$0xff]  ;;  %v3497_v8 = vld [vmem:[%s11401_s13 + $0xb58] sm:$0xff]  ;;  %v3502_v10 = vld [vmem:[%s11401_s13 + $0xb80] sm:$0xff]  ;;  %v6321_v56 = vpack.c.bf16 %v3519_v45, %v3514_v6 }
 0x644   :  { %v3524_v28 = vld [vmem:[%s11401_s13 + $0xc30] sm:$0xff]  ;;  %v3529_v57 = vld [vmem:[%s11401_s13 + $0xc58] sm:$0xff] }
 0x645   :  { %6278 = vmatpush1.bf16.msra.mxu0 %v6277_v17  ;;  %6438 = vmatpush1.bf16.msra.mxu1 %v6437_v18  ;;  %v3459_v17 = vld [vmem:[%s11401_s13 + $0xa28] sm:$0xff]  ;;  %v6668_v18 = vadd.f32 %v10261_v35, %v2688_v5  ;;  %v3470_v35 = vld [vmem:[%s11401_s13 + $0xa80] sm:$0xff]  ;;  %v3248_v6 = vld [vmem:[%s11401_s13 + $0x390] sm:$0xff] }
 0x646   :  { %6280 = vmatprep.subr.bf16.mxu0 %v6279_v21  ;;  %6440 = vmatprep.subr.bf16.mxu1 %v6439_v22  ;;  %v3456_v21 = vld [vmem:[%s11401_s13 + $0xa10] sm:$0xff]  ;;  %v3461_v22 = vld [vmem:[%s11401_s13 + $0xa38] sm:$0xff]  ;;  %v6297_v27 = vpack.c.bf16 %v3459_v17, %v3454_v16  ;;  %v6299_v37 = vpack.c.bf16 %v3470_v35, %v3465_v25  ;;  %v3486_v5 = vld [vmem:[%s11401_s13 + $0xb00] sm:$0xff]  ;;  %v6471_v16 = vpack.c.bf16 %v3502_v10, %v3497_v8 }
 0x647   :  { %v6457_v32 = vpack.c.bf16 %v3461_v22, %v3456_v21  ;;  %v3496_v17 = vld [vmem:[%s11401_s13 + $0xb50] sm:$0xff]  ;;  %v3507_v21 = vld [vmem:[%s11401_s13 + $0xba8] sm:$0xff]  ;;  %v3253_v45 = vld [vmem:[%s11401_s13 + $0x3b8] sm:$0xff] }
 0x648   :  { %v3512_v22 = vld [vmem:[%s11401_s13 + $0xbd0] sm:$0xff] }
 0x649   :  { %6282 = vmatpush1.bf16.msra.mxu0 %v6281_v34  ;;  %6442 = vmatpush1.bf16.msra.mxu1 %v6441_v36  ;;  %v3469_v34 = vld [vmem:[%s11401_s13 + $0xa78] sm:$0xff]  ;;  %v10699_v36 = vmax.f32 %v6668_v18, 0.0 }
 0x64a   :  { %6284 = vmatprep.subr.bf16.mxu0 %v6283_v39  ;;  %6444 = vmatprep.subr.bf16.mxu1 %v6443_v40  ;;  %v3466_v39 = vld [vmem:[%s11401_s13 + $0xa60] sm:$0xff]  ;;  %v3471_v40 = vld [vmem:[%s11401_s13 + $0xa88] sm:$0xff]  ;;  %v6301_v23 = vpack.c.bf16 %v3469_v34, %v3464_v33  ;;  %v3501_v18 = vld [vmem:[%s11401_s13 + $0xb78] sm:$0xff] }
 0x64b   :  { %v6461_v48 = vpack.c.bf16 %v3471_v40, %v3466_v39  ;;  %v6473_v35 = vpack.c.bf16 %v3501_v18, %v3496_v17  ;;  %v3506_v33 = vld [vmem:[%s11401_s13 + $0xba0] sm:$0xff]  ;;  %v3511_v34 = vld [vmem:[%s11401_s13 + $0xbc8] sm:$0xff]  ;;  %v3517_v39 = vld [vmem:[%s11401_s13 + $0xbf8] sm:$0xff] }
 0x64c   :  { %v3522_v40 = vld [vmem:[%s11401_s13 + $0xc20] sm:$0xff]  ;;  %v6477_v44 = vpack.c.bf16 %v3511_v34, %v3506_v33  ;;  %v3388_v17 = vld [vmem:[%s11401_s13 + $0x7f0] sm:$0xff]  ;;  %v3393_v18 = vld [vmem:[%s11401_s13 + $0x818] sm:$0xff] }
 0x64d   :  { %6286 = vmatpush1.bf16.msra.mxu0 %v6285_v58  ;;  %6446 = vmatpush1.bf16.msra.mxu1 %v6445_v51  ;;  %v3474_v58 = vld [vmem:[%s11401_s13 + $0xaa0] sm:$0xff]  ;;  %v3479_v51 = vld [vmem:[%s11401_s13 + $0xac8] sm:$0xff]  ;;  %v6523_v26 = vpack.c.bf16 %v3393_v18, %v3388_v17  ;;  %v3193_v17 = vld [vmem:[%s11401_s13 + $0x1d8] sm:$0xff] }
 0x64e   :  { %6288 = vmatprep.subr.bf16.mxu0 %v6287_v55  ;;  %6448 = vmatprep.subr.bf16.mxu1 %v6447_v50  ;;  %v3476_v55 = vld [vmem:[%s11401_s13 + $0xab0] sm:$0xff]  ;;  %v3481_v50 = vld [vmem:[%s11401_s13 + $0xad8] sm:$0xff]  ;;  %v6305_v59 = vpack.c.bf16 %v3479_v51, %v3474_v58  ;;  %v3398_v33 = vld [vmem:[%s11401_s13 + $0x840] sm:$0xff] }
 0x64f   :  { %v6465_v60 = vpack.c.bf16 %v3481_v50, %v3476_v55  ;;  %v3516_v58 = vld [vmem:[%s11401_s13 + $0xbf0] sm:$0xff]  ;;  %v3521_v51 = vld [vmem:[%s11401_s13 + $0xc18] sm:$0xff]  ;;  %v3527_v55 = vld [vmem:[%s11401_s13 + $0xc48] sm:$0xff] }
 0x650   :  { %v3532_v50 = vld [vmem:[%s11401_s13 + $0xc70] sm:$0xff]  ;;  %v6481_v47 = vpack.c.bf16 %v3521_v51, %v3516_v58  ;;  %v3403_v34 = vld [vmem:[%s11401_s13 + $0x868] sm:$0xff] }
 0x651   :  { %6290 = vmatpush1.bf16.msra.mxu0 %v6289_v61  ;;  %6450 = vmatpush1.bf16.msra.mxu1 %v6449_v0  ;;  %v3484_v61 = vld [vmem:[%s11401_s13 + $0xaf0] sm:$0xff]  ;;  %v3489_v0 = vld [vmem:[%s11401_s13 + $0xb18] sm:$0xff] }
 0x652   :  { %6292 = vmatprep.subr.bf16.mxu0 %v6291_v30  ;;  %6452 = vmatprep.subr.bf16.mxu1 %v6451_v4  ;;  %v3491_v30 = vld [vmem:[%s11401_s13 + $0xb28] sm:$0xff]  ;;  %v6309_v14 = vpack.c.bf16 %v3489_v0, %v3484_v61  ;;  %v3526_v61 = vld [vmem:[%s11401_s13 + $0xc40] sm:$0xff]  ;;  %v3348_v18 = vld [vmem:[%s11401_s13 + $0x6b0] sm:$0xff] }
 0x653   :  { %v3495_v4 = vld [vmem:[%s11401_s13 + $0xb48] sm:$0xff]  ;;  %v6469_v9 = vpack.c.bf16 %v3491_v30, %v3486_v5  ;;  %v3378_v5 = vld [vmem:[%s11401_s13 + $0x7a0] sm:$0xff] }
 0x654   :  { %v3531_v0 = vld [vmem:[%s11401_s13 + $0xc68] sm:$0xff] }
 0x655   :  { %6294 = vmatpush1.bf16.msra.mxu0 %v6293_v12  ;;  %6454 = vmatpush1.bf16.msra.mxu1 %v6453_v13  ;;  %v3499_v12 = vld [vmem:[%s11401_s13 + $0xb68] sm:$0xff]  ;;  %v6311_v13 = vpack.c.bf16 %v3500_v62, %v3495_v4  ;;  %v6325_v4 = vpack.c.bf16 %v3529_v57, %v3524_v28  ;;  %v6485_v62 = vpack.c.bf16 %v3531_v0, %v3526_v61  ;;  %v3258_v28 = vld [vmem:[%s11401_s13 + $0x3e0] sm:$0xff] }
 0x656   :  { %6296 = vmatprep.subr.bf16.mxu0 %v6295_v19  ;;  %6456 = vmatprep.subr.bf16.mxu1 %v6455_v20  ;;  %v3505_v19 = vld [vmem:[%s11401_s13 + $0xb98] sm:$0xff]  ;;  %v3510_v20 = vld [vmem:[%s11401_s13 + $0xbc0] sm:$0xff]  ;;  %v6313_v25 = vpack.c.bf16 %v3499_v12, %v3494_v11  ;;  %v3383_v30 = vld [vmem:[%s11401_s13 + $0x7c8] sm:$0xff] }
 0x657   :  { %v6519_v10 = vpack.c.bf16 %v3383_v30, %v3378_v5  ;;  %v3298_v11 = vld [vmem:[%s11401_s13 + $0x520] sm:$0xff]  ;;  %v3303_v12 = vld [vmem:[%s11401_s13 + $0x548] sm:$0xff] }
 0x658   :  { %3697 = vmatmul.mubr.f32.vlgmr.msra.gmra.mrb[16].mxu0 %v10699_v36  ;;  %3910 = vmatmul.mubr.f32.vlgmr.msra.gmra.mrb[24].mxu1 %v10699_v36  ;;  %v3263_v57 = vld [vmem:[%s11401_s13 + $0x408] sm:$0xff]  ;;  %v3338_v30 = vld [vmem:[%s11401_s13 + $0x660] sm:$0xff] }
 0x659   :  { %6298 = vmatpush1.bf16.msra.mxu0 %v6297_v27  ;;  %6458 = vmatpush1.bf16.msra.mxu1 %v6457_v32  ;;  %v6315_v27 = vpack.c.bf16 %v3510_v20, %v3505_v19  ;;  %v6475_v32 = vpack.c.bf16 %v3512_v22, %v3507_v21  ;;  %v10892_v20 = vmax.f32 %v10511_v49, 0.0  ;;  %v6521_v21 = vpack.c.bf16 %v3303_v12, %v3298_v11  ;;  %v3148_v22 = vld [vmem:[%s11401_s13 + $0x70] sm:$0xff]  ;;  %v3313_v49 = vld [vmem:[%s11401_s13 + $0x598] sm:$0xff]  ;;  %v3183_v5 = vld [vmem:[%s11401_s13 + $0x188] sm:$0xff] }
 0x65a   :  { %6300 = vmatprep.subr.bf16.mxu0 %v6299_v37  ;;  %6460 = vmatprep.subr.bf16.mxu1 %v6459_v38  ;;  %v3515_v37 = vld [vmem:[%s11401_s13 + $0xbe8] sm:$0xff]  ;;  %v3520_v38 = vld [vmem:[%s11401_s13 + $0xc10] sm:$0xff] }
 0x65b   :  { %3767 = vmatprep.mubr.f32.mxu0 %v6730_v7  ;;  %3980 = vmatprep.mubr.f32.mxu1 %v6730_v7 }
 0x65d   :  { %6302 = vmatpush1.bf16.msra.mxu0 %v6301_v23  ;;  %6462 = vmatpush1.bf16.msra.mxu1 %v6461_v48  ;;  %v6319_v23 = vpack.c.bf16 %v3520_v38, %v3515_v37  ;;  %v6479_v48 = vpack.c.bf16 %v3522_v40, %v3517_v39  ;;  %v3158_v40 = vld [vmem:[%s11401_s13 + $0xc0] sm:$0xff] }
 0x65e   :  { %6304 = vmatprep.subr.bf16.mxu0 %v6303_v54  ;;  %6464 = vmatprep.subr.bf16.mxu1 %v6463_v15  ;;  %v3525_v54 = vld [vmem:[%s11401_s13 + $0xc38] sm:$0xff]  ;;  %v3530_v15 = vld [vmem:[%s11401_s13 + $0xc60] sm:$0xff] }
 0x661   :  { %6306 = vmatpush1.bf16.msra.mxu0 %v6305_v59  ;;  %6466 = vmatpush1.bf16.msra.mxu1 %v6465_v60  ;;  %v6323_v59 = vpack.c.bf16 %v3530_v15, %v3525_v54  ;;  %v6483_v60 = vpack.c.bf16 %v3532_v50, %v3527_v55  ;;  %v6499_v54 = vpack.c.bf16 %v3253_v45, %v3248_v6  ;;  %v3168_v15 = vld [vmem:[%s11401_s13 + $0x110] sm:$0xff]  ;;  %v3173_v55 = vld [vmem:[%s11401_s13 + $0x138] sm:$0xff] }
 0x662   :  { %6308 = vmatprep.subr.bf16.mxu0 %v6307_v2  ;;  %6468 = vmatprep.subr.bf16.mxu1 %v6467_v3  ;;  %v3218_v2 = vld [vmem:[%s11401_s13 + $0x2a0] sm:$0xff]  ;;  %v3223_v3 = vld [vmem:[%s11401_s13 + $0x2c8] sm:$0xff]  ;;  %v3328_v50 = vld [vmem:[%s11401_s13 + $0x610] sm:$0xff]  ;;  %v6501_v61 = vpack.c.bf16 %v3173_v55, %v3168_v15 }
 0x663   :  { %v6487_v8 = vpack.c.bf16 %v3223_v3, %v3218_v2  ;;  %v6503_v2 = vpack.c.bf16 %v3263_v57, %v3258_v28  ;;  %v3178_v3 = vld [vmem:[%s11401_s13 + $0x160] sm:$0xff]  ;;  %v3208_v45 = vld [vmem:[%s11401_s13 + $0x250] sm:$0xff]  ;;  %v4219_v15 = vld [vmem:[%s11403_s15 + $0x88] sm:$0xff] }
 0x664   :  { %v6505_v11 = vpack.c.bf16 %v3183_v5, %v3178_v3  ;;  %v4202_v57 = vld [vmem:[%s11403_s15] sm:$0xff]  ;;  %v3473_v3 = vld [vmem:[%s11401_s13 + $0xa98] sm:$0xff] }
 0x665   :  { %6310 = vmatpush1.bf16.msra.mxu0 %v6309_v14  ;;  %6470 = vmatpush1.bf16.msra.mxu1 %v6469_v9  ;;  %v3138_v14 = vld [vmem:[%s11401_s13 + $0x20] sm:$0xff]  ;;  %v3143_v9 = vld [vmem:[%s11401_s13 + $0x48] sm:$0xff] }
 0x666   :  { %6312 = vmatprep.subr.bf16.mxu0 %v6311_v13  ;;  %6472 = vmatprep.subr.bf16.mxu1 %v6471_v16  ;;  %v3228_v13 = vld [vmem:[%s11401_s13 + $0x2f0] sm:$0xff]  ;;  %v3233_v16 = vld [vmem:[%s11401_s13 + $0x318] sm:$0xff]  ;;  %v6489_v19 = vpack.c.bf16 %v3143_v9, %v3138_v14 }
 0x667   :  { %v6491_v63 = vpack.c.bf16 %v3233_v16, %v3228_v13  ;;  %v3428_v14 = vld [vmem:[%s11401_s13 + $0x930] sm:$0xff]  ;;  %v3433_v9 = vld [vmem:[%s11401_s13 + $0x958] sm:$0xff] }
 0x668   :  { %v3188_v16 = vld [vmem:[%s11401_s13 + $0x1b0] sm:$0xff] }
 0x669   :  { %6314 = vmatpush1.bf16.msra.mxu0 %v6313_v25  ;;  %6474 = vmatpush1.bf16.msra.mxu1 %v6473_v35  ;;  %v3153_v25 = vld [vmem:[%s11401_s13 + $0x98] sm:$0xff]  ;;  %v3308_v35 = vld [vmem:[%s11401_s13 + $0x570] sm:$0xff] }
 0x66a   :  { %6316 = vmatprep.subr.bf16.mxu0 %v6315_v27  ;;  %6476 = vmatprep.subr.bf16.mxu1 %v6475_v32  ;;  %v3238_v27 = vld [vmem:[%s11401_s13 + $0x340] sm:$0xff]  ;;  %v3243_v32 = vld [vmem:[%s11401_s13 + $0x368] sm:$0xff]  ;;  %v6493_v37 = vpack.c.bf16 %v3153_v25, %v3148_v22  ;;  %v6525_v38 = vpack.c.bf16 %v3313_v49, %v3308_v35 }
 0x66b   :  { %v6495_v39 = vpack.c.bf16 %v3243_v32, %v3238_v27  ;;  %v3278_v22 = vld [vmem:[%s11401_s13 + $0x480] sm:$0xff]  ;;  %v3283_v25 = vld [vmem:[%s11401_s13 + $0x4a8] sm:$0xff] }
 0x66c   :  { %v3438_v35 = vld [vmem:[%s11401_s13 + $0x980] sm:$0xff]  ;;  %v6511_v27 = vpack.c.bf16 %v3283_v25, %v3278_v22 }
 0x66d   :  { %6318 = vmatpush1.bf16.msra.mxu0 %v6317_v41  ;;  %6478 = vmatpush1.bf16.msra.mxu1 %v6477_v44  ;;  %v3163_v41 = vld [vmem:[%s11401_s13 + $0xe8] sm:$0xff]  ;;  %v3318_v44 = vld [vmem:[%s11401_s13 + $0x5c0] sm:$0xff] }
 0x66e   :  { %6320 = vmatprep.subr.bf16.mxu0 %v6319_v23  ;;  %6480 = vmatprep.subr.bf16.mxu1 %v6479_v48  ;;  %v3408_v23 = vld [vmem:[%s11401_s13 + $0x890] sm:$0xff]  ;;  %v3413_v48 = vld [vmem:[%s11401_s13 + $0x8b8] sm:$0xff]  ;;  %v6497_v58 = vpack.c.bf16 %v3163_v41, %v3158_v40  ;;  %v3198_v32 = vld [vmem:[%s11401_s13 + $0x200] sm:$0xff] }
 0x66f   :  { %v3293_v40 = vld [vmem:[%s11401_s13 + $0x4f8] sm:$0xff]  ;;  %v3448_v41 = vld [vmem:[%s11401_s13 + $0x9d0] sm:$0xff] }
 0x671   :  { %6322 = vmatpush1.bf16.msra.mxu0 %v6321_v56  ;;  %6482 = vmatpush1.bf16.msra.mxu1 %v6481_v47  ;;  %v6531_v56 = vpack.c.bf16 %v3413_v48, %v3408_v23  ;;  %v3333_v47 = vld [vmem:[%s11401_s13 + $0x638] sm:$0xff] }
 0x672   :  { %6324 = vmatprep.subr.bf16.mxu0 %v6323_v59  ;;  %6484 = vmatprep.subr.bf16.mxu1 %v6483_v60  ;;  %v3418_v59 = vld [vmem:[%s11401_s13 + $0x8e0] sm:$0xff]  ;;  %v3423_v60 = vld [vmem:[%s11401_s13 + $0x908] sm:$0xff]  ;;  %v6533_v0 = vpack.c.bf16 %v3333_v47, %v3328_v50  ;;  %v3213_v23 = vld [vmem:[%s11401_s13 + $0x278] sm:$0xff] }
 0x673   :  { %v6517_v55 = vpack.c.bf16 %v3213_v23, %v3208_v45  ;;  %v3463_v47 = vld [vmem:[%s11401_s13 + $0xa48] sm:$0xff]  ;;  %v4212_v23 = vld [vmem:[%s11403_s15 + $0x50] sm:$0xff] }
 0x675   :  { %6326 = vmatpush1.bf16.msra.mxu0 %v6325_v4  ;;  %6486 = vmatpush1.bf16.msra.mxu1 %v6485_v62  ;;  %v6535_v4 = vpack.c.bf16 %v3423_v60, %v3418_v59  ;;  %v3343_v62 = vld [vmem:[%s11401_s13 + $0x688] sm:$0xff] }
 0x676   :  { %6488 = vmatprep.subr.bf16.mxu0 %v6487_v8  ;;  %6520 = vmatprep.subr.bf16.mxu1 %v6519_v10  ;;  %v3268_v8 = vld [vmem:[%s11401_s13 + $0x430] sm:$0xff]  ;;  %v3273_v10 = vld [vmem:[%s11401_s13 + $0x458] sm:$0xff]  ;;  %v6537_v12 = vpack.c.bf16 %v3343_v62, %v3338_v30  ;;  %v4203_v59 = vld [vmem:[%s11403_s15 + $0x8] sm:$0xff] }
 0x677   :  { %v6507_v13 = vpack.c.bf16 %v3273_v10, %v3268_v8  ;;  %v6577_v5 = vpack.c.bf16 %v4203_v59, %v4202_v57  ;;  %v4205_v62 = vld [vmem:[%s11403_s15 + $0x18] sm:$0xff]  ;;  %v4222_v10 = vld [vmem:[%s11403_s15 + $0xa0] sm:$0xff] }
 0x678   :  { %3768 = vmatmul.mubr.f32.vlgmr.msra.gmra.mrb[16].mxu0 %v10892_v20  ;;  %3981 = vmatmul.mubr.f32.vlgmr.msra.gmra.mrb[24].mxu1 %v10892_v20  ;;  %v3533_v57 = vld [vmem:[%s11401_s13 + $0xc78] sm:$0xff]  ;;  %v4250_v59 = vld [vmem:[%s11403_s15 + $0x180] sm:$0xff] }
 0x679   :  { %6490 = vmatpush3.bf16.msra.mxu0 %v6489_v19  ;;  %4051 = vmatprep.mubr.f32.mxu0 %v10287_v24  ;;  %v6527_v24 = vpack.c.bf16 %v3403_v34, %v3398_v33  ;;  %v6539_v19 = vpack.c.bf16 %v3433_v9, %v3428_v14  ;;  %v3203_v33 = vld [vmem:[%s11401_s13 + $0x228] sm:$0xff]  ;;  %v3358_v34 = vld [vmem:[%s11401_s13 + $0x700] sm:$0xff] }
 0x67a   :  { %6522 = vmatpush3.bf16.msra.mxu1 %v6521_v21  ;;  %4121 = vmatprep.mubr.f32.mxu1 %v10317_v52  ;;  %v3323_v52 = vld [vmem:[%s11401_s13 + $0x5e8] sm:$0xff]  ;;  %v3353_v21 = vld [vmem:[%s11401_s13 + $0x6d8] sm:$0xff]  ;;  %v3478_v14 = vld [vmem:[%s11401_s13 + $0xac0] sm:$0xff] }
 0x67b   :  { %6492 = vmatprep.subr.bf16.mxu0 %v6491_v63  ;;  %6524 = vmatprep.subr.bf16.mxu1 %v6523_v26  ;;  %v6529_v51 = vpack.c.bf16 %v3323_v52, %v3318_v44  ;;  %v3443_v63 = vld [vmem:[%s11401_s13 + $0x9a8] sm:$0xff]  ;;  %v6509_v26 = vpack.c.bf16 %v3193_v17, %v3188_v16  ;;  %v6541_v49 = vpack.c.bf16 %v3353_v21, %v3348_v18  ;;  %v3453_v44 = vld [vmem:[%s11401_s13 + $0x9f8] sm:$0xff]  ;;  %v4224_v17 = vld [vmem:[%s11403_s15 + $0xb0] sm:$0xff] }
 0x67c   :  { %v6547_v48 = vpack.c.bf16 %v3453_v44, %v3448_v41  ;;  %v4225_v18 = vld [vmem:[%s11403_s15 + $0xb8] sm:$0xff]  ;;  %v4228_v41 = vld [vmem:[%s11403_s15 + $0xd0] sm:$0xff] }
 0x67d   :  { %6494 = vmatpush3.bf16.msra.mxu0 %v6493_v37  ;;  %v6543_v37 = vpack.c.bf16 %v3443_v63, %v3438_v35  ;;  %v3493_v21 = vld [vmem:[%s11401_s13 + $0xb38] sm:$0xff]  ;;  %v6587_v25 = vpack.c.bf16 %v4225_v18, %v4224_v17  ;;  %v4208_v35 = vld [vmem:[%s11403_s15 + $0x30] sm:$0xff] }
 0x67e   :  { %6526 = vmatpush3.bf16.msra.mxu1 %v6525_v38  ;;  %6496 = vmatprep.subr.bf16.mxu0 %v6495_v39  ;;  %v3363_v38 = vld [vmem:[%s11401_s13 + $0x728] sm:$0xff]  ;;  %v3288_v39 = vld [vmem:[%s11401_s13 + $0x4d0] sm:$0xff]  ;;  %v4209_v63 = vld [vmem:[%s11403_s15 + $0x38] sm:$0xff] }
 0x67f   :  { %6528 = vmatprep.subr.bf16.mxu1 %v6527_v24  ;;  %v6513_v24 = vpack.c.bf16 %v3203_v33, %v3198_v32  ;;  %v6545_v52 = vpack.c.bf16 %v3363_v38, %v3358_v34  ;;  %v6515_v6 = vpack.c.bf16 %v3293_v40, %v3288_v39  ;;  %v3498_v32 = vld [vmem:[%s11401_s13 + $0xb60] sm:$0xff]  ;;  %v3503_v33 = vld [vmem:[%s11401_s13 + $0xb88] sm:$0xff]  ;;  %v6589_v34 = vpack.c.bf16 %v4209_v63, %v4208_v35  ;;  %v4229_v44 = vld [vmem:[%s11403_s15 + $0xd8] sm:$0xff] }
 0x680   :  { %v4210_v38 = vld [vmem:[%s11403_s15 + $0x40] sm:$0xff]  ;;  %v4211_v39 = vld [vmem:[%s11403_s15 + $0x48] sm:$0xff]  ;;  %v6564_v40 = vpack.c.bf16 %v3503_v33, %v3498_v32  ;;  %v6595_v45 = vpack.c.bf16 %v4229_v44, %v4228_v41  ;;  %v4240_v18 = vld [vmem:[%s11403_s15 + $0x130] sm:$0xff] }
 0x681   :  { %6498 = vmatpush3.bf16.msra.mxu0 %v6497_v58  ;;  %v3368_v58 = vld [vmem:[%s11401_s13 + $0x750] sm:$0xff]  ;;  %v4242_v63 = vld [vmem:[%s11403_s15 + $0x140] sm:$0xff]  ;;  %v4215_v44 = vld [vmem:[%s11403_s15 + $0x68] sm:$0xff] }
 0x682   :  { %6530 = vmatpush3.bf16.msra.mxu1 %v6529_v51  ;;  %6500 = vmatprep.subr.bf16.mxu0 %v6499_v54  ;;  %v3373_v51 = vld [vmem:[%s11401_s13 + $0x778] sm:$0xff]  ;;  %v4218_v54 = vld [vmem:[%s11403_s15 + $0x80] sm:$0xff] }
 0x683   :  { %6532 = vmatprep.subr.bf16.mxu1 %v6531_v56  ;;  %v6549_v50 = vpack.c.bf16 %v3373_v51, %v3368_v58  ;;  %v3458_v56 = vld [vmem:[%s11401_s13 + $0xa20] sm:$0xff]  ;;  %v6575_v28 = vpack.c.bf16 %v4219_v15, %v4218_v54  ;;  %v4231_v54 = vld [vmem:[%s11403_s15 + $0xe8] sm:$0xff] }
 0x684   :  { %v6552_v60 = vpack.c.bf16 %v3463_v47, %v3458_v56  ;;  %v4230_v51 = vld [vmem:[%s11403_s15 + $0xe0] sm:$0xff] }
 0x685   :  { %6502 = vmatpush3.bf16.msra.mxu0 %v6501_v61  ;;  %v4220_v61 = vld [vmem:[%s11403_s15 + $0x90] sm:$0xff]  ;;  %v3518_v15 = vld [vmem:[%s11401_s13 + $0xc00] sm:$0xff]  ;;  %v6599_v56 = vpack.c.bf16 %v4231_v54, %v4230_v51 }
 0x686   :  { %6534 = vmatpush3.bf16.msra.mxu1 %v6533_v0  ;;  %6504 = vmatprep.subr.bf16.mxu0 %v6503_v2  ;;  %v4221_v0 = vld [vmem:[%s11403_s15 + $0x98] sm:$0xff]  ;;  %v3468_v2 = vld [vmem:[%s11401_s13 + $0xa70] sm:$0xff]  ;;  %v4214_v41 = vld [vmem:[%s11403_s15 + $0x60] sm:$0xff] }
 0x687   :  { %6536 = vmatprep.subr.bf16.mxu1 %v6535_v4  ;;  %v6579_v30 = vpack.c.bf16 %v4221_v0, %v4220_v61  ;;  %v4204_v4 = vld [vmem:[%s11403_s15 + $0x10] sm:$0xff]  ;;  %v6555_v8 = vpack.c.bf16 %v3473_v3, %v3468_v2  ;;  %v4234_v2 = vld [vmem:[%s11403_s15 + $0x100] sm:$0xff]  ;;  %v4235_v3 = vld [vmem:[%s11403_s15 + $0x108] sm:$0xff] }
 0x688   :  { %v6581_v9 = vpack.c.bf16 %v4205_v62, %v4204_v4  ;;  %v6609_v4 = vpack.c.bf16 %v4235_v3, %v4234_v2 }
 0x689   :  { %6506 = vmatpush3.bf16.msra.mxu0 %v6505_v11 }
 0x68a   :  { %6538 = vmatpush3.bf16.msra.mxu1 %v6537_v12  ;;  %6508 = vmatprep.subr.bf16.mxu0 %v6507_v13  ;;  %v4206_v12 = vld [vmem:[%s11403_s15 + $0x20] sm:$0xff]  ;;  %v4207_v13 = vld [vmem:[%s11403_s15 + $0x28] sm:$0xff] }
 0x68b   :  { %6540 = vmatprep.subr.bf16.mxu1 %v6539_v19  ;;  %v3488_v19 = vld [vmem:[%s11401_s13 + $0xb10] sm:$0xff]  ;;  %v6585_v22 = vpack.c.bf16 %v4207_v13, %v4206_v12  ;;  %v4239_v12 = vld [vmem:[%s11403_s15 + $0x128] sm:$0xff] }
 0x68c   :  { %v4256_v13 = vld [vmem:[%s11403_s15 + $0x1b0] sm:$0xff] }
 0x68d   :  { %6510 = vmatpush3.bf16.msra.mxu0 %v6509_v26  ;;  %v6561_v26 = vpack.c.bf16 %v3493_v21, %v3488_v19  ;;  %v4241_v19 = vld [vmem:[%s11403_s15 + $0x138] sm:$0xff]  ;;  %v4258_v21 = vld [vmem:[%s11403_s15 + $0x1c0] sm:$0xff] }
 0x68e   :  { %6542 = vmatpush3.bf16.msra.mxu1 %v6541_v49  ;;  %6512 = vmatprep.subr.bf16.mxu0 %v6511_v27  ;;  %v4226_v49 = vld [vmem:[%s11403_s15 + $0xc0] sm:$0xff]  ;;  %v4227_v27 = vld [vmem:[%s11403_s15 + $0xc8] sm:$0xff] }
 0x68f   :  { %6544 = vmatprep.subr.bf16.mxu1 %v6543_v37  ;;  %v6591_v37 = vpack.c.bf16 %v4227_v27, %v4226_v49  ;;  %v4260_v49 = vld [vmem:[%s11403_s15 + $0x1d0] sm:$0xff]  ;;  %v4261_v27 = vld [vmem:[%s11403_s15 + $0x1d8] sm:$0xff] }
 0x690   :  { %v6627_v33 = vpack.c.bf16 %v4261_v27, %v4260_v49  ;;  %v4278_v27 = vld [vmem:[%s11403_s15 + $0x260] sm:$0xff] }
 0x691   :  { %6514 = vmatpush3.bf16.msra.mxu0 %v6513_v24  ;;  %v3508_v24 = vld [vmem:[%s11401_s13 + $0xbb0] sm:$0xff] }
 0x692   :  { %6546 = vmatpush3.bf16.msra.mxu1 %v6545_v52  ;;  %6516 = vmatprep.subr.bf16.mxu0 %v6515_v6  ;;  %v3513_v52 = vld [vmem:[%s11401_s13 + $0xbd8] sm:$0xff]  ;;  %v6593_v6 = vpack.c.bf16 %v4211_v39, %v4210_v38  ;;  %v4262_v38 = vld [vmem:[%s11403_s15 + $0x1e0] sm:$0xff]  ;;  %v4263_v39 = vld [vmem:[%s11403_s15 + $0x1e8] sm:$0xff] }
 0x693   :  { %6548 = vmatprep.subr.bf16.mxu1 %v6547_v48  ;;  %v4213_v48 = vld [vmem:[%s11403_s15 + $0x58] sm:$0xff]  ;;  %v6567_v58 = vpack.c.bf16 %v3513_v52, %v3508_v24  ;;  %v6631_v24 = vpack.c.bf16 %v4263_v39, %v4262_v38  ;;  %v6601_v52 = vpack.c.bf16 %v4215_v44, %v4214_v41 }
 0x695   :  { %6518 = vmatpush3.bf16.msra.mxu0 %v6517_v55  ;;  %v3523_v55 = vld [vmem:[%s11401_s13 + $0xc28] sm:$0xff] }
 0x696   :  { %6550 = vmatpush3.bf16.msra.mxu1 %v6549_v50  ;;  %6551 = vmatprep.subr.bf16.mxu0 %v6731_v1  ;;  %v6597_v50 = vpack.c.bf16 %v4213_v48, %v4212_v23  ;;  %v6570_v47 = vpack.c.bf16 %v3523_v55, %v3518_v15  ;;  %v4232_v23 = vld [vmem:[%s11403_s15 + $0xf0] sm:$0xff]  ;;  %v4233_v48 = vld [vmem:[%s11403_s15 + $0xf8] sm:$0xff] }
 0x697   :  { %6576 = vmatprep.subr.bf16.mxu1 %v6575_v28  ;;  %v3528_v28 = vld [vmem:[%s11401_s13 + $0xc50] sm:$0xff]  ;;  %v6603_v54 = vpack.c.bf16 %v4233_v48, %v4232_v23  ;;  %v4265_v15 = vld [vmem:[%s11403_s15 + $0x1f8] sm:$0xff] }
 0x698   :  { %4052 = vmatmul.mubr.f32.vlgmr.msra.gmra.mrb[18].mxu0 %v10295_v43  ;;  %v4223_v43 = vld [vmem:[%s11403_s15 + $0xa8] sm:$0xff]  ;;  %v6573_v61 = vpack.c.bf16 %v3533_v57, %v3528_v28  ;;  %v4216_v55 = vld [vmem:[%s11403_s15 + $0x70] sm:$0xff]  ;;  %v4249_v57 = vld [vmem:[%s11403_s15 + $0x178] sm:$0xff] }
 0x699   :  { %4122 = vmatmul.mubr.f32.vlgmr.msra.gmra.mrb[26].mxu1 %v10699_v36  ;;  %6553 = vmatpush3.bf16.msra.mxu0 %v6552_v60  ;;  %v3483_v36 = vld [vmem:[%s11401_s13 + $0xae8] sm:$0xff]  ;;  %v6583_v11 = vpack.c.bf16 %v4223_v43, %v4222_v10  ;;  %v4237_v10 = vld [vmem:[%s11403_s15 + $0x118] sm:$0xff]  ;;  %v4254_v43 = vld [vmem:[%s11403_s15 + $0x1a0] sm:$0xff] }
 0x69a   :  { %6554 = vmatprep.subr.bf16.mxu0 %v6731_v1  ;;  %5160 = vmatprep.mubr.msk.f32.mxu0 %vm6732_vm1, %v6730_v7  ;;  %v6558_v16 = vpack.c.bf16 %v3483_v36, %v3478_v14  ;;  %v4251_v60 = vld [vmem:[%s11403_s15 + $0x188] sm:$0xff]  ;;  %v4248_v28 = vld [vmem:[%s11403_s15 + $0x170] sm:$0xff] }
 0x69b   :  { %6578 = vmatpush3.bf16.msra.mxu1 %v6577_v5  ;;  %v6607_v0 = vpack.c.bf16 %v4251_v60, %v4250_v59  ;;  %v4252_v5 = vld [vmem:[%s11403_s15 + $0x190] sm:$0xff]  ;;  %v4255_v14 = vld [vmem:[%s11403_s15 + $0x1a8] sm:$0xff]  ;;  %v6637_v59 = vpack.c.bf16 %v4249_v57, %v4248_v28  ;;  %v11311_v60 = vld [vmem:[%s11402_s14] sm:$0x1f] }
 0x69c   :  { %6580 = vmatprep.subr.bf16.mxu1 %v6579_v30  ;;  %v4253_v30 = vld [vmem:[%s11403_s15 + $0x198] sm:$0xff]  ;;  %v3543_v2 = vrot.slane %v11311_v60, %v7401_v31  ;;  %v3551_v3 = vrot.slane %v11311_v60, %v7423_v42 }
 0x69d   :  { %6556 = vmatpush3.bf16.msra.mxu0 %v6555_v8  ;;  %v6611_v62 = vpack.c.bf16 %v4253_v30, %v4252_v5  ;;  %v4236_v8 = vld [vmem:[%s11403_s15 + $0x110] sm:$0xff] }
 0x69e   :  { %6557 = vmatprep.subr.bf16.mxu0 %v6731_v1  ;;  %v6613_v36 = vpack.c.bf16 %v4237_v10, %v4236_v8 }
 0x69f   :  { %6582 = vmatpush3.bf16.msra.mxu1 %v6581_v9  ;;  %v6615_v9 = vpack.c.bf16 %v4255_v14, %v4254_v43  ;;  %v4266_v43 = vld [vmem:[%s11403_s15 + $0x200] sm:$0xff] }
 0x6a0   :  { %6584 = vmatprep.subr.bf16.mxu1 %v6583_v11  ;;  %v4238_v11 = vld [vmem:[%s11403_s15 + $0x120] sm:$0xff] }
 0x6a1   :  { %6559 = vmatpush3.bf16.msra.mxu0 %v6558_v16  ;;  %v6617_v16 = vpack.c.bf16 %v4239_v12, %v4238_v11  ;;  %v4268_v12 = vld [vmem:[%s11403_s15 + $0x210] sm:$0xff] }
 0x6a2   :  { %6560 = vmatprep.subr.bf16.mxu0 %v6731_v1 }
 0x6a3   :  { %6586 = vmatpush3.bf16.msra.mxu1 %v6585_v22  ;;  %v4259_v22 = vld [vmem:[%s11403_s15 + $0x1c8] sm:$0xff] }
 0x6a4   :  { %6588 = vmatprep.subr.bf16.mxu1 %v6587_v25  ;;  %v6621_v25 = vpack.c.bf16 %v4241_v19, %v4240_v18  ;;  %v6623_v35 = vpack.c.bf16 %v4259_v22, %v4258_v21  ;;  %v4272_v19 = vld [vmem:[%s11403_s15 + $0x230] sm:$0xff]  ;;  %v4274_v22 = vld [vmem:[%s11403_s15 + $0x240] sm:$0xff] }
 0x6a5   :  { %6562 = vmatpush3.bf16.msra.mxu0 %v6561_v26  ;;  %v4243_v26 = vld [vmem:[%s11403_s15 + $0x148] sm:$0xff] }
 0x6a6   :  { %6563 = vmatprep.subr.bf16.mxu0 %v6731_v1  ;;  %v6625_v32 = vpack.c.bf16 %v4243_v26, %v4242_v63  ;;  %v4276_v63 = vld [vmem:[%s11403_s15 + $0x250] sm:$0xff]  ;;  %v4277_v26 = vld [vmem:[%s11403_s15 + $0x258] sm:$0xff] }
 0x6a7   :  { %6590 = vmatpush3.bf16.msra.mxu1 %v6589_v34  ;;  %v4244_v34 = vld [vmem:[%s11403_s15 + $0x150] sm:$0xff]  ;;  %v6655_v49 = vpack.c.bf16 %v4277_v26, %v4276_v63 }
 0x6a8   :  { %6592 = vmatprep.subr.bf16.mxu1 %v6591_v37  ;;  %v4245_v37 = vld [vmem:[%s11403_s15 + $0x158] sm:$0xff] }
 0x6a9   :  { %6565 = vmatpush3.bf16.msra.mxu0 %v6564_v40  ;;  %v6629_v40 = vpack.c.bf16 %v4245_v37, %v4244_v34  ;;  %v3555_v37 = vrot.slane %v11311_v60, %v7969_v46  ;;  %v4533_v46 = vld [vmem:[%s11404_s16] ss:$0 sm:$0xff]  ;;  %s6706_s16 = scalar_lea.vmem %s4516_s28, 32 }
 0x6aa   :  { %6566 = vmatprep.subr.bf16.mxu0 %v6731_v1  ;;  %p6707_p0 = scmp.ne.s32.totalorder %s4516_s28, %s6706_s16  ;;  %p6712_p2 = scmp.lt.s32.totalorder %s6706_s16, %s6706_s16 }
 0x6ab   :  { %6594 = vmatpush3.bf16.msra.mxu1 %v6593_v6  ;;  %v4246_v6 = vld [vmem:[%s11403_s15 + $0x160] sm:$0xff] }
 0x6ac   :  { %6596 = vmatprep.subr.bf16.mxu1 %v6595_v45  ;;  %v4247_v45 = vld [vmem:[%s11403_s15 + $0x168] sm:$0xff]  ;;  %p6713_p3 = por %p6712_p2, %p6711_p1 }
 0x6ad   :  { %6568 = vmatpush3.bf16.msra.mxu0 %v6567_v58  ;;  %v4264_v58 = vld [vmem:[%s11403_s15 + $0x1f0] sm:$0xff]  ;;  %v6633_v51 = vpack.c.bf16 %v4247_v45, %v4246_v6 }
 0x6ae   :  { %6569 = vmatprep.subr.bf16.mxu0 %v6731_v1  ;;  %p6714_p4 = pnand %p6713_p3, %p6707_p0 }
 0x6af   :  { %6598 = vmatpush3.bf16.msra.mxu1 %v6597_v50  ;;  %v4217_v50 = vld [vmem:[%s11403_s15 + $0x78] sm:$0xff] }
 0x6b0   :  { %6600 = vmatprep.subr.bf16.mxu1 %v6599_v56  ;;  %v6635_v56 = vpack.c.bf16 %v4265_v15, %v4264_v58 }
 0x6b1   :  { %6571 = vmatpush3.bf16.msra.mxu0 %v6570_v47  ;;  %v6605_v47 = vpack.c.bf16 %v4217_v50, %v4216_v55 }
 0x6b2   :  { %6572 = vmatprep.subr.bf16.mxu0 %v6731_v1 }
 0x6b3   :  { %6602 = vmatpush3.bf16.msra.mxu1 %v6601_v52 }
 0x6b4   :  { %6604 = vmatprep.subr.bf16.mxu1 %v6603_v54 }
 0x6b5   :  { %6574 = vmatpush3.bf16.msra.mxu0 %v6573_v61  ;;  %v3539_v61 = vrot.slane %v11311_v60, %v7393_v29  ;;  %v4267_v29 = vld [vmem:[%s11403_s15 + $0x208] sm:$0xff] }
 0x6b6   :  { %6608 = vmatprep.subr.bf16.mxu0 %v6607_v0  ;;  %v3547_v0 = vrot.slane %v11311_v60, %v7765_v53 }
 0x6b7   :  { %6606 = vmatpush3.bf16.msra.mxu1 %v6605_v47 }
 0x6b8   :  { %5161 = vmatmul.mubr.f32.vlgmr.msra.gmra.mrb[20].mxu0 %v10892_v20  ;;  %v4257_v20 = vld [vmem:[%s11403_s15 + $0x1b8] sm:$0xff]  ;;  %6639 = vmatprep.subr.bf16.mxu1 %v6731_v1 }
 0x6b9   :  { %6610 = vmatpush3.bf16.msra.mxu0 %v6609_v4  ;;  %v6619_v17 = vpack.c.bf16 %v4257_v20, %v4256_v13  ;;  %v4269_v13 = vld [vmem:[%s11403_s15 + $0x218] sm:$0xff] }
 0x6ba   :  { %6612 = vmatprep.subr.bf16.mxu0 %v6611_v62  ;;  %v6643_v20 = vpack.c.bf16 %v4269_v13, %v4268_v12 }
 0x6bd   :  { %6614 = vmatpush3.bf16.msra.mxu0 %v6613_v36 }
 0x6be   :  { %6616 = vmatprep.subr.bf16.mxu0 %v6615_v9  ;;  %v6640_v9 = vpack.c.bf16 %v4267_v29, %v4266_v43 }
 0x6c1   :  { %6618 = vmatpush3.bf16.msra.mxu0 %v6617_v16  ;;  %v4270_v16 = vld [vmem:[%s11403_s15 + $0x220] sm:$0xff] }
 0x6c2   :  { %6620 = vmatprep.subr.bf16.mxu0 %v6619_v17  ;;  %v4271_v17 = vld [vmem:[%s11403_s15 + $0x228] sm:$0xff] }
 0x6c3   :  { %v6646_v18 = vpack.c.bf16 %v4271_v17, %v4270_v16 }
 0x6c5   :  { %6622 = vmatpush3.bf16.msra.mxu0 %v6621_v25  ;;  %v4275_v25 = vld [vmem:[%s11403_s15 + $0x248] sm:$0xff] }
 0x6c6   :  { %6624 = vmatprep.subr.bf16.mxu0 %v6623_v35  ;;  %v6652_v35 = vpack.c.bf16 %v4275_v25, %v4274_v22 }
 0x6c9   :  { %6626 = vmatpush3.bf16.msra.mxu0 %v6625_v32  ;;  %v4279_v32 = vld [vmem:[%s11403_s15 + $0x268] sm:$0xff] }
 0x6ca   :  { %6628 = vmatprep.subr.bf16.mxu0 %v6627_v33  ;;  %v6658_v33 = vpack.c.bf16 %v4279_v32, %v4278_v27 }
 0x6cd   :  { %6630 = vmatpush3.bf16.msra.mxu0 %v6629_v40 }
 0x6ce   :  { %6632 = vmatprep.subr.bf16.mxu0 %v6631_v24 }
 0x6d1   :  { %6634 = vmatpush3.bf16.msra.mxu0 %v6633_v51 }
 0x6d2   :  { %6636 = vmatprep.subr.bf16.mxu0 %v6635_v56 }
 0x6d5   :  { %6638 = vmatpush3.bf16.msra.mxu0 %v6637_v59 }
 0x74b   :  { %v3769_v5 = vpop.f32.mrb[16].mxu0  ;;  %v3982_v30 = vpop.f32.mrb[24].mxu1 }
 0x74c   :  { %v6670_v4 = vadd.f32 %v3769_v5, %v3539_v61  ;;  %v6672_v62 = vadd.f32 %v3982_v30, %v3547_v0  ;;  %v3771_v8 = vpop.f32.mrb[17].mxu0  ;;  %v3984_v10 = vpop.f32.mrb[25].mxu1 }
 0x74d   :  { %v6671_v53 = vadd.f32 %v3771_v8, %v3543_v2  ;;  %v6673_v14 = vadd.f32 %v3984_v10, %v3551_v3 }
 0x74e   :  { %v4197_v42 = vmax.f32 %v6670_v4, 0.0  ;;  %v4199_v11 = vmax.f32 %v6672_v62, 0.0 }
 0x74f   :  { %v4198_v31 = vmax.f32 %v6671_v53, 0.0  ;;  %v4200_v36 = vmax.f32 %v6673_v14, 0.0 }
 0x751   :  { %4355 = vmatprep.mubr.f32.mxu1 %v4198_v31  ;;  %4425 = vmatprep.mubr.f32.mxu0 %v4200_v36 }
 0x752   :  { %4356 = vmatmul.mubr.f32.vlgmr.msra.gmra.mrb[28].mxu1 %v4197_v42  ;;  %4426 = vmatmul.mubr.f32.vlgmr.msra.gmra.mrb[22].mxu0 %v4199_v11 }
 0x753   :  { %6641 = vmatpush3.bf16.msra.mxu1 %v6640_v9  ;;  %5191 = vmatprep.mubr.msk.f32.mxu1 %vm6732_vm1, %v6730_v7  ;;  %v4273_v7 = vld [vmem:[%s11403_s15 + $0x238] sm:$0xff] }
 0x754   :  { %6642 = vmatprep.subr.bf16.mxu1 %v6731_v1  ;;  %v6649_v21 = vpack.c.bf16 %v4273_v7, %v4272_v19 }
 0x757   :  { %6644 = vmatpush3.bf16.msra.mxu1 %v6643_v20 }
 0x758   :  { %6645 = vmatprep.subr.bf16.mxu1 %v6731_v1 }
 0x75b   :  { %6647 = vmatpush3.bf16.msra.mxu1 %v6646_v18 }
 0x75c   :  { %6648 = vmatprep.subr.bf16.mxu1 %v6731_v1 }
 0x75f   :  { %6650 = vmatpush3.bf16.msra.mxu1 %v6649_v21 }
 0x760   :  { %6651 = vmatprep.subr.bf16.mxu1 %v6731_v1 }
 0x763   :  { %6653 = vmatpush3.bf16.msra.mxu1 %v6652_v35 }
 0x764   :  { %6654 = vmatprep.subr.bf16.mxu1 %v6731_v1 }
 0x767   :  { %6656 = vmatpush3.bf16.msra.mxu1 %v6655_v49 }
 0x768   :  { %6657 = vmatprep.subr.bf16.mxu1 %v6731_v1 }
 0x76b   :  { %v4846_v34 = vpop.f32.mrb[18].mxu0  ;;  %6659 = vmatpush3.bf16.msra.mxu1 %v6658_v33 }
 0x76c   :  { %v4881_v38 = vpop.f32.mrb[26].mxu1  ;;  %v4847_v39 = vpop.f32.mrb[19].mxu0 }
 0x76d   :  { %v4848_v40 = vadd.f32 %v4847_v39, %v4846_v34  ;;  %v4882_v41 = vpop.f32.mrb[27].mxu1 }
 0x76e   :  { %v4883_v44 = vadd.f32 %v4882_v41, %v4881_v38 }
 0x76f   :  { %v4054_v24 = vadd.f32 %v4848_v40, %v3555_v37 }
 0x771   :  { %v4124_v52 = vadd.f32 %v4883_v44, %v4054_v24 }
 0x78b   :  { %v4193_v6 = vpop.f32.mrb[20].mxu0 }
 0x78c   :  { %v4194_v45 = vadd.f32 %v4193_v6, %v4124_v52  ;;  %v5162_v23 = vpop.f32.mrb[21].mxu0 }
 0x78e   :  { %v4201_v48 = vmax.f32 %v4194_v45, 0.0 }
 0x790   :  { %5192 = vmatmul.mubr.msk.f32.vlgmr.msra.gmra.mrb[30].mxu1 %vm4287_vm4, %v4201_v48 }
 0x825   :  { %v4933_v58 = vpop.f32.mrb[28].mxu1  ;;  %v4968_v1 = vpop.f32.mrb[22].mxu0 }
 0x826   :  { %v4934_v51 = vpop.f32.mrb[29].mxu1  ;;  %v4969_v54 = vpop.f32.mrb[23].mxu0 }
 0x827   :  { %v4935_v15 = vadd.f32 %v4934_v51, %v4933_v58  ;;  %v4970_v55 = vadd.f32 %v4969_v54, %v4968_v1 }
 0x829   :  { %v4358_v50 = vadd.f32 %v4935_v15, %v4533_v46 }
 0x82b   :  { %v4428_v56 = vadd.f32 %v4970_v55, %v4358_v50 }
 0x863   :  { %v4497_v47 = vpop.f32.mrb[30].mxu1 }
 0x864   :  { %v4498_v28 = vadd.f32 %v4497_v47, %v4428_v56  ;;  %v5193_v57 = vpop.f32.mrb[31].mxu1 }
 0x866   :  { %v4535_v59 = vmul.f32 -1.442695, %v4498_v28 }
 0x868   :  { %6702 = vpow2.f32 %v4535_v59 }
 0x872   :  { %v6703_v60 = vpop.eup %6702 }
 0x873   :  { %v4504_v61 = vadd.f32 1.0, %v6703_v60 }
 0x875   :  { %6704 = vrcp.f32 %v4504_v61 }
 0x87f   :  { %v6705_v0 = vpop.eup %6704 }
 0x880   :  { %4508 = vst.msk [vmem:[#allocation2] sm:$0x3] %vm4507_vm5, %v6705_v0 }
 0x881   :  { %6717 = shalt.err (!%p6714_p4)
}
 0x882   :  { %s6718_s30 = scalar_lea.hbm %s11405_s17, 32 }
 0x883   :  { %p6719_p5 = scmp.ne.s32.totalorder %s11405_s17, %s6718_s30  ;;  %p6722_p6 = scmp.lt.u32.totalorder %s6718_s30, %s11405_s17 }
 0x885   :  { %p6724_p7 = pnand %p6722_p6, %p6719_p5 }
 0x887   :  { %6727 = shalt.err (!%p6724_p7)
}
 0x888   :  { %4518 = dma.vmem_to_hbm [thread:$0]  %s4516_s28, 32, %s11405_s17, [#allocation3]  }
 0x889   :  { %6728 = dma.done.wait [#allocation3], 32  }
 0x88a   :  { %6729 = vsyncadd [#allocation3], 4294967264 }
 0x88b   :  { %4522 = vsyncpa [#allocation3], 1 }

</bundles_post_ra>
